<compile_context>
chip_gen: v6e
topology: v6e:2x2x1
jax: 0.10.0
libtpu: 0.0.40
codegen_flags: <defaults>
</compile_context>

<pallas_src>
import jax
import jax.numpy as jnp
from jax import lax
from jax.experimental import pallas as pl
from jax.experimental.pallas import tpu as pltpu

FULL_BOND_FEATURE_DIMS = [5, 6, 2, 2]
OFFSETS = [0, 5, 11, 13]          # cumulative row offsets in the fused table
ROWS_PER_EDGE = 16                 # 5+6+2+2 = 15, padded to 16 (row 15 is zero)
NUM_FEATS = 4


def _round_up(x, m):
    return ((x + m - 1) // m) * m


def _make_kernel(k, chunk, nchunks, out_dtype):
    """Kernel for k edges packed per output row, processed in row sub-chunks."""
    rows = ROWS_PER_EDGE * k
    # Python-int column offsets -> scalar constants inside the kernel (Pallas
    # rejects captured array constants).
    col_offsets = [OFFSETS[c % NUM_FEATS] + ROWS_PER_EDGE * (c // NUM_FEATS)
                   for c in range(NUM_FEATS * k)]

    def kernel(edge_ref, table_ref, out_ref):
        # edge_ref : (TR, 4k) int8    k packed edges per row
        # table_ref: (16k, kD) f32    block-diagonal fused table
        # out_ref  : (TR, kD)  out_dtype
        tbl = table_ref[...]
        # Loop-invariant: build once, not per chunk (no CSE for broadcasts).
        col_iota = lax.broadcasted_iota(jnp.int32, (chunk, rows), 1)

        # Static, fully-unrolled chunk loop (nchunks is a small Python int);
        # keeps the (chunk, 16k) intermediates small instead of materializing
        # a (TR, 16k) slab in VMEM.
        for c in range(nchunks):
            r0 = c * chunk
            idx = edge_ref[pl.ds(r0, chunk), :].astype(jnp.int32)   # (chunk, 4k)
            # The 4k one-hot masks hit disjoint columns -> boolean OR, one cast.
            mh = col_iota == (idx[:, 0:1] + col_offsets[0])
            for f in range(1, NUM_FEATS * k):
                mh = mh | (col_iota == (idx[:, f:f + 1] + col_offsets[f]))
            # MXU: (chunk, 16k) @ (16k, kD) == per-edge sum of 4 embedding rows.
            # HIGHEST precision so the table is not bf16-rounded (exactness).
            acc = jnp.dot(mh.astype(jnp.float32), tbl,
                          preferred_element_type=jnp.float32,
                          precision=lax.Precision.HIGHEST)
            out_ref[pl.ds(r0, chunk), :] = acc.astype(out_dtype)

    return kernel


def bond_encoder(edge_attr, fused_table, *, te=None, out_dtype=jnp.float32,
                 chunk_rows=512):
    """edge_attr: (E, 4) int; fused_table: (16, D) f32 -> (E, D) out_dtype."""
    E, F = edge_attr.shape
    assert F == NUM_FEATS
    D = fused_table.shape[1]
    out_itemsize = jnp.dtype(out_dtype).itemsize

    # int8 indices (all values < 16).  Callers should pass int8 directly to
    # avoid this cast materializing an extra pass over edge_attr.
    if edge_attr.dtype != jnp.int8:
        edge_attr = edge_attr.astype(jnp.int8)

    # Lane-dense packing factor: k edges per output row so last dim = k*D is a
    # multiple of 128.  k=1 fallback: D % 128 == 0 is already lane dense; an
    # awkward D (e.g. 300 or 100) keeps full-D blocks (correct; tail lanes use
    # masked stores — acceptable vs. writing up-to-28% padded output bytes).
    if D < 128 and 128 % D == 0:
        k = 128 // D
    else:
        k = 1

    # Pad only to a multiple of k (<= k-1 edges); the ragged last grid block
    # is handled by pl.cdiv, so no pad-to-tile writeback waste.
    E_pad = _round_up(E, k)
    if E_pad != E:
        edge_attr = jnp.pad(edge_attr, ((0, E_pad - E), (0, 0)))
    R = E_pad // k
    kD = k * D

    edges_packed = edge_attr.reshape(R, NUM_FEATS * k)              # (R, 4k) int8
    if k > 1:
        # Block-diagonal fused table (k copies of the (16, D) table).
        table = jnp.kron(jnp.eye(k, dtype=fused_table.dtype), fused_table)
    else:
        table = fused_table                                          # (16, D)

    # --- tile-size selection -------------------------------------------------
    if te is None:
        # ~8 MiB of output per grid step: the 0.35 us/step pipeline overhead is
        # <10% of a step even at v7x's 3.2 TB/s, and 2x(in+out) double buffers
        # stay well inside the 32 MiB scoped default / v7x's 64 MiB physical.
        te = max(1024, (8 << 20) // (D * out_itemsize))              # edges/step

    TR = max(8, te // k)                                             # rows/step
    # Guarantee >= 2 grid steps when there is enough work so the "parallel"
    # grid axis can be spread over both v7x TensorCores (a 1-step grid runs on
    # a single TC).  Costs at most one extra ~0.35 us step on v5e/v6e.
    if R >= 64:
        TR = min(TR, _round_up((R + 1) // 2, 32))
    # Chunk the step: chunk is a multiple of 32 rows (int8 sublane tiling) and
    # divides TR exactly.
    nchunks = max(1, -(-TR // chunk_rows))
    chunk = _round_up(-(-TR // nchunks), 32)
    TR = chunk * nchunks

    grid = (pl.cdiv(R, TR),)

    # VMEM accounting (double-buffered, with the lane padding of the narrow
    # index block made explicit):
    #   index block : TR x 4k int8  -> pads to TR x 128 x 1 B
    #   output block: TR x max(kD, 128) x itemsize
    #   table       : 16k x kD x 4 B
    # plus a few hundred KiB of per-chunk intermediates (mh / iota are built
    # per `chunk` rows, not per TR rows, precisely so they stay small).
    vmem_bytes = (2 * TR * 128 * 1
                  + 2 * TR * max(kD, 128) * out_itemsize
                  + 2 * ROWS_PER_EDGE * k * max(kD, 128) * 4
                  + (4 << 20))
    vmem_limit_bytes = int(max(vmem_bytes, 32 << 20))

    out = pl.pallas_call(
        _make_kernel(k, chunk, nchunks, out_dtype),
        out_shape=jax.ShapeDtypeStruct((R, kD), out_dtype),
        grid_spec=pltpu.PrefetchScalarGridSpec(
            num_scalar_prefetch=0,
            grid=grid,
            in_specs=[
                pl.BlockSpec((TR, NUM_FEATS * k), lambda i: (i, 0)),
                # Constant block index across the grid -> not re-DMA'd per step.
                pl.BlockSpec((ROWS_PER_EDGE * k, kD), lambda i: (0, 0)),
            ],
            out_specs=pl.BlockSpec((TR, kD), lambda i: (i, 0)),
        ),
        compiler_params=pltpu.CompilerParams(
            dimension_semantics=("parallel",),
            vmem_limit_bytes=vmem_limit_bytes,
        ),
    )(edges_packed, table)

    # (R, kD) and (E_pad, D) are bit-identical row-major -> free reshape.
    out = out.reshape(E_pad, D)
    if E_pad != E:
        out = out[:E]          # <= k-1 padded rows; copy only when E % k != 0
    return out


def init_fused_table(key, emb_dim):
    """xavier_uniform init for each embedding table, fused into (16, D)."""
    tables = []
    for kk, dim in zip(jax.random.split(key, len(FULL_BOND_FEATURE_DIMS)),
                       FULL_BOND_FEATURE_DIMS):
        bound = (6.0 / (emb_dim + dim)) ** 0.5
        tables.append(jax.random.uniform(kk, (dim, emb_dim), jnp.float32,
                                         minval=-bound, maxval=bound))
    fused = jnp.concatenate(tables, axis=0)                    # (15, D)
    fused = jnp.pad(fused, ((0, ROWS_PER_EDGE - fused.shape[0]), (0, 0)))
    return fused                                               # (16, D)


def bond_encoder_ref(edge_attr, fused_table):
    """Pure-JAX reference matching the PyTorch forward."""
    idx = edge_attr.astype(jnp.int32)
    out = 0
    for i, off in enumerate(OFFSETS):
        out = out + fused_table[idx[:, i] + off]
    return out


if __name__ == "__main__":
    key = jax.random.PRNGKey(0)
    k_tab, k_idx = jax.random.split(key)

    def make_edges(kidx, E):
        cols = []
        for kc, dim in zip(jax.random.split(kidx, NUM_FEATS),
                           FULL_BOND_FEATURE_DIMS):
            cols.append(jax.random.randint(kc, (E, 1), 0, dim, dtype=jnp.int32))
        return jnp.concatenate(cols, axis=1).astype(jnp.int8)   # (E, 4) int8

    # Case 1: D=64 (k=2 lane-dense packing), odd E (pad-by-1 + tiny slice),
    # auto tile (>= 2 grid steps, ragged last block).
    E, D = 777, 64
    table64 = init_fused_table(k_tab, D)
    edges = make_edges(k_idx, E)
    ref = bond_encoder_ref(edges, table64)
    out = jax.block_until_ready(bond_encoder(edges, table64))
    assert out.shape == (E, D) and out.dtype == jnp.float32
    assert jnp.allclose(out, ref, atol=1e-5), "mismatch (default tile)"

    # Case 2: tiny explicit tile -> many grid steps + ragged last block.
    out_small = jax.block_until_ready(bond_encoder(edges, table64, te=128))
    assert jnp.allclose(out_small, ref, atol=1e-5), "mismatch (te=128)"

    # Case 3: bf16 output path (halves the dominant writeback traffic).
    out_bf16 = jax.block_until_ready(
        bond_encoder(edges, table64, out_dtype=jnp.bfloat16))
    assert out_bf16.shape == (E, D) and out_bf16.dtype == jnp.bfloat16
    assert jnp.allclose(out_bf16.astype(jnp.float32), ref,
                        atol=2e-2, rtol=2e-2), "mismatch (bf16 out)"

    # Case 4: D=100 (k=1 fallback, masked-store tail), E multiple of 16
    # (no pad, no trailing slice).
    E2, D2 = 640, 100
    table100 = init_fused_table(k_tab, D2)
    edges2 = make_edges(k_idx, E2)
    ref2 = bond_encoder_ref(edges2, table100)
    out2 = jax.block_until_ready(bond_encoder(edges2, table100))
    assert out2.shape == (E2, D2)
    assert jnp.allclose(out2, ref2, atol=1e-5), "mismatch (D=100 fallback)"

    print("KERNEL_OK")
</pallas_src>

<mosaic_0001>
module attributes {stable_mosaic.version = 11 : i64} {
  func.func @kernel(%arg0: i32, %arg1: memref<224x8xi8, #tpu.memory_space<vmem>>, %arg2: memref<32x128xf32, #tpu.memory_space<vmem>>, %arg3: memref<224x128xf32, #tpu.memory_space<vmem>>) attributes {dimension_semantics = [#tpu.dimension_semantics<parallel>], iteration_bounds = array<i64: 2>, scalar_prefetch = 0 : i64, scratch_operands = 0 : i64, tpu.core_type = #tpu.core_type<tc>, window_params = [{transform_indices = @transform_0, window_bounds = array<i64: 224, 8>}, {pipeline_mode = #tpu.pipeline_mode<synchronous>, transform_indices = @transform_1, window_bounds = array<i64: 32, 128>}, {transform_indices = @transform_2, window_bounds = array<i64: 224, 128>}]} {
    %c0 = arith.constant 0 : index
    %c0_0 = arith.constant 0 : index
    %0 = vector.load %arg2[%c0, %c0_0] : memref<32x128xf32, #tpu.memory_space<vmem>>, vector<32x128xf32>
    %1 = tpu.iota {dimensions = array<i32: 1>} : vector<224x32xi32>
    %c0_1 = arith.constant 0 : index
    %c0_2 = arith.constant 0 : index
    %2 = vector.load %arg1[%c0_1, %c0_2] : memref<224x8xi8, #tpu.memory_space<vmem>>, vector<224x8xi8>
    %3 = arith.extsi %2 : vector<224x8xi8> to vector<224x8xi32>
    %4 = vector.extract_strided_slice %3 {offsets = [0, 0], sizes = [224, 1], strides = [1, 1]} : vector<224x8xi32> to vector<224x1xi32>
    %c0_i32 = arith.constant 0 : i32
    %5 = vector.broadcast %c0_i32 : i32 to vector<224x1xi32>
    %6 = arith.addi %4, %5 : vector<224x1xi32>
    %7 = vector.broadcast %6 : vector<224x1xi32> to vector<224x32xi32>
    %8 = arith.cmpi eq, %1, %7 : vector<224x32xi32>
    %9 = vector.extract_strided_slice %3 {offsets = [0, 1], sizes = [224, 1], strides = [1, 1]} : vector<224x8xi32> to vector<224x1xi32>
    %c5_i32 = arith.constant 5 : i32
    %10 = vector.broadcast %c5_i32 : i32 to vector<224x1xi32>
    %11 = arith.addi %9, %10 : vector<224x1xi32>
    %12 = vector.broadcast %11 : vector<224x1xi32> to vector<224x32xi32>
    %13 = arith.cmpi eq, %1, %12 : vector<224x32xi32>
    %14 = arith.ori %8, %13 : vector<224x32xi1>
    %15 = vector.extract_strided_slice %3 {offsets = [0, 2], sizes = [224, 1], strides = [1, 1]} : vector<224x8xi32> to vector<224x1xi32>
    %c11_i32 = arith.constant 11 : i32
    %16 = vector.broadcast %c11_i32 : i32 to vector<224x1xi32>
    %17 = arith.addi %15, %16 : vector<224x1xi32>
    %18 = vector.broadcast %17 : vector<224x1xi32> to vector<224x32xi32>
    %19 = arith.cmpi eq, %1, %18 : vector<224x32xi32>
    %20 = arith.ori %14, %19 : vector<224x32xi1>
    %21 = vector.extract_strided_slice %3 {offsets = [0, 3], sizes = [224, 1], strides = [1, 1]} : vector<224x8xi32> to vector<224x1xi32>
    %c13_i32 = arith.constant 13 : i32
    %22 = vector.broadcast %c13_i32 : i32 to vector<224x1xi32>
    %23 = arith.addi %21, %22 : vector<224x1xi32>
    %24 = vector.broadcast %23 : vector<224x1xi32> to vector<224x32xi32>
    %25 = arith.cmpi eq, %1, %24 : vector<224x32xi32>
    %26 = arith.ori %20, %25 : vector<224x32xi1>
    %27 = vector.extract_strided_slice %3 {offsets = [0, 4], sizes = [224, 1], strides = [1, 1]} : vector<224x8xi32> to vector<224x1xi32>
    %c16_i32 = arith.constant 16 : i32
    %28 = vector.broadcast %c16_i32 : i32 to vector<224x1xi32>
    %29 = arith.addi %27, %28 : vector<224x1xi32>
    %30 = vector.broadcast %29 : vector<224x1xi32> to vector<224x32xi32>
    %31 = arith.cmpi eq, %1, %30 : vector<224x32xi32>
    %32 = arith.ori %26, %31 : vector<224x32xi1>
    %33 = vector.extract_strided_slice %3 {offsets = [0, 5], sizes = [224, 1], strides = [1, 1]} : vector<224x8xi32> to vector<224x1xi32>
    %c21_i32 = arith.constant 21 : i32
    %34 = vector.broadcast %c21_i32 : i32 to vector<224x1xi32>
    %35 = arith.addi %33, %34 : vector<224x1xi32>
    %36 = vector.broadcast %35 : vector<224x1xi32> to vector<224x32xi32>
    %37 = arith.cmpi eq, %1, %36 : vector<224x32xi32>
    %38 = arith.ori %32, %37 : vector<224x32xi1>
    %39 = vector.extract_strided_slice %3 {offsets = [0, 6], sizes = [224, 1], strides = [1, 1]} : vector<224x8xi32> to vector<224x1xi32>
    %c27_i32 = arith.constant 27 : i32
    %40 = vector.broadcast %c27_i32 : i32 to vector<224x1xi32>
    %41 = arith.addi %39, %40 : vector<224x1xi32>
    %42 = vector.broadcast %41 : vector<224x1xi32> to vector<224x32xi32>
    %43 = arith.cmpi eq, %1, %42 : vector<224x32xi32>
    %44 = arith.ori %38, %43 : vector<224x32xi1>
    %45 = vector.extract_strided_slice %3 {offsets = [0, 7], sizes = [224, 1], strides = [1, 1]} : vector<224x8xi32> to vector<224x1xi32>
    %c29_i32 = arith.constant 29 : i32
    %46 = vector.broadcast %c29_i32 : i32 to vector<224x1xi32>
    %47 = arith.addi %45, %46 : vector<224x1xi32>
    %48 = vector.broadcast %47 : vector<224x1xi32> to vector<224x32xi32>
    %49 = arith.cmpi eq, %1, %48 : vector<224x32xi32>
    %50 = arith.ori %44, %49 : vector<224x32xi1>
    %51 = arith.extui %50 : vector<224x32xi1> to vector<224x32xi32>
    %52 = arith.sitofp %51 : vector<224x32xi32> to vector<224x32xf32>
    %cst = arith.constant dense<0.000000e+00> : vector<224x128xf32>
    %53 = tpu.matmul %52, %0, %cst {dimension_numbers = #tpu.dot_dimension_numbers<[1], [0], [0], [1], [0, 0, 1, 1], [], []>, precision = #tpu.contract_precision<fp32>} : vector<224x32xf32>, vector<32x128xf32>, vector<224x128xf32> -> vector<224x128xf32>
    %c0_3 = arith.constant 0 : index
    %c0_4 = arith.constant 0 : index
    %54 = vector.load %arg3[%c0_3, %c0_4] : memref<224x128xf32, #tpu.memory_space<vmem>>, vector<224x128xf32>
    tpu.vector_store %arg3[%c0_3, %c0_4], %53 {strides = array<i32>} : memref<224x128xf32, #tpu.memory_space<vmem>>, vector<224x128xf32>,
    return
  }
  func.func @transform_0(%arg0: i32) -> (i32, i32) {
    %c0_i32 = arith.constant 0 : i32
    %c0_i32_0 = arith.constant 0 : i32
    return %arg0, %c0_i32 : i32, i32
  }
  func.func @transform_1(%arg0: i32) -> (i32, i32) {
    %c0_i32 = arith.constant 0 : i32
    %c0_i32_0 = arith.constant 0 : i32
    %c0_i32_1 = arith.constant 0 : i32
    return %c0_i32, %c0_i32_0 : i32, i32
  }
  func.func @transform_2(%arg0: i32) -> (i32, i32) {
    %c0_i32 = arith.constant 0 : i32
    %c0_i32_0 = arith.constant 0 : i32
    return %arg0, %c0_i32 : i32, i32
  }
}

</mosaic_0001>

<bundles_post_ra>
// kernel: tpu_custom_call.1
= control target key start
LH: loop header
LB: loop body
LE: loop exit
PB: predicated region body
PF: predicated region fallthrough
CT: control target
= control target key end

     0   :  { %7 = vsyncpa [#allocation3], 0  ;;  %s6541_s0 = inlined_call_operand.vmem [shape: s8[389,8], index: 0, kind: input, shape index: {}]   ;;  %s6542_s1 = inlined_call_operand.vmem [shape: f32[32,128], index: 1, kind: input, shape index: {}]   ;;  %s6543_s2 = inlined_call_operand.hbm [shape: f32[389,128], index: 2, kind: output, shape index: {}]  }
   0x1   :  { %9 = vsyncpa [#allocation3 + $0x1], 0  ;;  %s4312_s9 = smov 0   ;;  %s4314_s10 = smov 0  }
   0x2   :  { %s4316_s11 = smov 0   ;;  %s4318_s12 = smov 0  }
   0x3 LB: > { %s4333_s13 = sadd.s32 4294967295, %s4283_s12   ;;  %s3416_s14 = sadd.s32 4294967294, %s4283_s12   ;;  %s4283_s12 = sphi %s4318_s12, %s7150_s12   ;;  %s4279_s11 = sphi %s4316_s11, %s7149_s11   ;;  %s4275_s10 = sphi %s4314_s10, %s7148_s10   ;;  %s4271_s9 = sphi %s4312_s9, %s7147_s9  }
   0x4   : > { %s4337_s15 = sadd.s32 1, %s4283_s12   ;;  %s69_s16 = sadd.s32 1, %s4279_s11 }
   0x5   : > { %s66_s17 = ssub.s32 %s4283_s12, %s4337_s15  ;;  %p79_p0 = scmp.ne.s32.totalorder %s4279_s11, %s4275_s10 }
   0x6   : > { %p67_p1 = scmp.eq.s32.totalorder %s66_s17, 0  ;;  %p80_p2 = scmp.eq.s32.totalorder %s4333_s13, 1 }
   0x7   : > { %p85_p3 = scmp.ne.s32.totalorder %s4275_s10, %s4271_s9  ;;  %p86_p4 = scmp.eq.s32.totalorder %s3416_s14, 1 }
   0x8   : > { %s4348_s18 = scalar_select %p67_p1, %s4279_s11, %s69_s16  }
   0x9   : > { %p4350_p5 = por %p80_p2, %p79_p0  ;;  %p4354_p6 = por %p86_p4, %p85_p3 }
   0xa   : > { %p3419_p7 = scmp.ge.s32.totalorder %s4283_s12, 1  ;;  %p124_p8 = scmp.lt.s32.totalorder %s4283_s12, 3 }
   0xc   : > { %p125_p9 = pnand %p3419_p7, %p124_p8 }
   0xe   : > { %128 = sbr.rel (%p125_p9) target bundleno = 1088 (0x440), region = 28 }
  0x13   : > { %s4361_s21 = smul.u32 28, %s4333_s13  ;;  %v4285_v0 = vmov 0   ;;  %v4286_v38 = vmov 1   ;;  %s147_s7 = sand.u32 1, %s4275_s10  }
  0x14   : > { %4153 = vset.pattern.permute.xlu1 %v4285_v0  ;;  %4152 = vset.pattern.permute.xlu0 %v4285_v0  ;;  %s4102_s8 = smul.u32 224, %s147_s7  ;;  %s6481_s16 = scalar_lea.sflag [#allocation3], %s147_s7 }
  0x15   : > { %p155_p10 = scmp.lt.s32.totalorder %s4361_s21, 48  ;;  %s3343_s17 = ssub.s32 (%p4350_p5), 49, %s4361_s21 }
  0x16   : > { %s6380_s14 = scalar_lea.vmem [#allocation2], %s4102_s8  ;;  %p3344_p11 = scmp.lt.s32.totalorder (%p4350_p5), %s3343_s17, 28 }
  0x17   : > { %s156_s22 = scalar_select %p155_p10, %s4361_s21, 48 }
  0x19   : > { %s3420_s23 = sshll.u32 %s156_s22, 1 }
  0x1a   : > { %s4368_s26 = scalar_lea.vmem %s6541_s0, %s3420_s23 }
  0x1b   : > { %v4089_v1 = vld [vmem:[%s4368_s26 + $0x4] sm:$0xff]   ;;  %v3542_v2 = vld [vmem:[%s4368_s26] ss:$52 sps:$4 sm:$0xff]   ;;  %v4091_v9 = vld [vmem:[%s4368_s26 + $0xc] sm:$0xff]  }
  0x1c   : > { %v4372_v3 = vunpack.c.0.s8 %v4089_v1  ;;  %v4374_v4 = vunpack.c.0.s8 %v3542_v2  ;;  %v4378_v5 = vunpack.c.1.s8 %v4089_v1  ;;  %v4380_v6 = vunpack.c.1.s8 %v3542_v2  ;;  %v4093_v14 = vld [vmem:[%s4368_s26 + $0x14] sm:$0xff]   ;;  %v4095_v19 = vld [vmem:[%s4368_s26 + $0x1c] sm:$0xff]   ;;  %v4097_v24 = vld [vmem:[%s4368_s26 + $0x24] sm:$0xff]  }
  0x1d   : > { %v4384_v7 = vunpack.c.3.s8 %v4089_v1  ;;  %v4386_v8 = vunpack.c.2.s8 %v4089_v1  ;;  %v4391_v10 = vunpack.c.1.s8 %v4091_v9  ;;  %v4393_v11 = vunpack.c.0.s8 %v4091_v9  ;;  %v4099_v29 = vld [vmem:[%s4368_s26 + $0x2c] sm:$0xff]  }
  0x1e   : > { %238 = vperm.xlu1 %4153, %v4372_v3   ;;  %232 = vperm.xlu0 %4152, %v4374_v4   ;;  %v4397_v12 = vunpack.c.3.s8 %v4091_v9  ;;  %v4399_v13 = vunpack.c.2.s8 %v4091_v9  ;;  %v4404_v15 = vunpack.c.1.s8 %v4093_v14  ;;  %v4406_v16 = vunpack.c.0.s8 %v4093_v14 }
  0x1f   : > { %v4410_v17 = vunpack.c.3.s8 %v4093_v14  ;;  %v4412_v18 = vunpack.c.2.s8 %v4093_v14  ;;  %v4417_v20 = vunpack.c.1.s8 %v4095_v19  ;;  %v4419_v21 = vunpack.c.0.s8 %v4095_v19 }
  0x20   : > { %v4423_v22 = vunpack.c.3.s8 %v4095_v19  ;;  %v4425_v23 = vunpack.c.2.s8 %v4095_v19  ;;  %v4430_v25 = vunpack.c.1.s8 %v4097_v24  ;;  %v4432_v26 = vunpack.c.0.s8 %v4097_v24 }
  0x21   : > { %v4436_v27 = vunpack.c.3.s8 %v4097_v24  ;;  %v4438_v28 = vunpack.c.2.s8 %v4097_v24  ;;  %v4443_v30 = vunpack.c.1.s8 %v4099_v29  ;;  %v4445_v31 = vunpack.c.0.s8 %v4099_v29 }
  0x22   : > { %241 = vperm.xlu1 %4153, %v4378_v5   ;;  %235 = vperm.xlu0 %4152, %v4380_v6   ;;  %6644 = vst [vmem:[#allocation5_spill] sm:$0xff] %v4423_v22  ;;  %6645 = vst [vmem:[#allocation6_spill] sm:$0xff] %v4425_v23  ;;  %v4449_v32 = vunpack.c.3.s8 %v4099_v29  ;;  %v4451_v33 = vunpack.c.2.s8 %v4099_v29  ;;  %v4455_v34 = vunpack.c.3.s8 %v3542_v2  ;;  %v4457_v35 = vunpack.c.2.s8 %v3542_v2 }
  0x23   : > { %6646 = vst [vmem:[#allocation7_spill] sm:$0xff] %v4432_v26  ;;  %6647 = vst [vmem:[#allocation8_spill] sm:$0xff] %v4436_v27  ;;  %v344_v36 = vadd.s32 5, %v4380_v6  ;;  %v343_v37 = vadd.s32 5, %v4374_v4  ;;  %v345_v39 = vadd.s32 5, %v4372_v3  ;;  %v346_v40 = vadd.s32 5, %v4378_v5 }
  0x24   : > { %6648 = vst [vmem:[#allocation9_spill] sm:$0xff] %v4438_v28  ;;  %6649 = vst [vmem:[#allocation10_spill] sm:$0xff] %v4443_v30  ;;  %v347_v41 = vadd.s32 5, %v4386_v8  ;;  %v348_v42 = vadd.s32 5, %v4384_v7  ;;  %v349_v43 = vadd.s32 5, %v4393_v11  ;;  %v350_v44 = vadd.s32 5, %v4391_v10 }
  0x25   : > { %6650 = vst [vmem:[#allocation11_spill] sm:$0xff] %v4445_v31  ;;  %6651 = vst [vmem:[#allocation12_spill] sm:$0xff] %v4449_v32  ;;  %v351_v45 = vadd.s32 5, %v4399_v13  ;;  %v352_v46 = vadd.s32 5, %v4397_v12  ;;  %v353_v47 = vadd.s32 5, %v4406_v16  ;;  %v354_v48 = vadd.s32 5, %v4404_v15 }
  0x26   : > { %247 = vperm.xlu1 %4153, %v4384_v7   ;;  %244 = vperm.xlu0 %4152, %v4386_v8   ;;  %6652 = vst [vmem:[#allocation13_spill] sm:$0xff] %v4451_v33  ;;  %6653 = vst [vmem:[#allocation14_spill] sm:$0xff] %v4455_v34  ;;  %v355_v49 = vadd.s32 5, %v4412_v18  ;;  %v356_v50 = vadd.s32 5, %v4410_v17  ;;  %v357_v51 = vadd.s32 5, %v4419_v21  ;;  %v358_v52 = vadd.s32 5, %v4417_v20 }
  0x27   : > { %6654 = vst [vmem:[#allocation15_spill] sm:$0xff] %v4457_v35  ;;  %v359_v53 = vadd.s32 5, %v4425_v23  ;;  %v360_v54 = vadd.s32 5, %v4423_v22  ;;  %v361_v55 = vadd.s32 5, %v4432_v26  ;;  %v362_v56 = vadd.s32 5, %v4430_v25 }
  0x28   : > { %v363_v57 = vadd.s32 5, %v4438_v28  ;;  %v364_v58 = vadd.s32 5, %v4436_v27  ;;  %v365_v59 = vadd.s32 5, %v4445_v31  ;;  %v366_v60 = vadd.s32 5, %v4443_v30 }
  0x29   : > { %v367_v61 = vadd.s32 5, %v4451_v33  ;;  %v368_v62 = vadd.s32 5, %v4449_v32  ;;  %v369_v63 = vadd.s32 5, %v4457_v35  ;;  %v370_v0 = vadd.s32 5, %v4455_v34 }
  0x2a   : > { %253 = vperm.xlu1 %4153, %v4391_v10   ;;  %250 = vperm.xlu0 %4152, %v4393_v11   ;;  %v511_v1 = vadd.s32 11, %v4374_v4  ;;  %v512_v2 = vadd.s32 11, %v4380_v6  ;;  %v4287_v9 = vmov 2   ;;  %v513_v14 = vadd.s32 11, %v4372_v3 }
  0x2b   : > { %v515_v19 = vadd.s32 11, %v4386_v8  ;;  %v514_v24 = vadd.s32 11, %v4378_v5  ;;  %v517_v29 = vadd.s32 11, %v4393_v11 }
  0x2e   : > { %259 = vperm.xlu1 %4153, %v4397_v12   ;;  %256 = vperm.xlu0 %4152, %v4399_v13  }
  0x32   : > { %265 = vperm.xlu1 %4153, %v4404_v15   ;;  %262 = vperm.xlu0 %4152, %v4406_v16  }
  0x36   : > { %271 = vperm.xlu1 %4153, %v4410_v17   ;;  %268 = vperm.xlu0 %4152, %v4412_v18  }
  0x3a   : > { %277 = vperm.xlu1 %4153, %v4417_v20   ;;  %274 = vperm.xlu0 %4152, %v4419_v21  }
  0x3e   : > { %283 = vperm.xlu1 %4153, %v4423_v22   ;;  %280 = vperm.xlu0 %4152, %v4425_v23  }
  0x42   : > { %289 = vperm.xlu1 %4153, %v4430_v25   ;;  %286 = vperm.xlu0 %4152, %v4432_v26  }
  0x46   : > { %295 = vperm.xlu1 %4153, %v4436_v27   ;;  %292 = vperm.xlu0 %4152, %v4438_v28  }
  0x4a   : > { %301 = vperm.xlu1 %4153, %v4443_v30   ;;  %298 = vperm.xlu0 %4152, %v4445_v31  }
  0x4e   : > { %307 = vperm.xlu1 %4153, %v4449_v32   ;;  %304 = vperm.xlu0 %4152, %v4451_v33  }
  0x52   : > { %313 = vperm.xlu1 %4153, %v4455_v34   ;;  %310 = vperm.xlu0 %4152, %v4457_v35  }
  0x56   : > { %4155 = vset.pattern.permute.xlu1 %v4286_v38  ;;  %4154 = vset.pattern.permute.xlu0 %v4286_v38 }
  0x57   : > { %375 = vperm.xlu1 %4155, %v344_v36   ;;  %372 = vperm.xlu0 %4154, %v343_v37   ;;  %v516_v36 = vadd.s32 11, %v4384_v7  ;;  %v519_v37 = vadd.s32 11, %v4399_v13 }
  0x5b   : > { %378 = vperm.xlu1 %4155, %v345_v39   ;;  %381 = vperm.xlu0 %4154, %v346_v40   ;;  %v518_v40 = vadd.s32 11, %v4391_v10 }
  0x5f   : > { %384 = vperm.xlu1 %4155, %v347_v41   ;;  %387 = vperm.xlu0 %4154, %v348_v42   ;;  %v521_v41 = vadd.s32 11, %v4406_v16 }
  0x63   : > { %390 = vperm.xlu1 %4155, %v349_v43   ;;  %393 = vperm.xlu0 %4154, %v350_v44   ;;  %v520_v44 = vadd.s32 11, %v4397_v12 }
  0x67   : > { %396 = vperm.xlu1 %4155, %v351_v45   ;;  %399 = vperm.xlu0 %4154, %v352_v46   ;;  %v523_v45 = vadd.s32 11, %v4412_v18 }
  0x6b   : > { %402 = vperm.xlu1 %4155, %v353_v47   ;;  %405 = vperm.xlu0 %4154, %v354_v48   ;;  %v522_v48 = vadd.s32 11, %v4404_v15 }
  0x6f   : > { %408 = vperm.xlu1 %4155, %v355_v49   ;;  %411 = vperm.xlu0 %4154, %v356_v50   ;;  %v525_v49 = vadd.s32 11, %v4419_v21 }
  0x73   : > { %414 = vperm.xlu1 %4155, %v357_v51   ;;  %417 = vperm.xlu0 %4154, %v358_v52   ;;  %v524_v52 = vadd.s32 11, %v4410_v17 }
  0x77   : > { %420 = vperm.xlu1 %4155, %v359_v53   ;;  %423 = vperm.xlu0 %4154, %v360_v54   ;;  %v527_v53 = vadd.s32 11, %v4425_v23 }
  0x7b   : > { %426 = vperm.xlu1 %4155, %v361_v55   ;;  %429 = vperm.xlu0 %4154, %v362_v56   ;;  %v526_v56 = vadd.s32 11, %v4417_v20 }
  0x7f   : > { %432 = vperm.xlu1 %4155, %v363_v57   ;;  %435 = vperm.xlu0 %4154, %v364_v58   ;;  %v529_v57 = vadd.s32 11, %v4432_v26 }
  0x83   : > { %438 = vperm.xlu1 %4155, %v365_v59   ;;  %441 = vperm.xlu0 %4154, %v366_v60   ;;  %v528_v60 = vadd.s32 11, %v4423_v22 }
  0x87   : > { %444 = vperm.xlu1 %4155, %v367_v61   ;;  %447 = vperm.xlu0 %4154, %v368_v62   ;;  %v531_v61 = vadd.s32 11, %v4438_v28 }
  0x8b   : > { %450 = vperm.xlu1 %4155, %v369_v63   ;;  %453 = vperm.xlu0 %4154, %v370_v0   ;;  %v530_v0 = vadd.s32 11, %v4430_v25 }
  0x8f   : > { %4156 = vset.pattern.permute.xlu1 %v4287_v9  ;;  %4157 = vset.pattern.permute.xlu0 %v4287_v9 }
  0x90   : > { %540 = vperm.xlu1 %4156, %v511_v1   ;;  %543 = vperm.xlu0 %4157, %v512_v2   ;;  %v533_v1 = vadd.s32 11, %v4445_v31 }
  0x94   : > { %546 = vperm.xlu1 %4156, %v513_v14   ;;  %552 = vperm.xlu0 %4157, %v515_v19   ;;  %v532_v14 = vadd.s32 11, %v4436_v27  ;;  %v535_v19 = vadd.s32 11, %v4451_v33 }
  0x98   : > { %549 = vperm.xlu1 %4156, %v514_v24   ;;  %558 = vperm.xlu0 %4157, %v517_v29  }
  0x99   : > { %v4497_v38 = vpop.permute.xlu1 %238  ;;  %v4499_v39 = vpop.permute.xlu0 %232 }
  0x9c   : > { %555 = vperm.xlu1 %4156, %v516_v36   ;;  %564 = vperm.xlu0 %4157, %v519_v37   ;;  %v534_v36 = vadd.s32 11, %v4443_v30  ;;  %v537_v37 = vadd.s32 11, %v4457_v35 }
  0x9d   : > { %v4503_v42 = vpop.permute.xlu1 %241  ;;  %v4505_v43 = vpop.permute.xlu0 %235 }
  0xa0   : > { %561 = vperm.xlu1 %4156, %v518_v40   ;;  %570 = vperm.xlu0 %4157, %v521_v41  }
  0xa1   : > { %v4509_v46 = vpop.permute.xlu1 %247  ;;  %v4511_v47 = vpop.permute.xlu0 %244 }
  0xa4   : > { %567 = vperm.xlu1 %4156, %v520_v44   ;;  %576 = vperm.xlu0 %4157, %v523_v45   ;;  %v536_v44 = vadd.s32 11, %v4449_v32 }
  0xa5   : > { %v4515_v50 = vpop.permute.xlu1 %253  ;;  %v4517_v51 = vpop.permute.xlu0 %250 }
  0xa8   : > { %573 = vperm.xlu1 %4156, %v522_v48   ;;  %582 = vperm.xlu0 %4157, %v525_v49   ;;  %v679_v49 = vadd.s32 13, %v4374_v4 }
  0xa9   : > { %v4521_v54 = vpop.permute.xlu1 %259  ;;  %v4523_v55 = vpop.permute.xlu0 %256 }
  0xaa   : > { %6655 = vst [vmem:[#allocation16_spill] sm:$0xff] %v4521_v54  ;;  %6656 = vst [vmem:[#allocation17_spill] sm:$0xff] %v4523_v55  ;;  %v1360_v54 = vadd.s32 29, %v4397_v12  ;;  %v1372_v55 = vadd.s32 29, %v4436_v27 }
  0xac   : > { %579 = vperm.xlu1 %4156, %v524_v52   ;;  %588 = vperm.xlu0 %4157, %v527_v53   ;;  %v4288_v52 = vmov 3   ;;  %v538_v53 = vadd.s32 11, %v4455_v34 }
  0xad   : > { %v4527_v58 = vpop.permute.xlu1 %265  ;;  %v4529_v59 = vpop.permute.xlu0 %262 }
  0xae   : > { %6657 = vst [vmem:[#allocation18_spill] sm:$0xff] %v4527_v58  ;;  %6658 = vst [vmem:[#allocation19_spill] sm:$0xff] %v4529_v59 }
  0xb0   : > { %585 = vperm.xlu1 %4156, %v526_v56   ;;  %594 = vperm.xlu0 %4157, %v529_v57  }
  0xb1   : > { %v4533_v62 = vpop.permute.xlu1 %271  ;;  %v4535_v63 = vpop.permute.xlu0 %268 }
  0xb2   : > { %6659 = vst [vmem:[#allocation20_spill] sm:$0xff] %v4533_v62  ;;  %6660 = vst [vmem:[#allocation21_spill] sm:$0xff] %v4535_v63 }
  0xb4   : > { %591 = vperm.xlu1 %4156, %v528_v60   ;;  %600 = vperm.xlu0 %4157, %v531_v61   ;;  %v682_v60 = vadd.s32 13, %v4378_v5 }
  0xb5   : > { %v4539_v2 = vpop.permute.xlu1 %277  ;;  %v4541_v9 = vpop.permute.xlu0 %274 }
  0xb6   : > { %6661 = vst [vmem:[#allocation22_spill] sm:$0xff] %v4539_v2  ;;  %6662 = vst [vmem:[#allocation23_spill] sm:$0xff] %v4541_v9 }
  0xb8   : > { %597 = vperm.xlu1 %4156, %v530_v0   ;;  %606 = vperm.xlu0 %4157, %v533_v1   ;;  %v680_v1 = vadd.s32 13, %v4380_v6 }
  0xb9   : > { %v4545_v24 = vpop.permute.xlu1 %283  ;;  %v4547_v29 = vpop.permute.xlu0 %280 }
  0xba   : > { %6663 = vst [vmem:[#allocation24_spill] sm:$0xff] %v4545_v24  ;;  %6664 = vst [vmem:[#allocation25_spill] sm:$0xff] %v4547_v29 }
  0xbc   : > { %603 = vperm.xlu1 %4156, %v532_v14   ;;  %612 = vperm.xlu0 %4157, %v535_v19   ;;  %v684_v14 = vadd.s32 13, %v4384_v7 }
  0xbd   : > { %v4551_v40 = vpop.permute.xlu1 %289  ;;  %v4553_v41 = vpop.permute.xlu0 %286 }
  0xbe   : > { %6665 = vst [vmem:[#allocation26_spill] sm:$0xff] %v4551_v40  ;;  %6666 = vst [vmem:[#allocation27_spill] sm:$0xff] %v4553_v41 }
  0xc0   : > { %609 = vperm.xlu1 %4156, %v534_v36   ;;  %618 = vperm.xlu0 %4157, %v537_v37   ;;  %v681_v37 = vadd.s32 13, %v4372_v3 }
  0xc1   : > { %v4556_v45 = vpop.permute.xlu1 %295  ;;  %v4558_v48 = vpop.permute.xlu0 %292 }
  0xc2   : > { %6667 = vst [vmem:[#allocation28_spill] sm:$0xff] %v4556_v45  ;;  %6668 = vst [vmem:[#allocation29_spill] sm:$0xff] %v4558_v48 }
  0xc4   : > { %615 = vperm.xlu1 %4156, %v536_v44   ;;  %4158 = vset.pattern.permute.xlu0 %v4288_v52  ;;  %v686_v44 = vadd.s32 13, %v4391_v10 }
  0xc5   : > { %v4562_v56 = vpop.permute.xlu1 %301  ;;  %708 = vperm.xlu0 %4158, %v679_v49   ;;  %v4564_v57 = vpop.permute.xlu0 %298  ;;  %v683_v49 = vadd.s32 13, %v4386_v8 }
  0xc6   : > { %6669 = vst [vmem:[#allocation30_spill] sm:$0xff] %v4562_v56  ;;  %6670 = vst [vmem:[#allocation31_spill] sm:$0xff] %v4564_v57 }
  0xc8   : > { %621 = vperm.xlu1 %4156, %v538_v53   ;;  %v688_v53 = vadd.s32 13, %v4397_v12 }
  0xc9   : > { %v4567_v61 = vpop.permute.xlu1 %307  ;;  %717 = vperm.xlu0 %4158, %v682_v60   ;;  %v4569_v0 = vpop.permute.xlu0 %304 }
  0xca   : > { %6671 = vst [vmem:[#allocation32_spill] sm:$0xff] %v4567_v61  ;;  %6672 = vst [vmem:[#allocation33_spill] sm:$0xff] %v4569_v0 }
  0xcc   : > { %4159 = vset.pattern.permute.xlu1 %v4288_v52  ;;  %v685_v52 = vadd.s32 13, %v4393_v11 }
  0xcd   : > { %v4573_v19 = vpop.permute.xlu1 %313  ;;  %711 = vperm.xlu1 %4159, %v680_v1   ;;  %723 = vperm.xlu0 %4158, %v684_v14   ;;  %v4575_v36 = vpop.permute.xlu0 %310  ;;  %v690_v1 = vadd.s32 13, %v4404_v15 }
  0xce   : > { %6673 = vst [vmem:[#allocation34_spill] sm:$0xff] %v4573_v19  ;;  %6674 = vst [vmem:[#allocation35_spill] sm:$0xff] %v4575_v36 }
  0xd1   : > { %714 = vperm.xlu1 %4159, %v681_v37   ;;  %729 = vperm.xlu0 %4158, %v686_v44   ;;  %v687_v37 = vadd.s32 13, %v4399_v13  ;;  %v692_v44 = vadd.s32 13, %v4410_v17 }
  0xd2   : > { %v4581_v60 = vpop.permute.xlu1 %375  ;;  %v4583_v61 = vpop.permute.xlu0 %372 }
  0xd5   : > { %720 = vperm.xlu1 %4159, %v683_v49   ;;  %735 = vperm.xlu0 %4158, %v688_v53   ;;  %v689_v49 = vadd.s32 13, %v4406_v16  ;;  %v694_v53 = vadd.s32 13, %v4417_v20 }
  0xd6   : > { %v4587_v14 = vpop.permute.xlu1 %378  ;;  %v4589_v19 = vpop.permute.xlu0 %381 }
  0xd9   : > { %726 = vperm.xlu1 %4159, %v685_v52   ;;  %741 = vperm.xlu0 %4158, %v690_v1   ;;  %v691_v52 = vadd.s32 13, %v4412_v18  ;;  %v696_v1 = vadd.s32 13, %v4423_v22 }
  0xda   : > { %v4593_v36 = vpop.permute.xlu1 %384  ;;  %v4595_v0 = vpop.permute.xlu0 %387 }
  0xdd   : > { %732 = vperm.xlu1 %4159, %v687_v37   ;;  %747 = vperm.xlu0 %4158, %v692_v44   ;;  %v693_v37 = vadd.s32 13, %v4419_v21  ;;  %v698_v44 = vadd.s32 13, %v4430_v25 }
  0xde   : > { %v4599_v56 = vpop.permute.xlu1 %390  ;;  %v4601_v57 = vpop.permute.xlu0 %393 }
  0xe1   : > { %738 = vperm.xlu1 %4159, %v689_v49   ;;  %753 = vperm.xlu0 %4158, %v694_v53   ;;  %v695_v49 = vadd.s32 13, %v4425_v23  ;;  %v700_v53 = vadd.s32 13, %v4436_v27 }
  0xe2   : > { %v4605_v48 = vpop.permute.xlu1 %396  ;;  %v4607_v45 = vpop.permute.xlu0 %399 }
  0xe3   : > { %6675 = vst [vmem:[#allocation36_spill] sm:$0xff] %v4605_v48  ;;  %6676 = vst [vmem:[#allocation37_spill] sm:$0xff] %v4607_v45  ;;  %v850_v45 = vadd.s32 16, %v4378_v5 }
  0xe5   : > { %744 = vperm.xlu1 %4159, %v691_v52   ;;  %759 = vperm.xlu0 %4158, %v696_v1   ;;  %v697_v52 = vadd.s32 13, %v4432_v26  ;;  %v702_v1 = vadd.s32 13, %v4443_v30 }
  0xe6   : > { %v4611_v40 = vpop.permute.xlu1 %402  ;;  %v4613_v41 = vpop.permute.xlu0 %405 }
  0xe7   : > { %6677 = vst [vmem:[#allocation38_spill] sm:$0xff] %v4611_v40  ;;  %6678 = vst [vmem:[#allocation39_spill] sm:$0xff] %v4613_v41  ;;  %v1354_v40 = vadd.s32 29, %v4378_v5 }
  0xe9   : > { %750 = vperm.xlu1 %4159, %v693_v37   ;;  %765 = vperm.xlu0 %4158, %v698_v44   ;;  %v699_v37 = vadd.s32 13, %v4438_v28  ;;  %v704_v44 = vadd.s32 13, %v4449_v32 }
  0xea   : > { %v4617_v29 = vpop.permute.xlu1 %408  ;;  %v4619_v24 = vpop.permute.xlu0 %411 }
  0xeb   : > { %6679 = vst [vmem:[#allocation40_spill] sm:$0xff] %v4617_v29  ;;  %6680 = vst [vmem:[#allocation41_spill] sm:$0xff] %v4619_v24 }
  0xed   : > { %756 = vperm.xlu1 %4159, %v695_v49   ;;  %771 = vperm.xlu0 %4158, %v700_v53   ;;  %v701_v49 = vadd.s32 13, %v4445_v31  ;;  %v706_v53 = vadd.s32 13, %v4455_v34  ;;  %v6712_v34 = vmov 7  }
  0xee   : > { %v4623_v2 = vpop.permute.xlu1 %414  ;;  %v4625_v9 = vpop.permute.xlu0 %417 }
  0xef   : > { %6681 = vst [vmem:[#allocation42_spill] sm:$0xff] %v4623_v2  ;;  %6682 = vst [vmem:[#allocation43_spill] sm:$0xff] %v4625_v9 }
  0xf1   : > { %762 = vperm.xlu1 %4159, %v697_v52   ;;  %777 = vperm.xlu0 %4158, %v702_v1   ;;  %v703_v52 = vadd.s32 13, %v4451_v33 }
  0xf2   : > { %v4629_v62 = vpop.permute.xlu1 %420  ;;  %v4631_v29 = vpop.permute.xlu0 %423 }
  0xf3   : > { %6683 = vst [vmem:[#allocation44_spill] sm:$0xff] %v4629_v62  ;;  %6684 = vst [vmem:[#allocation45_spill] sm:$0xff] %v4631_v29  ;;  %v1017_v62 = vadd.s32 21, %v4372_v3 }
  0xf5   : > { %768 = vperm.xlu1 %4159, %v699_v37   ;;  %783 = vperm.xlu0 %4158, %v704_v44   ;;  %v6544_v37 = vmov 5   ;;  %v705_v44 = vadd.s32 13, %v4457_v35 }
  0xf6   : > { %v4635_v24 = vpop.permute.xlu1 %426  ;;  %v4637_v2 = vpop.permute.xlu0 %429 }
  0xf7   : > { %6685 = vst [vmem:[#allocation46_spill] sm:$0xff] %v4635_v24  ;;  %6686 = vst [vmem:[#allocation47_spill] sm:$0xff] %v4637_v2 }
  0xf9   : > { %774 = vperm.xlu1 %4159, %v701_v49   ;;  %789 = vperm.xlu0 %4158, %v706_v53   ;;  %v1020_v49 = vadd.s32 21, %v4384_v7 }
  0xfa   : > { %v4640_v1 = vpop.permute.xlu1 %432  ;;  %v4642_v9 = vpop.permute.xlu0 %435 }
  0xfb   : > { %6687 = vst [vmem:[#allocation48_spill] sm:$0xff] %v4640_v1  ;;  %6688 = vst [vmem:[#allocation49_spill] sm:$0xff] %v4642_v9  ;;  %v1023_v9 = vadd.s32 21, %v4399_v13 }
  0xfd   : > { %780 = vperm.xlu1 %4159, %v703_v52   ;;  %4165 = vset.pattern.permute.xlu0 %v6544_v37  ;;  %v847_v52 = vadd.s32 16, %v4374_v4  ;;  %v6546_v37 = vmov 4  }
  0xfe   : > { %v4647_v29 = vpop.permute.xlu1 %438  ;;  %1050 = vperm.xlu0 %4165, %v1017_v62   ;;  %v4649_v2 = vpop.permute.xlu0 %441 }
  0xff   : > { %6689 = vst [vmem:[#allocation50_spill] sm:$0xff] %v4647_v29  ;;  %6690 = vst [vmem:[#allocation51_spill] sm:$0xff] %v4649_v2 }
 0x101   : > { %786 = vperm.xlu1 %4159, %v705_v44   ;;  %v1026_v44 = vadd.s32 21, %v4404_v15 }
 0x102   : > { %v4652_v53 = vpop.permute.xlu1 %444  ;;  %1059 = vperm.xlu0 %4165, %v1020_v49   ;;  %v4654_v1 = vpop.permute.xlu0 %447  ;;  %v6695_v49 = vmov 5  }
 0x103   : > { %6691 = vst [vmem:[#allocation52_spill] sm:$0xff] %v4652_v53  ;;  %6692 = vst [vmem:[#allocation53_spill] sm:$0xff] %v4654_v1  ;;  %v1015_v53 = vadd.s32 21, %v4374_v4  ;;  %v1029_v1 = vadd.s32 21, %v4419_v21 }
 0x105   : > { %4160 = vset.pattern.permute.xlu1 %v6546_v37  ;;  %v1016_v37 = vadd.s32 21, %v4380_v6 }
 0x106   : > { %v4659_v24 = vpop.permute.xlu1 %450  ;;  %876 = vperm.xlu1 %4160, %v847_v52   ;;  %1068 = vperm.xlu0 %4165, %v1023_v9   ;;  %v4661_v62 = vpop.permute.xlu0 %453  ;;  %v1032_v9 = vadd.s32 21, %v4423_v22 }
 0x107   : > { %6693 = vst [vmem:[#allocation54_spill] sm:$0xff] %v4659_v24  ;;  %6694 = vst [vmem:[#allocation55_spill] sm:$0xff] %v4661_v62  ;;  %v1184_v24 = vadd.s32 27, %v4380_v6 }
 0x10a   : > { %4161 = vset.pattern.permute.xlu1 %v6695_v49  ;;  %1077 = vperm.xlu0 %4165, %v1026_v44   ;;  %v6548_v44 = vmov 6  }
 0x10b   : > { %1044 = vperm.xlu1 %4161, %v1015_v53   ;;  %v4667_v2 = vpop.permute.xlu1 %540  ;;  %v4669_v29 = vpop.permute.xlu0 %543 }
 0x10e   : > { %1086 = vperm.xlu0 %4165, %v1029_v1   ;;  %v1351_v1 = vadd.s32 29, %v4374_v4 }
 0x10f   : > { %1047 = vperm.xlu1 %4161, %v1016_v37   ;;  %v4673_v52 = vpop.permute.xlu1 %546  ;;  %v4675_v62 = vpop.permute.xlu0 %552  ;;  %v6552_v37 = vmov 7  }
 0x110   : > { %6696 = vst [vmem:[#allocation56_spill] sm:$0xff] %v4673_v52 }
 0x112   : > { %1095 = vperm.xlu0 %4165, %v1032_v9   ;;  %v1355_v9 = vadd.s32 29, %v4386_v8 }
 0x113   : > { %4162 = vset.pattern.permute.xlu1 %v6548_v44  ;;  %v4679_v53 = vpop.permute.xlu1 %549  ;;  %v4681_v63 = vpop.permute.xlu0 %558  ;;  %v1352_v44 = vadd.s32 29, %v4380_v6 }
 0x114   : > { %1215 = vperm.xlu1 %4162, %v1184_v24  }
 0x116   : > { %4195 = vset.pattern.permute.xlu0 %v6552_v37 }
 0x117   : > { %v4686_v59 = vpop.permute.xlu1 %555  ;;  %1389 = vperm.xlu0 %4195, %v1354_v40   ;;  %v4688_v58 = vpop.permute.xlu0 %564 }
 0x118   : > { %6697 = vst [vmem:[#allocation57_spill] sm:$0xff] %v4688_v58  ;;  %4163 = vset.pattern.permute.xlu1 %v6552_v37  ;;  %v1361_v37 = vadd.s32 29, %v4406_v16 }
 0x119   : > { %1380 = vperm.xlu1 %4163, %v1351_v1   ;;  %v6702_v1 = vmov 4  }
 0x11b   : > { %v4693_v41 = vpop.permute.xlu1 %561  ;;  %1392 = vperm.xlu0 %4195, %v1355_v9   ;;  %v4695_v24 = vpop.permute.xlu0 %570 }
 0x11c   : > { %6698 = vst [vmem:[#allocation58_spill] sm:$0xff] %v4693_v41  ;;  %6699 = vst [vmem:[#allocation59_spill] sm:$0xff] %v4695_v24  ;;  %v1018_v24 = vadd.s32 21, %v4378_v5 }
 0x11d   : > { %1383 = vperm.xlu1 %4163, %v1352_v44   ;;  %v1366_v44 = vadd.s32 29, %v4417_v20 }
 0x11f   : > { %v4699_v40 = vpop.permute.xlu1 %567  ;;  %1407 = vperm.xlu0 %4195, %v1360_v54   ;;  %v4701_v58 = vpop.permute.xlu0 %576 }
 0x120   : > { %6700 = vst [vmem:[#allocation60_spill] sm:$0xff] %v4699_v40  ;;  %6701 = vst [vmem:[#allocation61_spill] sm:$0xff] %v4701_v58  ;;  %v1367_v40 = vadd.s32 29, %v4425_v23 }
 0x121   : > { %4164 = vset.pattern.permute.xlu1 %v6702_v1 }
 0x122   : > { %885 = vperm.xlu1 %4164, %v850_v45   ;;  %v1185_v45 = vadd.s32 27, %v4372_v3 }
 0x123   : > { %v4705_v48 = vpop.permute.xlu1 %573  ;;  %1410 = vperm.xlu0 %4195, %v1361_v37   ;;  %v4707_v9 = vpop.permute.xlu0 %582 }
 0x124   : > { %6703 = vst [vmem:[#allocation62_spill] sm:$0xff] %v4705_v48  ;;  %6704 = vst [vmem:[#allocation63_spill] sm:$0xff] %v4707_v9  ;;  %v6707_v48 = vmov 6  }
 0x126   : > { %4166 = vset.pattern.permute.xlu1 %v6695_v49 }
 0x127   : > { %1053 = vperm.xlu1 %4166, %v1018_v24   ;;  %v4712_v54 = vpop.permute.xlu1 %579  ;;  %1425 = vperm.xlu0 %4195, %v1366_v44   ;;  %v4714_v58 = vpop.permute.xlu0 %588  ;;  %v1353_v24 = vadd.s32 29, %v4372_v3 }
 0x128   : > { %6705 = vst [vmem:[#allocation64_spill] sm:$0xff] %v4712_v54  ;;  %6706 = vst [vmem:[#allocation65_spill] sm:$0xff] %v4714_v58  ;;  %v1373_v58 = vadd.s32 29, %v4445_v31  ;;  %v171_v31 = vld [vmem:[%s6542_s1 + $0x10] sm:$0xff] }
 0x12b   : > { %4167 = vset.pattern.permute.xlu1 %v6707_v48  ;;  %v4719_v37 = vpop.permute.xlu1 %585  ;;  %1428 = vperm.xlu0 %4195, %v1367_v40   ;;  %v4721_v9 = vpop.permute.xlu0 %594 }
 0x12c   : > { %6708 = vst [vmem:[#allocation66_spill] sm:$0xff] %v4719_v37  ;;  %6709 = vst [vmem:[#allocation67_spill] sm:$0xff] %v4721_v9  ;;  %1218 = vperm.xlu1 %4167, %v1185_v45   ;;  %v851_v37 = vadd.s32 16, %v4386_v8  ;;  %v1183_v45 = vadd.s32 27, %v4374_v4  ;;  %v1019_v4 = vadd.s32 21, %v4386_v8 }
 0x12f   : > { %v4725_v54 = vpop.permute.xlu1 %591  ;;  %1443 = vperm.xlu0 %4195, %v1372_v55   ;;  %v4727_v44 = vpop.permute.xlu0 %600  ;;  %v852_v55 = vadd.s32 16, %v4384_v7 }
 0x130   : > { %6710 = vst [vmem:[#allocation68_spill] sm:$0xff] %v4725_v54  ;;  %6711 = vst [vmem:[#allocation69_spill] sm:$0xff] %v4727_v44  ;;  %4168 = vset.pattern.permute.xlu1 %v6712_v34 }
 0x131   : > { %1386 = vperm.xlu1 %4168, %v1353_v24   ;;  %v1186_v24 = vadd.s32 27, %v4378_v5  ;;  %v1187_v5 = vadd.s32 27, %v4386_v8  ;;  %v1198_v8 = vadd.s32 27, %v4417_v20 }
 0x133   : > { %v4732_v40 = vpop.permute.xlu1 %597  ;;  %1446 = vperm.xlu0 %4195, %v1373_v58   ;;  %v4734_v9 = vpop.permute.xlu0 %606 }
 0x134   : > { %6713 = vst [vmem:[#allocation70_spill] sm:$0xff] %v4732_v40  ;;  %6714 = vst [vmem:[#allocation71_spill] sm:$0xff] %v4734_v9 }
 0x135   : > { %4169 = vset.pattern.permute.xlu1 %v6702_v1 }
 0x136   : > { %888 = vperm.xlu1 %4169, %v851_v37   ;;  %v1189_v37 = vadd.s32 27, %v4393_v11 }
 0x137   : > { %v4739_v44 = vpop.permute.xlu1 %603  ;;  %4209 = vset.pattern.permute.xlu0 %v6707_v48  ;;  %v4742_v54 = vpop.permute.xlu0 %612 }
 0x138   : > { %6715 = vst [vmem:[#allocation72_spill] sm:$0xff] %v4739_v44  ;;  %6716 = vst [vmem:[#allocation73_spill] sm:$0xff] %v4742_v54  ;;  %1212 = vperm.xlu0 %4209, %v1183_v45   ;;  %v1192_v45 = vadd.s32 27, %v4397_v12 }
 0x13a   : > { %891 = vperm.xlu1 %4169, %v852_v55  }
 0x13b   : > { %v4745_v58 = vpop.permute.xlu1 %609  ;;  %v4747_v9 = vpop.permute.xlu0 %618 }
 0x13c   : > { %6717 = vst [vmem:[#allocation74_spill] sm:$0xff] %v4745_v58  ;;  %6718 = vst [vmem:[#allocation75_spill] sm:$0xff] %v4747_v9  ;;  %1221 = vperm.xlu0 %4209, %v1186_v24   ;;  %v1188_v9 = vadd.s32 27, %v4384_v7  ;;  %v853_v58 = vadd.s32 16, %v4393_v11 }
 0x13e   : > { %4170 = vset.pattern.permute.xlu1 %v6695_v49 }
 0x13f   : > { %1056 = vperm.xlu1 %4170, %v1019_v4   ;;  %v4752_v44 = vpop.permute.xlu1 %615  ;;  %v1195_v4 = vadd.s32 27, %v4412_v18 }
 0x140   : > { %6719 = vst [vmem:[#allocation76_spill] sm:$0xff] %v4752_v44  ;;  %1230 = vperm.xlu0 %4209, %v1189_v37   ;;  %v4754_v54 = vpop.permute.xlu0 %708 }
 0x143   : > { %4171 = vset.pattern.permute.xlu1 %v6707_v48  ;;  %v4759_v55 = vpop.permute.xlu1 %621 }
 0x144   : > { %6720 = vst [vmem:[#allocation77_spill] sm:$0xff] %v4759_v55  ;;  %1224 = vperm.xlu1 %4171, %v1187_v5   ;;  %1239 = vperm.xlu0 %4209, %v1192_v45   ;;  %v4761_v24 = vpop.permute.xlu0 %717  ;;  %v1201_v55 = vadd.s32 27, %v4432_v26  ;;  %v1204_v26 = vadd.s32 27, %v4436_v27 }
 0x148   : > { %1227 = vperm.xlu1 %4171, %v1188_v9   ;;  %v4765_v37 = vpop.permute.xlu1 %711  ;;  %1248 = vperm.xlu0 %4209, %v1195_v4   ;;  %v4767_v44 = vpop.permute.xlu0 %723  ;;  %v172_v9 = vld [vmem:[%s6542_s1 + $0x18] sm:$0xff]  ;;  %v1356_v4 = vadd.s32 29, %v4384_v7  ;;  %v170_v7 = vld [vmem:[%s6542_s1 + $0x8] sm:$0xff] }
 0x149   : > { %6721 = vst [vmem:[#allocation78_spill] sm:$0xff] %v4765_v37  ;;  %v4781_v40 = vand.u32 4294901760, %v172_v9  ;;  %v169_v37 = vld [vmem:[%s6542_s1] sm:$0xff] }
 0x14b   : > { %3789 = vmatprep.subr.mxu0 %v4781_v40 }
 0x14c   : > { %4172 = vset.pattern.permute.xlu1 %v6702_v1  ;;  %v4772_v5 = vpop.permute.xlu1 %714  ;;  %1257 = vperm.xlu0 %4209, %v1198_v8   ;;  %v4774_v45 = vpop.permute.xlu0 %729 }
 0x14d   : > { %6722 = vst [vmem:[#allocation79_spill] sm:$0xff] %v4772_v5  ;;  %6723 = vst [vmem:[#allocation80_spill] sm:$0xff] %v4774_v45  ;;  %894 = vperm.xlu1 %4172, %v853_v58   ;;  %v4792_v58 = vsub.f32 %v172_v9, %v4781_v40  ;;  %v4794_v45 = vand.u32 4294901760, %v171_v31  ;;  %3790 = vmatpush3.msra.mxu0 %v4781_v40  ;;  %v4808_v9 = vand.u32 4294901760, %v170_v7  ;;  %v1207_v5 = vadd.s32 27, %v4451_v33 }
 0x14e   : > { %v4829_v33 = vand.u32 4294901760, %v169_v37 }
 0x14f   : > { %6725 = vst [vmem:[#allocation82_spill] sm:$0xff] %v4794_v45  ;;  %v4806_v27 = vsub.f32 %v171_v31, %v4794_v45  ;;  %6728 = vst [vmem:[#allocation85_spill] sm:$0xff] %v4808_v9  ;;  %3791 = vmatprep.subr.mxu0 %v4794_v45  ;;  %v4827_v52 = vsub.f32 %v170_v7, %v4808_v9  ;;  %v1022_v7 = vadd.s32 21, %v4391_v10 }
 0x150   : > { %v4786_v22 = vpop.permute.xlu1 %720  ;;  %1266 = vperm.xlu0 %4209, %v1201_v55   ;;  %v4788_v8 = vpop.permute.xlu0 %735  ;;  %v4803_v55 = vand.u32 4294901760, %v4792_v58  ;;  %3792 = vmatpush3.msra.mxu0 %v4794_v45  ;;  %v4842_v45 = vsub.f32 %v169_v37, %v4829_v33 }
 0x151   : > { %6724 = vst [vmem:[#allocation81_spill] sm:$0xff] %v4788_v8  ;;  %4173 = vset.pattern.permute.xlu1 %v6712_v34  ;;  %6727 = vst [vmem:[#allocation84_spill] sm:$0xff] %v4806_v27  ;;  %v1021_v8 = vadd.s32 21, %v4393_v11  ;;  %v4824_v23 = vand.u32 4294901760, %v4806_v27  ;;  %3793 = vmatprep.subr.mxu0 %v4808_v9 }
 0x152   : > { %1395 = vperm.xlu1 %4173, %v1356_v4   ;;  %6726 = vst [vmem:[#allocation83_spill] sm:$0xff] %v4803_v55  ;;  %v2037_v31 = vsub.f32 %v4792_v58, %v4803_v55  ;;  %3794 = vmatpush3.msra.mxu0 %v4808_v9  ;;  %v4837_v55 = vand.u32 4294901760, %v4827_v52 }
 0x153   : > { %6731 = vst [vmem:[#allocation88_spill] sm:$0xff] %v4824_v23  ;;  %3795 = vmatprep.subr.mxu0 %v4829_v33 }
 0x154   : > { %v4817_v4 = vpop.permute.xlu1 %726  ;;  %1275 = vperm.xlu0 %4209, %v1204_v26   ;;  %v4819_v41 = vpop.permute.xlu0 %741  ;;  %v2038_v26 = vand.u32 4294901760, %v2037_v31  ;;  %6732 = vst [vmem:[#allocation89_spill] sm:$0xff] %v4837_v55  ;;  %3796 = vmatpush3.msra.mxu0 %v4829_v33 }
 0x155   : > { %6729 = vst [vmem:[#allocation86_spill] sm:$0xff] %v4817_v4  ;;  %6730 = vst [vmem:[#allocation87_spill] sm:$0xff] %v4819_v41  ;;  %v2044_v41 = vsub.f32 %v4806_v27, %v4824_v23  ;;  %v2051_v27 = vsub.f32 %v4827_v52, %v4837_v55  ;;  %v848_v4 = vadd.s32 16, %v4380_v6  ;;  %3889 = vmatprep.subr.mxu0 %v4792_v58  ;;  %v1190_v6 = vadd.s32 27, %v4391_v10 }
 0x156   : > { %4174 = vset.pattern.permute.xlu1 %v6695_v49  ;;  %3839 = vmatprep.subr.mxu1 %v2038_v26 }
 0x157   : > { %1062 = vperm.xlu1 %4174, %v1021_v8   ;;  %v2045_v23 = vand.u32 4294901760, %v2044_v41  ;;  %3840 = vmatpush3.msra.mxu1 %v2038_v26  ;;  %v4853_v8 = vand.u32 4294901760, %v4842_v45  ;;  %v2052_v37 = vand.u32 4294901760, %v2051_v27  ;;  %v849_v26 = vadd.s32 16, %v4372_v3 }
 0x158   : > { %v4845_v9 = vpop.permute.xlu1 %732  ;;  %1284 = vperm.xlu0 %4209, %v1207_v5   ;;  %v4847_v31 = vpop.permute.xlu0 %747 }
 0x159   : > { %6733 = vst [vmem:[#allocation90_spill] sm:$0xff] %v4847_v31  ;;  %6734 = vst [vmem:[#allocation91_spill] sm:$0xff] %v4853_v8  ;;  %3841 = vmatprep.subr.mxu1 %v2045_v23  ;;  %v2058_v5 = vsub.f32 %v4842_v45, %v4853_v8  ;;  %v854_v8 = vadd.s32 16, %v4391_v10 }
 0x15a   : > { %3842 = vmatpush3.msra.mxu1 %v2045_v23 }
 0x15b   : > { %1065 = vperm.xlu1 %4174, %v1022_v7   ;;  %3843 = vmatprep.subr.mxu1 %v2052_v37  ;;  %v2059_v55 = vand.u32 4294901760, %v2058_v5  ;;  %v1357_v7 = vadd.s32 29, %v4393_v11  ;;  %v855_v5 = vadd.s32 16, %v4399_v13  ;;  %v860_v11 = vadd.s32 16, %v4410_v17 }
 0x15c   : > { %v4858_v31 = vpop.permute.xlu1 %738  ;;  %4213 = vset.pattern.permute.xlu0 %v6702_v1  ;;  %v4861_v41 = vpop.permute.xlu0 %753  ;;  %3844 = vmatpush3.msra.mxu1 %v2052_v37  ;;  %v1358_v37 = vadd.s32 29, %v4391_v10  ;;  %v861_v10 = vadd.s32 16, %v4419_v21 }
 0x15d   : > { %6735 = vst [vmem:[#allocation92_spill] sm:$0xff] %v4858_v31  ;;  %6736 = vst [vmem:[#allocation93_spill] sm:$0xff] %v4861_v41  ;;  %879 = vperm.xlu0 %4213, %v848_v4   ;;  %3845 = vmatprep.subr.mxu1 %v2059_v55  ;;  %v1027_v41 = vadd.s32 21, %v4412_v18 }
 0x15e   : > { %3846 = vmatpush3.msra.mxu1 %v2059_v55 }
 0x15f   : > { %4175 = vset.pattern.permute.xlu1 %v6707_v48  ;;  %3939 = vmatprep.subr.mxu1 %v4781_v40 }
 0x160   : > { %1233 = vperm.xlu1 %4175, %v1190_v6   ;;  %v4866_v23 = vpop.permute.xlu1 %744  ;;  %v4868_v27 = vpop.permute.xlu0 %759 }
 0x161   : > { %6737 = vst [vmem:[#allocation94_spill] sm:$0xff] %v4866_v23  ;;  %6738 = vst [vmem:[#allocation95_spill] sm:$0xff] %v4868_v27  ;;  %882 = vperm.xlu0 %4213, %v849_v26   ;;  %v856_v26 = vadd.s32 16, %v4397_v12 }
 0x164   : > { %4176 = vset.pattern.permute.xlu1 %v6712_v34  ;;  %v4874_v3 = vpop.permute.xlu1 %750  ;;  %v4876_v4 = vpop.permute.xlu0 %765 }
 0x165   : > { %6739 = vst [vmem:[#allocation96_spill] sm:$0xff] %v4874_v3  ;;  %6740 = vst [vmem:[#allocation97_spill] sm:$0xff] %v4876_v4  ;;  %1398 = vperm.xlu1 %4176, %v1357_v7   ;;  %897 = vperm.xlu0 %4213, %v854_v8   ;;  %v1024_v8 = vadd.s32 21, %v4397_v12  ;;  %v1025_v4 = vadd.s32 21, %v4406_v16 }
 0x168   : > { %v4880_v55 = vpop.permute.xlu1 %756  ;;  %v4882_v6 = vpop.permute.xlu0 %771 }
 0x169   : > { %6741 = vst [vmem:[#allocation98_spill] sm:$0xff] %v4880_v55  ;;  %6742 = vst [vmem:[#allocation99_spill] sm:$0xff] %v4882_v6  ;;  %1401 = vperm.xlu1 %4176, %v1358_v37   ;;  %900 = vperm.xlu0 %4213, %v855_v5   ;;  %v866_v5 = vadd.s32 16, %v4430_v25  ;;  %v1193_v55 = vadd.s32 27, %v4406_v16 }
 0x16c   : > { %v4886_v27 = vpop.permute.xlu1 %762  ;;  %v4888_v3 = vpop.permute.xlu0 %777 }
 0x16d   : > { %6743 = vst [vmem:[#allocation100_spill] sm:$0xff] %v4886_v27  ;;  %6744 = vst [vmem:[#allocation101_spill] sm:$0xff] %v4888_v3  ;;  %4177 = vset.pattern.permute.xlu1 %v6702_v1  ;;  %915 = vperm.xlu0 %4213, %v860_v11   ;;  %v1191_v3 = vadd.s32 27, %v4399_v13  ;;  %v1041_v27 = vadd.s32 21, %v4457_v35 }
 0x16e   : > { %903 = vperm.xlu1 %4177, %v856_v26   ;;  %v867_v26 = vadd.s32 16, %v4438_v28 }
 0x170   : > { %v4893_v7 = vpop.permute.xlu1 %768  ;;  %v4895_v37 = vpop.permute.xlu0 %783 }
 0x171   : > { %6745 = vst [vmem:[#allocation102_spill] sm:$0xff] %v4893_v7  ;;  %6746 = vst [vmem:[#allocation103_spill] sm:$0xff] %v4895_v37  ;;  %918 = vperm.xlu0 %4213, %v861_v10   ;;  %v1359_v37 = vadd.s32 29, %v4399_v13  ;;  %v1038_v7 = vadd.s32 21, %v4443_v30 }
 0x172   : > { %4178 = vset.pattern.permute.xlu1 %v6695_v49 }
 0x173   : > { %1071 = vperm.xlu1 %4178, %v1024_v8   ;;  %v872_v8 = vadd.s32 16, %v4449_v32 }
 0x174   : > { %v4899_v6 = vpop.permute.xlu1 %774  ;;  %v4902_v11 = vpop.permute.xlu0 %789 }
 0x175   : > { %6747 = vst [vmem:[#allocation104_spill] sm:$0xff] %v4899_v6  ;;  %6748 = vst [vmem:[#allocation105_spill] sm:$0xff] %v4902_v11  ;;  %933 = vperm.xlu0 %4213, %v866_v5   ;;  %v873_v11 = vadd.s32 16, %v4457_v35 }
 0x177   : > { %4179 = vset.pattern.permute.xlu1 %v6707_v48 }
 0x178   : > { %1236 = vperm.xlu1 %4179, %v1191_v3   ;;  %v4906_v12 = vpop.permute.xlu1 %780  ;;  %v857_v3 = vadd.s32 16, %v4406_v16 }
 0x179   : > { %6749 = vst [vmem:[#allocation106_spill] sm:$0xff] %v4906_v12  ;;  %936 = vperm.xlu0 %4213, %v867_v26   ;;  %v4908_v10 = vpop.permute.xlu0 %1050  ;;  %v858_v12 = vadd.s32 16, %v4404_v15 }
 0x17c   : > { %4180 = vset.pattern.permute.xlu1 %v6712_v34  ;;  %v4913_v6 = vpop.permute.xlu1 %786 }
 0x17d   : > { %6750 = vst [vmem:[#allocation107_spill] sm:$0xff] %v4913_v6  ;;  %1404 = vperm.xlu1 %4180, %v1359_v37   ;;  %951 = vperm.xlu0 %4213, %v872_v8   ;;  %v4915_v5 = vpop.permute.xlu0 %1059  ;;  %v1035_v6 = vadd.s32 21, %v4438_v28  ;;  %v1028_v28 = vadd.s32 21, %v4410_v17 }
 0x181   : > { %4181 = vset.pattern.permute.xlu1 %v6702_v1  ;;  %v4920_v26 = vpop.permute.xlu1 %876  ;;  %954 = vperm.xlu0 %4213, %v873_v11   ;;  %v4922_v13 = vpop.permute.xlu0 %1068 }
 0x182   : > { %906 = vperm.xlu1 %4181, %v857_v3  }
 0x185   : > { %4216 = vset.pattern.permute.xlu0 %v6695_v49  ;;  %v4927_v37 = vpop.permute.xlu0 %1077 }
 0x186   : > { %909 = vperm.xlu1 %4181, %v858_v12   ;;  %v4929_v8 = vpop.permute.xlu1 %1044  ;;  %1104 = vperm.xlu0 %4216, %v1035_v6  }
 0x189   : > { %v4933_v11 = vpop.permute.xlu0 %1086 }
 0x18a   : > { %6751 = vst [vmem:[#allocation108_spill] sm:$0xff] %v4933_v11  ;;  %4182 = vset.pattern.permute.xlu1 %v6695_v49  ;;  %v4936_v3 = vpop.permute.xlu1 %1047  ;;  %1113 = vperm.xlu0 %4216, %v1038_v7   ;;  %v1194_v11 = vadd.s32 27, %v4404_v15 }
 0x18b   : > { %1074 = vperm.xlu1 %4182, %v1025_v4   ;;  %v859_v4 = vadd.s32 16, %v4412_v18 }
 0x18d   : > { %v4940_v12 = vpop.permute.xlu0 %1095 }
 0x18e   : > { %6752 = vst [vmem:[#allocation109_spill] sm:$0xff] %v4940_v12  ;;  %1122 = vperm.xlu0 %4216, %v1041_v27  }
 0x18f   : > { %4183 = vset.pattern.permute.xlu1 %v6707_v48  ;;  %v4943_v6 = vpop.permute.xlu1 %1215 }
 0x190   : > { %1242 = vperm.xlu1 %4183, %v1193_v55   ;;  %v1362_v55 = vadd.s32 29, %v4404_v15 }
 0x192   : > { %v4946_v32 = vpop.permute.xlu0 %1389  ;;  %4220 = vset.pattern.permute.xlu0 %v6707_v48 }
 0x194   : > { %1245 = vperm.xlu1 %4183, %v1194_v11   ;;  %v1381_v7 = vpop.permute.xlu1 %1380 }
 0x196   : > { %v4950_v35 = vpop.permute.xlu0 %1392 }
 0x198   : > { %4184 = vset.pattern.permute.xlu1 %v6702_v1  ;;  %v4953_v16 = vpop.permute.xlu1 %1383 }
 0x199   : > { %912 = vperm.xlu1 %4184, %v859_v4   ;;  %v173_v4 = vlaneseq }
 0x19a   : > { %v4955_v27 = vpop.permute.xlu0 %1407 }
 0x19b   : > { %v4972_v31 = vand.u32 127, %v173_v4  ;;  %v1030_v4 = vadd.s32 21, %v4417_v20 }
 0x19d   : > { %4185 = vset.pattern.permute.xlu1 %v6712_v34  ;;  %v4959_v12 = vpop.permute.xlu1 %885  ;;  %vm315_vm0 = vcmp.eq.s32.totalorder %v4972_v31, %v4499_v39  ;;  %vm455_vm1 = vcmp.eq.s32.totalorder %v4972_v31, %v4583_v61  ;;  %vm460_vm2 = vcmp.eq.s32.totalorder %v4972_v31, %v4595_v0  ;;  %vm623_vm4 = vcmp.eq.s32.totalorder %v4972_v31, %v4667_v2 }
 0x19e   : > { %1413 = vperm.xlu1 %4185, %v1362_v55   ;;  %v4961_v11 = vpop.permute.xlu0 %1410  ;;  %vm483_vm3 = vmor %vm315_vm0, %vm455_vm1  ;;  %vm320_vm5 = vcmp.eq.s32.totalorder %v4972_v31, %v4509_v46  ;;  %vm628_vm6 = vcmp.eq.s32.totalorder %v4972_v31, %v4686_v59  ;;  %v1363_v39 = vadd.s32 29, %v4412_v18  ;;  %vm791_vm8 = vcmp.eq.s32.totalorder %v4972_v31, %v4754_v54 }
 0x19f   : > { %6753 = vst [vmem:[#allocation110_spill] sm:$0xff] %v4961_v11  ;;  %v1196_v11 = vadd.s32 27, %v4410_v17  ;;  %vm488_vm7 = vmor %vm320_vm5, %vm460_vm2  ;;  %vm796_vm10 = vcmp.eq.s32.totalorder %v4972_v31, %v4767_v44  ;;  %vm959_vm12 = vcmp.eq.s32.totalorder %v4972_v31, %v4920_v26  ;;  %vm1127_vm14 = vcmp.eq.s32.totalorder %v4972_v31, %v4929_v8 }
 0x1a0   : > { %vm651_vm9 = vmor %vm483_vm3, %vm623_vm4  ;;  %v1364_v46 = vadd.s32 29, %v4410_v17  ;;  %vm1132_vm3 = vcmp.eq.s32.totalorder %v4972_v31, %v4915_v5  ;;  %vm1463_vm4 = vcmp.eq.s32.totalorder %v4972_v31, %v1381_v7  ;;  %v862_v17 = vadd.s32 16, %v4417_v20 }
 0x1a1   : > { %vm656_vm11 = vmor %vm488_vm7, %vm628_vm6  ;;  %vm6594_vm6 = vcmask 261120   ;;  %v6615_v54 = vmov 0.0   ;;  %v6755_v26 = vmov 0 }
 0x1a2   : > { %4186 = vset.pattern.permute.xlu1 %v6695_v49  ;;  %v4965_v23 = vpop.permute.xlu1 %1053  ;;  %v4967_v30 = vpop.permute.xlu0 %1425  ;;  %vm819_vm13 = vmor %vm651_vm9, %vm791_vm8 }
 0x1a3   : > { %6754 = vst [vmem:[#allocation111_spill] sm:$0xff] %v4967_v30  ;;  %1080 = vperm.xlu1 %4186, %v1027_v41   ;;  %vm824_vm15 = vmor %vm656_vm11, %vm796_vm10  ;;  %vm316_vm11 = vcmp.eq.s32.totalorder %v4972_v31, %v4505_v43 }
 0x1a4   : > { %vm987_vm0 = vmor %vm819_vm13, %vm959_vm12  ;;  %vm456_vm12 = vcmp.eq.s32.totalorder %v4972_v31, %v4581_v60  ;;  %vm457_vm13 = vcmp.eq.s32.totalorder %v4972_v31, %v4587_v14  ;;  %v6772_v60 = vld [vmem:[#allocation6_spill] sm:$0xff] }
 0x1a5   : > { %vm1155_vm1 = vmor %vm987_vm0, %vm1127_vm14  ;;  %vm458_vm14 = vcmp.eq.s32.totalorder %v4972_v31, %v4589_v19  ;;  %vm319_vm0 = vcmp.eq.s32.totalorder %v4972_v31, %v4511_v47  ;;  %v6792_v19 = vld [vmem:[#allocation80_spill] sm:$0xff] }
 0x1a6   : > { %v4970_v15 = vpop.permute.xlu0 %1428 }
 0x1a7   : > { %1083 = vperm.xlu1 %4186, %v1028_v28   ;;  %v4974_v55 = vpop.permute.xlu1 %1218 }
 0x1aa   : > { %v4981_v30 = vpop.permute.xlu0 %1443 }
 0x1ab   : > { %4187 = vset.pattern.permute.xlu1 %v6707_v48 }
 0x1ac   : > { %1251 = vperm.xlu1 %4187, %v1196_v11   ;;  %v4988_v28 = vpop.permute.xlu1 %1386 }
 0x1ae   : > { %v4997_v61 = vpop.permute.xlu0 %1446 }
 0x1b0   : > { %4188 = vset.pattern.permute.xlu1 %v6712_v34 }
 0x1b1   : > { %1416 = vperm.xlu1 %4188, %v1363_v39   ;;  %v5006_v18 = vpop.permute.xlu1 %888 }
 0x1b3   : > { %v1213_v59 = vpop.permute.xlu0 %1212 }
 0x1b4   : > { %vm1295_vm2 = vcmp.eq.s32.totalorder %v4972_v31, %v1213_v59 }
 0x1b5   : > { %vm1323_vm5 = vmor %vm1155_vm1, %vm1295_vm2  ;;  %1419 = vperm.xlu1 %4188, %v1364_v46   ;;  %v892_v2 = vpop.permute.xlu1 %891  ;;  %vm459_vm2 = vcmp.eq.s32.totalorder %v4972_v31, %v4593_v36 }
 0x1b6   : > { %vm1491_vm7 = vmor %vm1323_vm5, %vm1463_vm4  ;;  %vm964_vm8 = vcmp.eq.s32.totalorder %v4972_v31, %v892_v2  ;;  %v1197_v2 = vadd.s32 27, %v4419_v21  ;;  %vm321_vm4 = vcmp.eq.s32.totalorder %v4972_v31, %v4517_v51 }
 0x1b7   : > { %vm992_vm9 = vmor %vm824_vm15, %vm964_vm8  ;;  %v5015_v0 = vpop.permute.xlu0 %1221  ;;  %v5018_v44 = vsel %vm1491_vm7, 1.0, %v6615_v54  ;;  %vm317_vm15 = vcmp.eq.s32.totalorder %v4972_v31, %v4497_v38  ;;  %vm461_vm7 = vcmp.eq.s32.totalorder %v4972_v31, %v4599_v56 }
 0x1b8   : > { %3847 = vmatprep.mubr.msk.f32.mxu1 %vm6594_vm6, %v5018_v44  ;;  %v1577_v41 = vsel %vm6594_vm6, %v5018_v44, 0  ;;  %vm5027_vm10 = vmor %vm992_vm9, %vm1132_vm3  ;;  %vm318_vm3 = vcmp.eq.s32.totalorder %v4972_v31, %v4503_v42  ;;  %vm627_vm9 = vcmp.eq.s32.totalorder %v4972_v31, %v4675_v62  ;;  %v1365_v42 = vadd.s32 29, %v4419_v21  ;;  %v6815_v21 = vld [vmem:[#allocation17_spill] sm:$0xff] }
 0x1b9   : > { %v6756_v26 = vsel %vm5027_vm10, 4294967295, %v6755_v26  ;;  %4189 = vset.pattern.permute.xlu1 %v6702_v1  ;;  %v5032_v8 = vsub.f32 %v1577_v41, %v1577_v41  ;;  %vm5061_vm1 = vmor %vm316_vm11, %vm456_vm12  ;;  %vm462_vm12 = vcmp.eq.s32.totalorder %v4972_v31, %v4601_v57  ;;  %vm322_vm6 = vcmp.eq.s32.totalorder %v4972_v31, %v4515_v50 }
 0x1ba   : > { %921 = vperm.xlu1 %4189, %v862_v17   ;;  %v5034_v7 = vpop.permute.xlu1 %1056  ;;  %vm5071_vm5 = vmor %vm317_vm15, %vm457_vm13  ;;  %vm624_vm13 = vcmp.eq.s32.totalorder %v4972_v31, %v4669_v29  ;;  %vm626_vm15 = vcmp.eq.s32.totalorder %v4972_v31, %v4679_v53  ;;  %v6770_v57 = vmov 0  ;;  %v6773_v62 = vmov 0  ;;  %v6778_v17 = vld [vmem:[#allocation86_spill] sm:$0xff] }
 0x1bb   : > { %v5036_v11 = vpop.permute.xlu0 %1230  ;;  %v6614_v39 = vand.u32 4294901760, %v5032_v8  ;;  %vm5082_vm8 = vmor %vm318_vm3, %vm458_vm14  ;;  %vm629_vm3 = vcmp.eq.s32.totalorder %v4972_v31, %v4681_v63  ;;  %v6769_v63 = vld [vmem:[#allocation56_spill] sm:$0xff] }
 0x1bc   : > { %vm487_vm11 = vmor %vm319_vm0, %vm459_vm2  ;;  %vm794_vm0 = vcmp.eq.s32.totalorder %v4972_v31, %v4761_v24  ;;  %v6775_v24 = vld [vmem:[#allocation58_spill] sm:$0xff] }
 0x1bd   : > { %v1732_v5 = vsub.f32 %v5032_v8, %v6614_v39  ;;  %vm489_vm14 = vmor %vm321_vm4, %vm461_vm7 }
 0x1be   : > { %4190 = vset.pattern.permute.xlu1 %v6695_v49  ;;  %vm5099_vm10 = vmor %vm487_vm11, %vm627_vm9  ;;  %vm795_vm9 = vcmp.eq.s32.totalorder %v4972_v31, %v4786_v22  ;;  %v863_v22 = vadd.s32 16, %v6772_v60 }
 0x1bf   : > { %1089 = vperm.xlu1 %4190, %v1030_v4   ;;  %v5048_v46 = vpop.permute.xlu1 %1224  ;;  %v5050_v59 = vpop.permute.xlu0 %1239  ;;  %v1733_v20 = vand.u32 4294901760, %v1732_v5  ;;  %vm5107_vm2 = vmor %vm322_vm6, %vm462_vm12  ;;  %vm625_vm6 = vcmp.eq.s32.totalorder %v4972_v31, %v6769_v63  ;;  %v6783_v4 = vld [vmem:[#allocation79_spill] sm:$0xff] }
 0x1c0   : > { %vm5113_vm4 = vmor %vm5061_vm1, %vm624_vm13  ;;  %vm962_vm1 = vcmp.eq.s32.totalorder %v4972_v31, %v4959_v12  ;;  %v6777_v12 = vld [vmem:[#allocation5_spill] sm:$0xff] }
 0x1c1   : > { %3797 = vmatprep.mubr.f32.mxu0 %v1733_v20  ;;  %vm654_vm7 = vmor %vm5082_vm8, %vm626_vm15  ;;  %vm1130_vm8 = vcmp.eq.s32.totalorder %v4972_v31, %v4965_v23  ;;  %vm963_vm15 = vcmp.eq.s32.totalorder %v4972_v31, %v5006_v18  ;;  %v6776_v23 = vld [vmem:[#allocation78_spill] sm:$0xff]  ;;  %v864_v18 = vadd.s32 16, %v6777_v12 }
 0x1c2   : > { %vm5124_vm11 = vmor %vm489_vm14, %vm629_vm3 }
 0x1c3   : > { %4191 = vset.pattern.permute.xlu1 %v6707_v48  ;;  %v5078_v38 = vpop.permute.xlu1 %1227  ;;  %v5080_v47 = vpop.permute.xlu0 %1248  ;;  %v6771_v57 = vsel %vm5124_vm11, 4294967295, %v6770_v57  ;;  %vm822_vm12 = vmor %vm654_vm7, %vm794_vm0  ;;  %vm1298_vm0 = vcmp.eq.s32.totalorder %v4972_v31, %v5015_v0  ;;  %vm1131_vm11 = vcmp.eq.s32.totalorder %v4972_v31, %v5034_v7  ;;  %v6781_v7 = vmov 0 }
 0x1c4   : > { %1254 = vperm.xlu1 %4191, %v1197_v2   ;;  %vm823_vm13 = vmor %vm5099_vm10, %vm795_vm9  ;;  %vm630_vm10 = vcmp.eq.s32.totalorder %v4972_v31, %v6775_v24 }
 0x1c5   : > { %vm5141_vm14 = vmor %vm5071_vm5, %vm625_vm6  ;;  %vm792_vm5 = vcmp.eq.s32.totalorder %v4972_v31, %v6776_v23  ;;  %vm1299_vm6 = vcmp.eq.s32.totalorder %v4972_v31, %v5048_v46  ;;  %v1031_v46 = vadd.s32 21, %v6772_v60 }
 0x1c6   : > { %v6774_v62 = vsel %vm5141_vm14, 4294967295, %v6773_v62  ;;  %vm990_vm3 = vmor %vm822_vm12, %vm962_vm1  ;;  %vm797_vm1 = vcmp.eq.s32.totalorder %v4972_v31, %v6778_v17 }
 0x1c7   : > { %v5105_v29 = vpop.permute.xlu0 %1257  ;;  %vm1158_vm7 = vmor %vm990_vm3, %vm1130_vm8  ;;  %vm1466_vm8 = vcmp.eq.s32.totalorder %v4972_v31, %v4946_v32 }
 0x1c8   : > { %4192 = vset.pattern.permute.xlu1 %v6712_v34  ;;  %v895_v50 = vpop.permute.xlu1 %894  ;;  %vm991_vm9 = vmor %vm823_vm13, %vm963_vm15  ;;  %vm1467_vm13 = vcmp.eq.s32.totalorder %v4972_v31, %v4950_v35 }
 0x1c9   : > { %1422 = vperm.xlu1 %4192, %v1365_v42   ;;  %vm1326_vm12 = vmor %vm1158_vm7, %vm1298_vm0  ;;  %vm793_vm7 = vcmp.eq.s32.totalorder %v4972_v31, %v6783_v4 }
 0x1ca   : > { %vm1159_vm3 = vmor %vm991_vm9, %vm1131_vm11  ;;  %vm6784_vm11 = vnez %v6771_v57 }
 0x1cb   : > { %v5137_v14 = vpop.permute.xlu0 %1266  ;;  %vm5165_vm14 = vmor %vm5107_vm2, %vm630_vm10  ;;  %vm965_vm2 = vcmp.eq.s32.totalorder %v4972_v31, %v895_v50 }
 0x1cc   : > { %vm1327_vm15 = vmor %vm1159_vm3, %vm1299_vm6 }
 0x1cd   : > { %4193 = vset.pattern.permute.xlu1 %v6702_v1  ;;  %v1396_v53 = vpop.permute.xlu1 %1395  ;;  %vm5173_vm0 = vmor %vm5113_vm4, %vm792_vm5  ;;  %vm1300_vm5 = vcmp.eq.s32.totalorder %v4972_v31, %v5078_v38  ;;  %v6794_v38 = vld [vmem:[#allocation14_spill] sm:$0xff] }
 0x1ce   : > { %924 = vperm.xlu1 %4193, %v863_v22   ;;  %v6782_v7 = vsel %vm5173_vm0, 4294967295, %v6781_v7  ;;  %vm825_vm9 = vmor %vm6784_vm11, %vm797_vm1  ;;  %vm1468_vm3 = vcmp.eq.s32.totalorder %v4972_v31, %v1396_v53  ;;  %vm1301_vm11 = vcmp.eq.s32.totalorder %v4972_v31, %v5036_v11  ;;  %v1210_v36 = vadd.s32 27, %v6794_v38 }
 0x1cf   : > { %v5159_v0 = vpop.permute.xlu0 %1275  ;;  %vm5182_vm10 = vmor %vm1326_vm12, %vm1466_vm8  ;;  %vm6789_vm12 = vnez %v6774_v62  ;;  %v1199_v11 = vadd.s32 27, %v6772_v60 }
 0x1d0   : > { %vm5190_vm4 = vmor %vm1327_vm15, %vm1467_vm13  ;;  %vm798_vm13 = vcmp.eq.s32.totalorder %v4972_v31, %v6792_v19  ;;  %vm6793_vm15 = vnez %v6756_v26  ;;  %v5221_v56 = vsel %vm5182_vm10, 1.0, %v6615_v54  ;;  %1293 = vperm.xlu0 %4220, %v1210_v36   ;;  %vm1128_vm10 = vcmp.eq.s32.totalorder %v4972_v31, %v4936_v3  ;;  %v6811_v19 = vld [vmem:[#allocation85_spill] sm:$0xff] }
 0x1d1   : > { %vm993_vm1 = vmor %vm825_vm9, %vm965_vm2  ;;  %v5226_v26 = vsel %vm5190_vm4, 1.0, %v6615_v54 }
 0x1d2   : > { %927 = vperm.xlu1 %4193, %v864_v18   ;;  %v1063_v32 = vpop.permute.xlu1 %1062  ;;  %vm5199_vm8 = vmor %vm6789_vm12, %vm793_vm7  ;;  %vm6802_vm12 = vcmask 261120  }
 0x1d3   : > { %vm1133_vm6 = vcmp.eq.s32.totalorder %v4972_v31, %v1063_v32  ;;  %v5187_v35 = vpop.permute.xlu0 %1284  ;;  %vm1328_vm9 = vmor %vm6793_vm15, %vm1300_vm5  ;;  %v1586_v57 = vsel %vm6802_vm12, %v5221_v56, 0 }
 0x1d4   : > { %vm1161_vm0 = vmor %vm993_vm1, %vm1133_vm6  ;;  %vm6801_vm1 = vnez %v6782_v7  ;;  %4222 = vset.pattern.permute.xlu0 %v6712_v34  ;;  %v5267_v62 = vsub.f32 %v1586_v57, %v1586_v57  ;;  %v6808_v7 = vld [vmem:[#allocation82_spill] sm:$0xff] }
 0x1d5   : > { %vm5213_vm7 = vmor %vm1328_vm9, %vm1468_vm3  ;;  %vm1296_vm3 = vcmp.eq.s32.totalorder %v4972_v31, %v4943_v6  ;;  %v1200_v6 = vadd.s32 27, %v6777_v12 }
 0x1d6   : > { %4194 = vset.pattern.permute.xlu1 %v6695_v49  ;;  %v5206_v43 = vpop.permute.xlu1 %1065  ;;  %vm5229_vm6 = vmor %vm1161_vm0, %vm1301_vm11  ;;  %vm1129_vm11 = vcmp.eq.s32.totalorder %v4972_v31, %v4908_v10  ;;  %v5259_v22 = vsel %vm5213_vm7, 1.0, %v6615_v54  ;;  %v6807_v10 = vld [vmem:[#allocation7_spill] sm:$0xff]  ;;  %v6596_v32 = vand.u32 4294901760, %v5267_v62 }
 0x1d7   : > { %1092 = vperm.xlu1 %4194, %v1031_v46   ;;  %vm5235_vm5 = vmor %vm5165_vm14, %vm798_vm13  ;;  %vm1464_vm13 = vcmp.eq.s32.totalorder %v4972_v31, %v4953_v16  ;;  %v865_v41 = vadd.s32 16, %v6807_v10 }
 0x1d8   : > { %v880_v51 = vpop.permute.xlu0 %879  ;;  %vm6803_vm14 = vmmov %vm6802_vm12 }
 0x1d9   : > { %vm960_vm2 = vcmp.eq.s32.totalorder %v4972_v31, %v880_v51  ;;  %v1589_v60 = vsel %vm6803_vm14, %v5226_v26, 0 }
 0x1da   : > { %vm988_vm4 = vmor %vm6801_vm1, %vm960_vm2  ;;  %v5269_v53 = vsub.f32 %v1589_v60, %v1589_v60  ;;  %vm1297_vm1 = vcmp.eq.s32.totalorder %v4972_v31, %v4974_v55  ;;  %v6816_v60 = vld [vmem:[#allocation36_spill] sm:$0xff] }
 0x1db   : > { %vm1156_vm0 = vmor %vm988_vm4, %vm1128_vm10  ;;  %4196 = vset.pattern.permute.xlu1 %v6707_v48  ;;  %v1234_v63 = vpop.permute.xlu1 %1233 }
 0x1dc   : > { %vm1324_vm15 = vmor %vm1156_vm0, %vm1296_vm3  ;;  %1260 = vperm.xlu1 %4196, %v1199_v11   ;;  %v883_v3 = vpop.permute.xlu0 %882  ;;  %v6595_v5 = vand.u32 4294901760, %v5269_v53 }
 0x1dd   : > { %vm961_vm9 = vcmp.eq.s32.totalorder %v4972_v31, %v883_v3  ;;  %vm1492_vm2 = vmor %vm1324_vm15, %vm1464_vm13 }
 0x1de   : > { %vm989_vm10 = vmor %vm5199_vm8, %vm961_vm9  ;;  %v5265_v16 = vsel %vm1492_vm2, 1.0, %v6615_v54  ;;  %vm1465_vm8 = vcmp.eq.s32.totalorder %v4972_v31, %v4988_v28  ;;  %vm1134_vm9 = vcmp.eq.s32.totalorder %v4972_v31, %v5206_v43 }
 0x1df   : > { %vm1157_vm7 = vmor %vm989_vm10, %vm1129_vm11 }
 0x1e0   : > { %vm6804_vm4 = vmmov %vm6802_vm12  ;;  %1263 = vperm.xlu1 %4196, %v1200_v6   ;;  %v1399_v18 = vpop.permute.xlu1 %1398  ;;  %v898_v17 = vpop.permute.xlu0 %897  ;;  %v1762_v6 = vsub.f32 %v5267_v62, %v6596_v32  ;;  %v1033_v32 = vadd.s32 21, %v6807_v10 }
 0x1e1   : > { %v1580_v24 = vsel %vm6804_vm4, %v5265_v16, 0  ;;  %vm6805_vm3 = vmmov %vm6804_vm4  ;;  %vm1469_vm14 = vcmp.eq.s32.totalorder %v4972_v31, %v1399_v18  ;;  %vm966_vm11 = vcmp.eq.s32.totalorder %v4972_v31, %v898_v17  ;;  %v1772_v17 = vsub.f32 %v5269_v53, %v6595_v5 }
 0x1e2   : > { %3848 = vmatmul.mubr.msk.f32.vlgmr.msra.gmra.mxu1 %vm6805_vm3, %v5265_v16  ;;  %vm1325_vm0 = vmor %vm1157_vm7, %vm1297_vm1  ;;  %v5282_v23 = vsub.f32 %v1580_v24, %v1580_v24  ;;  %vm1302_vm1 = vcmp.eq.s32.totalorder %v4972_v31, %v1234_v63  ;;  %v1368_v63 = vadd.s32 29, %v6777_v12 }
 0x1e3   : > { %vm6806_vm12 = vmmov %vm6805_vm3  ;;  %3940 = vmatpush3.msra.mxu1 %v4781_v40 }
 0x1e4   : > { %v1592_v55 = vsel %vm6806_vm12, %v5259_v22, 0  ;;  %vm1493_vm13 = vmor %vm1325_vm0, %vm1465_vm8  ;;  %3941 = vmatprep.subr.mxu1 %v6808_v7  ;;  %v6611_v4 = vand.u32 4294901760, %v5282_v23  ;;  %4197 = vset.pattern.permute.xlu1 %v6702_v1  ;;  %v1402_v36 = vpop.permute.xlu1 %1401  ;;  %vm323_vm12 = vcmp.eq.s32.totalorder %v4972_v31, %v6815_v21  ;;  %v1773_v21 = vand.u32 4294901760, %v1772_v17  ;;  %v901_v17 = vpop.permute.xlu0 %900 }
 0x1e5   : > { %vm1497_vm15 = vmor %vm5229_vm6, %vm1469_vm14  ;;  %v5294_v28 = vsel %vm1493_vm13, 1.0, %v6615_v54  ;;  %3942 = vmatpush3.msra.mxu1 %v6808_v7  ;;  %v5308_v20 = vsub.f32 %v1592_v55, %v1592_v55  ;;  %vm1470_vm8 = vcmp.eq.s32.totalorder %v4972_v31, %v1402_v36  ;;  %930 = vperm.xlu1 %4197, %v865_v41   ;;  %v6819_v41 = vld [vmem:[#allocation37_spill] sm:$0xff] }
 0x1e6   : > { %vm994_vm2 = vmor %vm5235_vm5, %vm966_vm11  ;;  %v5311_v2 = vsel %vm1497_vm15, 1.0, %v6615_v54  ;;  %3943 = vmatprep.subr.mxu1 %v6811_v19  ;;  %v1742_v42 = vsub.f32 %v5282_v23, %v6611_v4  ;;  %vm463_vm11 = vcmp.eq.s32.totalorder %v4972_v31, %v6816_v60 }
 0x1e7   : > { %vm6809_vm10 = vmmov %vm6805_vm3  ;;  %3944 = vmatpush3.msra.mxu1 %v6811_v19  ;;  %v6605_v24 = vand.u32 4294901760, %v5308_v20 }
 0x1e8   : > { %v1583_v46 = vsel %vm6809_vm10, %v5294_v28, 0  ;;  %vm6810_vm6 = vmmov %vm6805_vm3  ;;  %v1743_v50 = vand.u32 4294901760, %v1742_v42  ;;  %3945 = vmatprep.subr.mxu1 %v4829_v33  ;;  %v6821_v42 = vld [vmem:[#allocation16_spill] sm:$0xff] }
 0x1e9   : > { %3850 = vmatprep.mubr.msk.f32.mxu1 %vm6810_vm6, %v5294_v28  ;;  %vm1162_vm7 = vmor %vm994_vm2, %vm1134_vm9  ;;  %v5315_v43 = vsub.f32 %v1583_v46, %v1583_v46  ;;  %vm464_vm9 = vcmp.eq.s32.totalorder %v4972_v31, %v6819_v41  ;;  %4198 = vset.pattern.permute.xlu1 %v6712_v34  ;;  %v904_v46 = vpop.permute.xlu1 %903  ;;  %vm324_vm10 = vcmp.eq.s32.totalorder %v4972_v31, %v6821_v42  ;;  %v1763_v42 = vand.u32 4294901760, %v1762_v6  ;;  %v6828_v6 = vld [vmem:[#allocation57_spill] sm:$0xff] }
 0x1ea   : > { %vm6812_vm5 = vmmov %vm6805_vm3  ;;  %3798 = vmatmul.mubr.f32.vlgmr.msra.gmra.mxu0 %v1743_v50  ;;  %v6823_v50 = vld [vmem:[#allocation81_spill] sm:$0xff]  ;;  %1431 = vperm.xlu1 %4198, %v1368_v63   ;;  %v1782_v63 = vsub.f32 %v5308_v20, %v6605_v24 }
 0x1eb   : > { %3851 = vmatmul.mubr.msk.f32.gmra.mxu1 %vm6812_vm5, %v5221_v56  ;;  %vm6813_vm4 = vmmov %vm6805_vm3  ;;  %v6607_v57 = vand.u32 4294901760, %v5315_v43  ;;  %3890 = vmatpush3.msra.mxu0 %v4792_v58  ;;  %v6826_v58 = vld [vmem:[#allocation84_spill] sm:$0xff] }
 0x1ec   : > { %v1595_v51 = vsel %vm6813_vm4, %v5311_v2, 0  ;;  %vm1330_vm3 = vmor %vm1162_vm7, %vm1302_vm1  ;;  %vm800_vm1 = vcmp.eq.s32.totalorder %v4972_v31, %v6823_v50  ;;  %3891 = vmatprep.subr.mxu0 %v6826_v58  ;;  %3946 = vmatpush3.msra.mxu1 %v4829_v33  ;;  %v1783_v41 = vand.u32 4294901760, %v1782_v63 }
 0x1ed   : > { %vm6814_vm0 = vmmov %vm6813_vm4  ;;  %v5328_v11 = vsub.f32 %v1595_v51, %v1595_v51  ;;  %v1752_v12 = vsub.f32 %v5315_v43, %v6607_v57  ;;  %v6822_v51 = vld [vmem:[#allocation60_spill] sm:$0xff]  ;;  %vm968_vm4 = vcmp.eq.s32.totalorder %v4972_v31, %v904_v46  ;;  %4039 = vmatprep.subr.mxu1 %v4781_v40  ;;  %3892 = vmatpush3.msra.mxu0 %v6826_v58  ;;  %v6830_v46 = vld [vmem:[#allocation83_spill] sm:$0xff] }
 0x1ee   : > { %3853 = vmatprep.mubr.msk.f32.mxu1 %vm6814_vm0, %v5226_v26  ;;  %vm1498_vm14 = vmor %vm1330_vm3, %vm1470_vm8  ;;  %vm632_vm6 = vcmp.eq.s32.totalorder %v4972_v31, %v6822_v51  ;;  %4199 = vset.pattern.permute.xlu1 %v6695_v49  ;;  %v1034_v51 = vadd.s32 21, %v4430_v25  ;;  %v6894_v57 = vld [vmem:[#allocation44_spill] sm:$0xff] }
 0x1ef   : > { %v5338_v3 = vsel %vm1498_vm14, 1.0, %v6615_v54  ;;  %vm6817_vm13 = vmmov %vm6814_vm0  ;;  %v6604_v55 = vand.u32 4294901760, %v5328_v11  ;;  %v1753_v5 = vand.u32 4294901760, %v1752_v12  ;;  %vm1304_vm14 = vcmp.eq.s32.totalorder %v4972_v31, %v5050_v59  ;;  %1098 = vperm.xlu1 %4199, %v1033_v32   ;;  %3893 = vmatprep.subr.mxu0 %v4827_v52 }
 0x1f0   : > { %3854 = vmatmul.mubr.msk.f32.gmra.mxu1 %vm6817_vm13, %v5259_v22  ;;  %vm6818_vm15 = vmmov %vm6814_vm0  ;;  %3894 = vmatpush3.msra.mxu0 %v4827_v52 }
 0x1f1   : > { %v1598_v18 = vsel %vm6818_vm15, %v5338_v3, 0  ;;  %vm6820_vm2 = vmmov %vm6814_vm0  ;;  %3800 = vmatprep.mubr.f32.mxu0 %v1753_v5  ;;  %v1792_v60 = vsub.f32 %v5328_v11, %v6604_v55  ;;  %v1072_v5 = vpop.permute.xlu1 %1071  ;;  %vm1472_vm15 = vcmp.eq.s32.totalorder %v4972_v31, %v4955_v27  ;;  %3895 = vmatprep.subr.mxu0 %v4842_v45  ;;  %v6889_v55 = vld [vmem:[#allocation95_spill] sm:$0xff] }
 0x1f2   : > { %3856 = vmatprep.mubr.msk.f32.mxu1 %vm6820_vm2, %v5311_v2  ;;  %v5361_v36 = vsub.f32 %v1598_v18, %v1598_v18  ;;  %vm5376_vm7 = vmor %vm323_vm12, %vm463_vm11  ;;  %3801 = vmatmul.mubr.f32.gmra.mxu0 %v1763_v42  ;;  %vm1136_vm13 = vcmp.eq.s32.totalorder %v4972_v31, %v1072_v5  ;;  %vm799_vm2 = vcmp.eq.s32.totalorder %v4972_v31, %v4845_v9  ;;  %v1202_v9 = vadd.s32 27, %v4430_v25 }
 0x1f3   : > { %vm492_vm5 = vmor %vm324_vm10, %vm464_vm9  ;;  %3803 = vmatprep.mubr.f32.mxu0 %v1773_v21  ;;  %v1793_v42 = vand.u32 4294901760, %v1792_v60  ;;  %1101 = vperm.xlu1 %4199, %v1034_v51   ;;  %v6833_v60 = vld [vmem:[#allocation39_spill] sm:$0xff]  ;;  %v1370_v5 = vadd.s32 29, %v4430_v25 }
 0x1f4   : > { %v6600_v12 = vand.u32 4294901760, %v5361_v36  ;;  %vm6827_vm3 = vmmov %vm6814_vm0  ;;  %vm631_vm0 = vcmp.eq.s32.totalorder %v4972_v31, %v6828_v6  ;;  %3896 = vmatpush3.msra.mxu0 %v4842_v45  ;;  %v1369_v45 = vadd.s32 29, %v6807_v10  ;;  %v6837_v51 = vld [vmem:[#allocation87_spill] sm:$0xff] }
 0x1f5   : > { %3857 = vmatmul.mubr.msk.f32.gmra.mxu1 %vm6827_vm3, %v5338_v3  ;;  %vm660_vm8 = vmor %vm492_vm5, %vm632_vm6  ;;  %v1237_v27 = vpop.permute.xlu1 %1236  ;;  %3989 = vmatprep.subr.mxu0 %v6830_v46 }
 0x1f6   : > { %vm828_vm12 = vmor %vm660_vm8, %vm800_vm1  ;;  %v1802_v50 = vsub.f32 %v5361_v36, %v6600_v12  ;;  %3804 = vmatmul.mubr.f32.gmra.mxu0 %v1783_v41  ;;  %vm967_vm1 = vcmp.eq.s32.totalorder %v4972_v31, %v901_v17  ;;  %vm6829_vm8 = vcmask 261120   ;;  %v6835_v17 = vld [vmem:[#allocation62_spill] sm:$0xff] }
 0x1f7   : > { %vm996_vm11 = vmor %vm828_vm12, %vm968_vm4  ;;  %3806 = vmatprep.mubr.f32.mxu0 %v1793_v42  ;;  %4200 = vset.pattern.permute.xlu1 %v6707_v48  ;;  %v6836_v41 = vld [vmem:[#allocation18_spill] sm:$0xff] }
 0x1f8   : > { %vm1164_vm9 = vmor %vm996_vm11, %vm1136_vm13  ;;  %v1803_v32 = vand.u32 4294901760, %v1802_v50  ;;  %1269 = vperm.xlu1 %4200, %v1202_v9  }
 0x1f9   : > { %vm1332_vm10 = vmor %vm1164_vm9, %vm1304_vm14  ;;  %v1405_v18 = vpop.permute.xlu1 %1404 }
 0x1fa   : > { %vm659_vm6 = vmor %vm5376_vm7, %vm631_vm0  ;;  %vm1135_vm7 = vcmp.eq.s32.totalorder %v4972_v31, %v4922_v13  ;;  %3807 = vmatmul.mubr.f32.gmra.mxu0 %v1803_v32  ;;  %vm1303_vm0 = vcmp.eq.s32.totalorder %v4972_v31, %v1237_v27  ;;  %vm1471_vm11 = vcmp.eq.s32.totalorder %v4972_v31, %v1405_v18  ;;  %v6838_v32 = vld [vmem:[#allocation8_spill] sm:$0xff] }
 0x1fb   : > { %vm1500_vm5 = vmor %vm1332_vm10, %vm1472_vm15  ;;  %v868_v9 = vadd.s32 16, %v6838_v32 }
 0x1fc   : > { %vm827_vm4 = vmor %vm659_vm6, %vm799_vm2  ;;  %v5434_v59 = vsel %vm1500_vm5, 1.0, %v6615_v54  ;;  %4201 = vset.pattern.permute.xlu1 %v6712_v34  ;;  %vm466_vm2 = vcmp.eq.s32.totalorder %v4972_v31, %v6833_v60  ;;  %vm634_vm6 = vcmp.eq.s32.totalorder %v4972_v31, %v6835_v17  ;;  %vm802_vm5 = vcmp.eq.s32.totalorder %v4972_v31, %v6837_v51  ;;  %v6844_v17 = vld [vmem:[#allocation92_spill] sm:$0xff]  ;;  %v6845_v51 = vld [vmem:[#allocation110_spill] sm:$0xff] }
 0x1fd   : > { %vm995_vm3 = vmor %vm827_vm4, %vm967_vm1  ;;  %v1604_v52 = vsel %vm6829_vm8, %v5434_v59, 0  ;;  %1434 = vperm.xlu1 %4201, %v1369_v45   ;;  %v907_v10 = vpop.permute.xlu1 %906  ;;  %vm326_vm1 = vcmp.eq.s32.totalorder %v4972_v31, %v6836_v41  ;;  %v6839_v45 = vld [vmem:[#allocation19_spill] sm:$0xff]  ;;  %v1036_v41 = vadd.s32 21, %v6838_v32 }
 0x1fe   : > { %vm1163_vm12 = vmor %vm995_vm3, %vm1135_vm7  ;;  %v5444_v63 = vsub.f32 %v1604_v52, %v1604_v52 }
 0x1ff   : > { %vm1331_vm14 = vmor %vm1163_vm12, %vm1303_vm0 }
 0x200   : > { %vm1499_vm13 = vmor %vm1331_vm14, %vm1471_vm11  ;;  %v6598_v21 = vand.u32 4294901760, %v5444_v63  ;;  %vm325_vm14 = vcmp.eq.s32.totalorder %v4972_v31, %v6839_v45 }
 0x201   : > { %v5449_v13 = vsel %vm1499_vm13, 1.0, %v6615_v54  ;;  %vm6831_vm15 = vmmov %vm6829_vm8  ;;  %1437 = vperm.xlu1 %4201, %v1370_v5   ;;  %v910_v27 = vpop.permute.xlu1 %909 }
 0x202   : > { %v1601_v58 = vsel %vm6831_vm15, %v5449_v13, 0  ;;  %vm6832_vm9 = vmmov %vm6829_vm8  ;;  %v1822_v42 = vsub.f32 %v5444_v63, %v6598_v21  ;;  %vm970_vm0 = vcmp.eq.s32.totalorder %v4972_v31, %v910_v27  ;;  %v6846_v27 = vld [vmem:[#allocation9_spill] sm:$0xff] }
 0x203   : > { %3859 = vmatprep.mubr.msk.f32.mxu1 %vm6832_vm9, %v5449_v13  ;;  %v5459_v6 = vsub.f32 %v1601_v58, %v1601_v58  ;;  %vm6834_vm10 = vmmov %vm6829_vm8  ;;  %vm1138_vm8 = vcmp.eq.s32.totalorder %v4972_v31, %v4927_v37  ;;  %v6840_v58 = vld [vmem:[#allocation38_spill] sm:$0xff]  ;;  %v6843_v37 = vld [vmem:[#allocation59_spill] sm:$0xff]  ;;  %vm801_vm9 = vcmp.eq.s32.totalorder %v4972_v31, %v6844_v17 }
 0x204   : > { %3860 = vmatmul.mubr.msk.f32.gmra.mxu1 %vm6834_vm10, %v5434_v59  ;;  %vm494_vm4 = vmor %vm326_vm1, %vm466_vm2  ;;  %v1823_v18 = vand.u32 4294901760, %v1822_v42  ;;  %vm465_vm11 = vcmp.eq.s32.totalorder %v4972_v31, %v6840_v58  ;;  %vm633_vm15 = vcmp.eq.s32.totalorder %v4972_v31, %v6843_v37  ;;  %vm969_vm10 = vcmp.eq.s32.totalorder %v4972_v31, %v907_v10 }
 0x205   : > { %v6599_v50 = vand.u32 4294901760, %v5459_v6  ;;  %vm662_vm7 = vmor %vm494_vm4, %vm634_vm6  ;;  %4202 = vset.pattern.permute.xlu1 %v6702_v1  ;;  %vm1473_vm4 = vcmp.eq.s32.totalorder %v4972_v31, %v6845_v51 }
 0x206   : > { %vm830_vm3 = vmor %vm662_vm7, %vm802_vm5  ;;  %939 = vperm.xlu1 %4202, %v868_v9   ;;  %v1075_v5 = vpop.permute.xlu1 %1074 }
 0x207   : > { %v1812_v25 = vsub.f32 %v5459_v6, %v6599_v50  ;;  %vm998_vm12 = vmor %vm830_vm3, %vm970_vm0  ;;  %vm1137_vm1 = vcmp.eq.s32.totalorder %v4972_v31, %v1075_v5  ;;  %v6849_v5 = vld [vmem:[#allocation11_spill] sm:$0xff]  ;;  %v6857_v50 = vld [vmem:[#allocation20_spill] sm:$0xff] }
 0x208   : > { %vm5486_vm13 = vmor %vm998_vm12, %vm1138_vm8  ;;  %v869_v17 = vadd.s32 16, %v6849_v5 }
 0x209   : > { %v1813_v52 = vand.u32 4294901760, %v1812_v25  ;;  %vm493_vm2 = vmor %vm325_vm14, %vm465_vm11  ;;  %v1203_v25 = vadd.s32 27, %v6846_v27  ;;  %vm6847_vm14 = vcmask 261120  }
 0x20a   : > { %vm661_vm6 = vmor %vm493_vm2, %vm633_vm15  ;;  %4203 = vset.pattern.permute.xlu1 %v6695_v49 }
 0x20b   : > { %3809 = vmatprep.mubr.f32.mxu0 %v1813_v52  ;;  %vm829_vm5 = vmor %vm661_vm6, %vm801_vm9  ;;  %1107 = vperm.xlu1 %4203, %v1036_v41   ;;  %v1243_v42 = vpop.permute.xlu1 %1242 }
 0x20c   : > { %3810 = vmatmul.mubr.f32.gmra.mxu0 %v1823_v18  ;;  %vm997_vm7 = vmor %vm829_vm5, %vm969_vm10  ;;  %vm1305_vm8 = vcmp.eq.s32.totalorder %v4972_v31, %v1243_v42  ;;  %v1371_v18 = vadd.s32 29, %v6846_v27  ;;  %v6850_v42 = vld [vmem:[#allocation10_spill] sm:$0xff] }
 0x20d   : > { %vm1165_vm3 = vmor %vm997_vm7, %vm1137_vm1  ;;  %v870_v27 = vadd.s32 16, %v6850_v42 }
 0x20e   : > { %vm1333_vm0 = vmor %vm1165_vm3, %vm1305_vm8  ;;  %vm328_vm3 = vcmp.eq.s32.totalorder %v4972_v31, %v6857_v50  ;;  %v1206_v50 = vadd.s32 27, %v6850_v42 }
 0x20f   : > { %vm1501_vm12 = vmor %vm1333_vm0, %vm1473_vm4  ;;  %4204 = vset.pattern.permute.xlu1 %v6707_v48  ;;  %v1246_v10 = vpop.permute.xlu1 %1245 }
 0x210   : > { %v5504_v32 = vsel %vm1501_vm12, 1.0, %v6615_v54  ;;  %1272 = vperm.xlu1 %4204, %v1203_v25   ;;  %vm6848_vm11 = vmmov %vm6847_vm14  ;;  %vm1306_vm15 = vcmp.eq.s32.totalorder %v4972_v31, %v1246_v10 }
 0x211   : > { %v1607_v9 = vsel %vm6847_vm14, %v5504_v32, 0  ;;  %3862 = vmatprep.mubr.msk.f32.mxu1 %vm6848_vm11, %v5504_v32  ;;  %vm1334_vm9 = vmor %vm5486_vm13, %vm1306_vm15 }
 0x212   : > { %v5510_v52 = vsub.f32 %v1607_v9, %v1607_v9  ;;  %vm6851_vm6 = vmmov %vm6848_vm11 }
 0x213   : > { %vm6852_vm1 = vmmov %vm6851_vm6 }
 0x214   : > { %v6597_v45 = vand.u32 4294901760, %v5510_v52  ;;  %4205 = vset.pattern.permute.xlu1 %v6712_v34  ;;  %v913_v58 = vpop.permute.xlu1 %912 }
 0x215   : > { %1440 = vperm.xlu1 %4205, %v1371_v18   ;;  %v1037_v18 = vadd.s32 21, %v6849_v5  ;;  %vm971_vm14 = vcmp.eq.s32.totalorder %v4972_v31, %v913_v58  ;;  %v6863_v58 = vld [vmem:[#allocation13_spill] sm:$0xff] }
 0x216   : > { %v1832_v37 = vsub.f32 %v5510_v52, %v6597_v45  ;;  %v6855_v45 = vld [vmem:[#allocation41_spill] sm:$0xff] }
 0x217   : > { %vm468_vm4 = vcmp.eq.s32.totalorder %v4972_v31, %v6855_v45 }
 0x218   : > { %v1833_v41 = vand.u32 4294901760, %v1832_v37  ;;  %vm5553_vm12 = vmor %vm328_vm3, %vm468_vm4 }
 0x219   : > { %4206 = vset.pattern.permute.xlu1 %v6702_v1  ;;  %v1414_v51 = vpop.permute.xlu1 %1413 }
 0x21a   : > { %3812 = vmatprep.mubr.f32.mxu0 %v1833_v41  ;;  %vm1474_vm2 = vcmp.eq.s32.totalorder %v4972_v31, %v1414_v51  ;;  %942 = vperm.xlu1 %4206, %v869_v17   ;;  %v6853_v17 = vld [vmem:[#allocation21_spill] sm:$0xff]  ;;  %v6854_v41 = vld [vmem:[#allocation40_spill] sm:$0xff] }
 0x21b   : > { %vm1502_vm10 = vmor %vm1334_vm9, %vm1474_vm2  ;;  %vm327_vm13 = vcmp.eq.s32.totalorder %v4972_v31, %v6853_v17  ;;  %vm467_vm5 = vcmp.eq.s32.totalorder %v4972_v31, %v6854_v41  ;;  %v1205_v17 = vadd.s32 27, %v6849_v5  ;;  %v6858_v41 = vld [vmem:[#allocation94_spill] sm:$0xff]  ;;  %v6861_v5 = vld [vmem:[#allocation64_spill] sm:$0xff] }
 0x21c   : > { %v5526_v25 = vsel %vm1502_vm10, 1.0, %v6615_v54  ;;  %vm495_vm8 = vmor %vm327_vm13, %vm467_vm5  ;;  %vm803_vm0 = vcmp.eq.s32.totalorder %v4972_v31, %v6858_v41  ;;  %vm636_vm9 = vcmp.eq.s32.totalorder %v4972_v31, %v6861_v5  ;;  %v6866_v5 = vld [vmem:[#allocation23_spill] sm:$0xff] }
 0x21d   : > { %v1610_v10 = vsel %vm6851_vm6, %v5526_v25, 0  ;;  %3863 = vmatmul.mubr.msk.f32.gmra.mxu1 %vm6852_vm1, %v5526_v25  ;;  %vm1307_vm1 = vcmp.eq.s32.totalorder %v4972_v31, %v5080_v47  ;;  %vm664_vm5 = vmor %vm5553_vm12, %vm636_vm9 }
 0x21e   : > { %v5532_v9 = vsub.f32 %v1610_v10, %v1610_v10  ;;  %945 = vperm.xlu1 %4206, %v870_v27   ;;  %v1081_v60 = vpop.permute.xlu1 %1080  ;;  %v6856_v27 = vld [vmem:[#allocation61_spill] sm:$0xff] }
 0x21f   : > { %vm635_vm7 = vcmp.eq.s32.totalorder %v4972_v31, %v6856_v27  ;;  %vm1139_vm15 = vcmp.eq.s32.totalorder %v4972_v31, %v1081_v60  ;;  %v871_v60 = vadd.s32 16, %v6863_v58 }
 0x220   : > { %v6601_v37 = vand.u32 4294901760, %v5532_v9  ;;  %vm663_vm11 = vmor %vm495_vm8, %vm635_vm7 }
 0x221   : > { %vm831_vm2 = vmor %vm663_vm11, %vm803_vm0 }
 0x222   : > { %4207 = vset.pattern.permute.xlu1 %v6695_v49  ;;  %v1084_v51 = vpop.permute.xlu1 %1083  ;;  %v1842_v10 = vsub.f32 %v5532_v9, %v6601_v37  ;;  %vm999_vm6 = vmor %vm831_vm2, %vm971_vm14 }
 0x223   : > { %1110 = vperm.xlu1 %4207, %v1037_v18   ;;  %v6862_v18 = vld [vmem:[#allocation90_spill] sm:$0xff]  ;;  %vm1167_vm13 = vmor %vm999_vm6, %vm1139_vm15  ;;  %vm1140_vm3 = vcmp.eq.s32.totalorder %v4972_v31, %v1084_v51  ;;  %vm6864_vm15 = vcmask 261120  }
 0x224   : > { %v1843_v21 = vand.u32 4294901760, %v1842_v10  ;;  %vm804_vm10 = vcmp.eq.s32.totalorder %v4972_v31, %v6862_v18  ;;  %v916_v10 = vpop.permute.xlu0 %915  ;;  %vm1335_vm8 = vmor %vm1167_vm13, %vm1307_vm1  ;;  %vm329_vm13 = vcmp.eq.s32.totalorder %v4972_v31, %v6866_v5 }
 0x225   : > { %vm832_vm4 = vmor %vm664_vm5, %vm804_vm10  ;;  %vm972_vm7 = vcmp.eq.s32.totalorder %v4972_v31, %v916_v10  ;;  %v6870_v10 = vld [vmem:[#allocation43_spill] sm:$0xff] }
 0x226   : > { %3813 = vmatmul.mubr.f32.gmra.mxu0 %v1843_v21  ;;  %vm1000_vm2 = vmor %vm832_vm4, %vm972_vm7 }
 0x227   : > { %4208 = vset.pattern.permute.xlu1 %v6707_v48  ;;  %v1252_v45 = vpop.permute.xlu1 %1251  ;;  %vm1168_vm12 = vmor %vm1000_vm2, %vm1140_vm3  ;;  %vm470_vm3 = vcmp.eq.s32.totalorder %v4972_v31, %v6870_v10  ;;  %v1039_v10 = vadd.s32 21, %v6863_v58 }
 0x228   : > { %1278 = vperm.xlu1 %4208, %v1205_v17   ;;  %vm1308_vm14 = vcmp.eq.s32.totalorder %v4972_v31, %v1252_v45  ;;  %vm6865_vm9 = vmmov %vm6864_vm15  ;;  %v1374_v17 = vadd.s32 29, %v6850_v42 }
 0x229   : > { %vm1336_vm10 = vmor %vm1168_vm12, %vm1308_vm14 }
 0x22a   : > { %vm6868_vm4 = vmmov %vm6865_vm9 }
 0x22b   : > { %vm6869_vm7 = vmmov %vm6868_vm4 }
 0x22c   : > { %1281 = vperm.xlu1 %4208, %v1206_v50   ;;  %v1417_v21 = vpop.permute.xlu1 %1416  ;;  %v6867_v50 = vld [vmem:[#allocation42_spill] sm:$0xff] }
 0x22d   : > { %vm1475_vm0 = vcmp.eq.s32.totalorder %v4972_v31, %v1417_v21  ;;  %vm469_vm5 = vcmp.eq.s32.totalorder %v4972_v31, %v6867_v50  ;;  %v6875_v50 = vld [vmem:[#allocation93_spill] sm:$0xff] }
 0x22e   : > { %vm1503_vm11 = vmor %vm1335_vm8, %vm1475_vm0 }
 0x22f   : > { %v5575_v47 = vsel %vm1503_vm11, 1.0, %v6615_v54  ;;  %vm5610_vm14 = vmor %vm329_vm13, %vm469_vm5  ;;  %vm806_vm11 = vcmp.eq.s32.totalorder %v4972_v31, %v6875_v50  ;;  %v6877_v50 = vld [vmem:[#allocation12_spill] sm:$0xff] }
 0x230   : > { %v1613_v12 = vsel %vm6864_vm15, %v5575_v47, 0  ;;  %4210 = vset.pattern.permute.xlu1 %v6702_v1  ;;  %v1420_v27 = vpop.permute.xlu1 %1419  ;;  %3865 = vmatprep.mubr.msk.f32.mxu1 %vm6865_vm9, %v5575_v47 }
 0x231   : > { %v5582_v51 = vsub.f32 %v1613_v12, %v1613_v12  ;;  %vm1476_vm6 = vcmp.eq.s32.totalorder %v4972_v31, %v1420_v27  ;;  %948 = vperm.xlu1 %4210, %v871_v60   ;;  %v6871_v12 = vld [vmem:[#allocation22_spill] sm:$0xff] }
 0x232   : > { %vm1504_vm1 = vmor %vm1336_vm10, %vm1476_vm6  ;;  %vm330_vm8 = vcmp.eq.s32.totalorder %v4972_v31, %v6871_v12  ;;  %v6872_v27 = vld [vmem:[#allocation66_spill] sm:$0xff]  ;;  %vm1310_vm10 = vcmp.eq.s32.totalorder %v4972_v31, %v5105_v29  ;;  %v6876_v12 = vld [vmem:[#allocation111_spill] sm:$0xff] }
 0x233   : > { %v5587_v41 = vsel %vm1504_vm1, 1.0, %v6615_v54  ;;  %v6602_v45 = vand.u32 4294901760, %v5582_v51  ;;  %vm638_vm0 = vcmp.eq.s32.totalorder %v4972_v31, %v6872_v27  ;;  %vm498_vm2 = vmor %vm330_vm8, %vm470_vm3  ;;  %vm1478_vm6 = vcmp.eq.s32.totalorder %v4972_v31, %v6876_v12  ;;  %v919_v27 = vpop.permute.xlu0 %918 }
 0x234   : > { %v1616_v18 = vsel %vm6868_vm4, %v5587_v41, 0  ;;  %3866 = vmatmul.mubr.msk.f32.gmra.mxu1 %vm6869_vm7, %v5587_v41  ;;  %vm666_vm15 = vmor %vm498_vm2, %vm638_vm0  ;;  %vm973_vm8 = vcmp.eq.s32.totalorder %v4972_v31, %v919_v27  ;;  %v1375_v12 = vadd.s32 29, %v6863_v58 }
 0x235   : > { %v5600_v42 = vsub.f32 %v1616_v18, %v1616_v18  ;;  %4211 = vset.pattern.permute.xlu1 %v6712_v34  ;;  %v922_v21 = vpop.permute.xlu1 %921  ;;  %v1852_v60 = vsub.f32 %v5582_v51, %v6602_v45  ;;  %vm834_vm9 = vmor %vm666_vm15, %vm806_vm11  ;;  %v6878_v45 = vld [vmem:[#allocation63_spill] sm:$0xff] }
 0x236   : > { %1449 = vperm.xlu1 %4211, %v1374_v17   ;;  %vm974_vm12 = vcmp.eq.s32.totalorder %v4972_v31, %v922_v21  ;;  %vm637_vm5 = vcmp.eq.s32.totalorder %v4972_v31, %v6878_v45  ;;  %v1208_v45 = vadd.s32 27, %v6877_v50 }
 0x237   : > { %v1853_v18 = vand.u32 4294901760, %v1852_v60  ;;  %v6603_v37 = vand.u32 4294901760, %v5600_v42  ;;  %vm1002_vm1 = vmor %vm834_vm9, %vm974_vm12  ;;  %vm6882_vm9 = vcmask 261120  }
 0x238   : > { %vm665_vm11 = vmor %vm5610_vm14, %vm637_vm5 }
 0x239   : > { %3815 = vmatprep.mubr.f32.mxu0 %v1853_v18  ;;  %v1862_v17 = vsub.f32 %v5600_v42, %v6603_v37  ;;  %v1040_v18 = vadd.s32 21, %v6877_v50  ;;  %v6879_v37 = vld [vmem:[#allocation96_spill] sm:$0xff]  ;;  %vm6883_vm5 = vmmov %vm6882_vm9 }
 0x23a   : > { %4212 = vset.pattern.permute.xlu1 %v6695_v49  ;;  %v1090_v60 = vpop.permute.xlu1 %1089  ;;  %vm805_vm7 = vcmp.eq.s32.totalorder %v4972_v31, %v6879_v37 }
 0x23b   : > { %vm1142_vm13 = vcmp.eq.s32.totalorder %v4972_v31, %v1090_v60  ;;  %1116 = vperm.xlu1 %4212, %v1039_v10   ;;  %v1863_v21 = vand.u32 4294901760, %v1862_v17  ;;  %vm833_vm2 = vmor %vm665_vm11, %vm805_vm7  ;;  %v6881_v17 = vld [vmem:[#allocation108_spill] sm:$0xff]  ;;  %vm808_vm11 = vcmp.eq.s32.totalorder %v4972_v31, %v6889_v55  ;;  %v6890_v55 = vld [vmem:[#allocation109_spill] sm:$0xff] }
 0x23c   : > { %vm1170_vm4 = vmor %vm1002_vm1, %vm1142_vm13  ;;  %vm1141_vm12 = vcmp.eq.s32.totalorder %v4972_v31, %v6881_v17  ;;  %v1376_v17 = vadd.s32 29, %v6877_v50 }
 0x23d   : > { %vm1338_vm3 = vmor %vm1170_vm4, %vm1310_vm10  ;;  %3816 = vmatmul.mubr.f32.gmra.mxu0 %v1863_v21 }
 0x23e   : > { %vm1506_vm0 = vmor %vm1338_vm3, %vm1478_vm6 }
 0x23f   : > { %1119 = vperm.xlu1 %4212, %v1040_v18   ;;  %v1255_v29 = vpop.permute.xlu1 %1254  ;;  %v5637_v10 = vsel %vm1506_vm0, 1.0, %v6615_v54  ;;  %vm1001_vm15 = vmor %vm833_vm2, %vm973_vm8 }
 0x240   : > { %6880 = vst [vmem:[#allocation56_spill] sm:$0xff] %v5637_v10  ;;  %v1622_v37 = vsel %vm6882_vm9, %v5637_v10, 0  ;;  %vm1309_vm10 = vcmp.eq.s32.totalorder %v4972_v31, %v1255_v29  ;;  %vm1169_vm14 = vmor %vm1001_vm15, %vm1141_vm12  ;;  %v6885_v29 = vld [vmem:[#allocation45_spill] sm:$0xff] }
 0x241   : > { %v5646_v60 = vsub.f32 %v1622_v37, %v1622_v37  ;;  %vm1337_vm6 = vmor %vm1169_vm14, %vm1309_vm10  ;;  %vm472_vm7 = vcmp.eq.s32.totalorder %v4972_v31, %v6885_v29  ;;  %v6887_v37 = vld [vmem:[#allocation68_spill] sm:$0xff]  ;;  %vm1144_vm10 = vcmp.eq.s32.totalorder %v4972_v31, %v6890_v55 }
 0x242   : > { %vm6884_vm4 = vmmov %vm6883_vm5  ;;  %vm640_vm8 = vcmp.eq.s32.totalorder %v4972_v31, %v6887_v37  ;;  %v874_v37 = vadd.s32 16, %v6794_v38 }
 0x243   : > { %4214 = vset.pattern.permute.xlu1 %v6707_v48  ;;  %v6606_v18 = vand.u32 4294901760, %v5646_v60  ;;  %vm6886_vm3 = vmmov %vm6884_vm4 }
 0x244   : > { %1287 = vperm.xlu1 %4214, %v1208_v45   ;;  %v1423_v5 = vpop.permute.xlu1 %1422 }
 0x245   : > { %vm1477_vm1 = vcmp.eq.s32.totalorder %v4972_v31, %v1423_v5  ;;  %v6888_v5 = vld [vmem:[#allocation24_spill] sm:$0xff] }
 0x246   : > { %vm1505_vm13 = vmor %vm1337_vm6, %vm1477_vm1  ;;  %vm332_vm0 = vcmp.eq.s32.totalorder %v4972_v31, %v6888_v5 }
 0x247   : > { %v5651_v27 = vsel %vm1505_vm13, 1.0, %v6615_v54  ;;  %vm500_vm2 = vmor %vm332_vm0, %vm472_vm7  ;;  %vm471_vm13 = vcmp.eq.s32.totalorder %v4972_v31, %v6894_v57  ;;  %v6897_v57 = vld [vmem:[#allocation15_spill] sm:$0xff] }
 0x248   : > { %v1619_v21 = vsel %vm6883_vm5, %v5651_v27, 0  ;;  %4215 = vset.pattern.permute.xlu1 %v6712_v34  ;;  %3868 = vmatprep.mubr.msk.f32.mxu1 %vm6884_vm4, %v5651_v27  ;;  %vm668_vm12 = vmor %vm500_vm2, %vm640_vm8  ;;  %vm1479_vm2 = vcmp.eq.s32.totalorder %v4972_v31, %v4970_v15 }
 0x249   : > { %v5661_v45 = vsub.f32 %v1619_v21, %v1619_v21  ;;  %1452 = vperm.xlu1 %4215, %v1375_v12   ;;  %v925_v58 = vpop.permute.xlu1 %924  ;;  %3869 = vmatmul.mubr.msk.f32.gmra.mxu1 %vm6886_vm3, %v5637_v10  ;;  %v1882_v12 = vsub.f32 %v5646_v60, %v6606_v18  ;;  %vm836_vm15 = vmor %vm668_vm12, %vm808_vm11  ;;  %v6905_v18 = vld [vmem:[#allocation46_spill] sm:$0xff] }
 0x24a   : > { %vm975_vm3 = vcmp.eq.s32.totalorder %v4972_v31, %v925_v58 }
 0x24b   : > { %v6610_v29 = vand.u32 4294901760, %v5661_v45  ;;  %v1883_v24 = vand.u32 4294901760, %v1882_v12  ;;  %v6896_v12 = vld [vmem:[#allocation98_spill] sm:$0xff] }
 0x24c   : > { %vm807_vm4 = vcmp.eq.s32.totalorder %v4972_v31, %v6896_v12 }
 0x24d   : > { %1455 = vperm.xlu1 %4215, %v1376_v17   ;;  %v928_v21 = vpop.permute.xlu1 %927  ;;  %v1872_v50 = vsub.f32 %v5661_v45, %v6610_v29  ;;  %v6893_v17 = vld [vmem:[#allocation25_spill] sm:$0xff] }
 0x24e   : > { %vm976_vm9 = vcmp.eq.s32.totalorder %v4972_v31, %v928_v21  ;;  %vm331_vm1 = vcmp.eq.s32.totalorder %v4972_v31, %v6893_v17  ;;  %v6895_v21 = vld [vmem:[#allocation65_spill] sm:$0xff] }
 0x24f   : > { %vm1004_vm14 = vmor %vm836_vm15, %vm976_vm9  ;;  %v1873_v5 = vand.u32 4294901760, %v1872_v50  ;;  %vm639_vm5 = vcmp.eq.s32.totalorder %v4972_v31, %v6895_v21  ;;  %v1042_v50 = vadd.s32 21, %v6794_v38  ;;  %v1378_v21 = vadd.s32 29, %v6794_v38 }
 0x250   : > { %vm5683_vm6 = vmor %vm1004_vm14, %vm1144_vm10 }
 0x251   : > { %4217 = vset.pattern.permute.xlu1 %v6702_v1  ;;  %3818 = vmatprep.mubr.f32.mxu0 %v1873_v5  ;;  %vm499_vm7 = vmor %vm331_vm1, %vm471_vm13  ;;  %vm6899_vm1 = vcmask 261120   ;;  %v1377_v5 = vadd.s32 29, %v6897_v57 }
 0x252   : > { %957 = vperm.xlu1 %4217, %v874_v37   ;;  %v1093_v55 = vpop.permute.xlu1 %1092  ;;  %3819 = vmatmul.mubr.f32.gmra.mxu0 %v1883_v24  ;;  %vm667_vm8 = vmor %vm499_vm7, %vm639_vm5  ;;  %v1209_v24 = vadd.s32 27, %v6897_v57 }
 0x253   : > { %vm1143_vm0 = vcmp.eq.s32.totalorder %v4972_v31, %v1093_v55  ;;  %vm835_vm11 = vmor %vm667_vm8, %vm807_vm4 }
 0x254   : > { %vm1003_vm12 = vmor %vm835_vm11, %vm975_vm3  ;;  %vm473_vm11 = vcmp.eq.s32.totalorder %v4972_v31, %v6905_v18 }
 0x255   : > { %vm1171_vm15 = vmor %vm1003_vm12, %vm1143_vm0 }
 0x256   : > { %4218 = vset.pattern.permute.xlu1 %v6695_v49  ;;  %vm6900_vm13 = vmmov %vm6899_vm1 }
 0x257   : > { %1125 = vperm.xlu1 %4218, %v1042_v50   ;;  %v1261_v1 = vpop.permute.xlu1 %1260  ;;  %vm6902_vm8 = vmmov %vm6899_vm1 }
 0x258   : > { %vm1311_vm9 = vcmp.eq.s32.totalorder %v4972_v31, %v1261_v1  ;;  %vm6903_vm0 = vmmov %vm6899_vm1 }
 0x259   : > { %vm1339_vm10 = vmor %vm1171_vm15, %vm1311_vm9 }
 0x25a   : > { %vm1507_vm14 = vmor %vm1339_vm10, %vm1479_vm2 }
 0x25b   : > { %4219 = vset.pattern.permute.xlu1 %v6707_v48  ;;  %v1264_v58 = vpop.permute.xlu1 %1263  ;;  %v5706_v37 = vsel %vm1507_vm14, 1.0, %v6615_v54 }
 0x25c   : > { %6898 = vst [vmem:[#allocation6_spill] sm:$0xff] %v5706_v37  ;;  %1290 = vperm.xlu1 %4219, %v1209_v24   ;;  %v1625_v49 = vsel %vm6899_vm1, %v5706_v37, 0  ;;  %3871 = vmatprep.mubr.msk.f32.mxu1 %vm6900_vm13, %v5706_v37  ;;  %vm1312_vm5 = vcmp.eq.s32.totalorder %v4972_v31, %v1264_v58  ;;  %v6904_v58 = vld [vmem:[#allocation27_spill] sm:$0xff] }
 0x25d   : > { %v5712_v15 = vsub.f32 %v1625_v49, %v1625_v49  ;;  %vm1340_vm4 = vmor %vm5683_vm6, %vm1312_vm5  ;;  %vm333_vm6 = vcmp.eq.s32.totalorder %v4972_v31, %v6904_v58  ;;  %v934_v58 = vpop.permute.xlu0 %933 }
 0x25e   : > { %vm501_vm9 = vmor %vm333_vm6, %vm473_vm11 }
 0x25f   : > { %v6609_v17 = vand.u32 4294901760, %v5712_v15 }
 0x260   : > { %4221 = vset.pattern.permute.xlu1 %v6712_v34  ;;  %v931_v48 = vpop.permute.xlu1 %930 }
 0x261   : > { %1458 = vperm.xlu1 %4221, %v1377_v5   ;;  %v1892_v55 = vsub.f32 %v5712_v15, %v6609_v17  ;;  %vm977_vm1 = vcmp.eq.s32.totalorder %v4972_v31, %v931_v48  ;;  %v937_v48 = vpop.permute.xlu0 %936  ;;  %v6921_v17 = vld [vmem:[#allocation99_spill] sm:$0xff] }
 0x263   : > { %v1893_v12 = vand.u32 4294901760, %v1892_v55  ;;  %v6907_v55 = vld [vmem:[#allocation67_spill] sm:$0xff] }
 0x264   : > { %vm641_vm12 = vcmp.eq.s32.totalorder %v4972_v31, %v6907_v55 }
 0x265   : > { %1461 = vperm.xlu1 %4221, %v1378_v21   ;;  %v1432_v50 = vpop.permute.xlu1 %1431  ;;  %3821 = vmatprep.mubr.f32.mxu0 %v1893_v12  ;;  %v6906_v21 = vld [vmem:[#allocation47_spill] sm:$0xff]  ;;  %vm669_vm13 = vmor %vm501_vm9, %vm641_vm12 }
 0x266   : > { %vm1480_vm7 = vcmp.eq.s32.totalorder %v4972_v31, %v1432_v50  ;;  %vm474_vm2 = vcmp.eq.s32.totalorder %v4972_v31, %v6906_v21  ;;  %v6908_v50 = vld [vmem:[#allocation26_spill] sm:$0xff] }
 0x267   : > { %vm1508_vm3 = vmor %vm1340_vm4, %vm1480_vm7  ;;  %vm334_vm15 = vcmp.eq.s32.totalorder %v4972_v31, %v6908_v50  ;;  %v6910_v21 = vld [vmem:[#allocation70_spill] sm:$0xff]  ;;  %v5772_v50 = vpop.permute.xlu0 %951 }
 0x268   : > { %v5726_v34 = vsel %vm1508_vm3, 1.0, %v6615_v54  ;;  %vm502_vm14 = vmor %vm334_vm15, %vm474_vm2  ;;  %vm642_vm4 = vcmp.eq.s32.totalorder %v4972_v31, %v6910_v21  ;;  %vm978_vm15 = vcmp.eq.s32.totalorder %v4972_v31, %v934_v58  ;;  %v6918_v21 = vld [vmem:[#allocation49_spill] sm:$0xff] }
 0x269   : > { %6901 = vst [vmem:[#allocation58_spill] sm:$0xff] %v5726_v34  ;;  %v1628_v38 = vsel %vm6902_vm8, %v5726_v34, 0  ;;  %3872 = vmatmul.mubr.msk.f32.gmra.mxu1 %vm6903_vm0, %v5726_v34  ;;  %vm1313_vm0 = vcmp.eq.s32.totalorder %v4972_v31, %v5137_v14  ;;  %vm670_vm11 = vmor %vm502_vm14, %vm642_vm4  ;;  %vm6913_vm14 = vcmask 261120   ;;  %v6944_v34 = vld [vmem:[#allocation101_spill] sm:$0xff] }
 0x26a   : > { %v5732_v1 = vsub.f32 %v1628_v38, %v1628_v38  ;;  %v1099_v57 = vpop.permute.xlu1 %1098  ;;  %v6909_v38 = vld [vmem:[#allocation100_spill] sm:$0xff]  ;;  %vm6914_vm4 = vmmov %vm6913_vm14 }
 0x26b   : > { %vm809_vm10 = vcmp.eq.s32.totalorder %v4972_v31, %v6909_v38  ;;  %vm1145_vm5 = vcmp.eq.s32.totalorder %v4972_v31, %v1099_v57 }
 0x26c   : > { %v6608_v24 = vand.u32 4294901760, %v5732_v1  ;;  %vm837_vm7 = vmor %vm669_vm13, %vm809_vm10 }
 0x26d   : > { %vm1005_vm8 = vmor %vm837_vm7, %vm977_vm1 }
 0x26e   : > { %v1102_v49 = vpop.permute.xlu1 %1101  ;;  %v1902_v5 = vsub.f32 %v5732_v1, %v6608_v24  ;;  %vm1173_vm6 = vmor %vm1005_vm8, %vm1145_vm5  ;;  %v6920_v24 = vld [vmem:[#allocation28_spill] sm:$0xff] }
 0x26f   : > { %vm1146_vm12 = vcmp.eq.s32.totalorder %v4972_v31, %v1102_v49  ;;  %vm1341_vm9 = vmor %vm1173_vm6, %vm1313_vm0 }
 0x270   : > { %v1903_v12 = vand.u32 4294901760, %v1902_v5  ;;  %v6911_v5 = vld [vmem:[#allocation97_spill] sm:$0xff]  ;;  %vm6916_vm6 = vmmov %vm6914_vm4 }
 0x271   : > { %vm810_vm3 = vcmp.eq.s32.totalorder %v4972_v31, %v6911_v5 }
 0x272   : > { %3822 = vmatmul.mubr.f32.gmra.mxu0 %v1903_v12  ;;  %vm838_vm2 = vmor %vm670_vm11, %vm810_vm3 }
 0x273   : > { %v1270_v18 = vpop.permute.xlu1 %1269  ;;  %vm1006_vm7 = vmor %vm838_vm2, %vm978_vm15  ;;  %vm476_vm2 = vcmp.eq.s32.totalorder %v4972_v31, %v6918_v21 }
 0x274   : > { %vm1314_vm13 = vcmp.eq.s32.totalorder %v4972_v31, %v1270_v18  ;;  %vm1174_vm5 = vmor %vm1006_vm7, %vm1146_vm12  ;;  %vm336_vm12 = vcmp.eq.s32.totalorder %v4972_v31, %v6920_v24  ;;  %v6922_v24 = vld [vmem:[#allocation29_spill] sm:$0xff] }
 0x275   : > { %vm1342_vm3 = vmor %vm1174_vm5, %vm1314_vm13 }
 0x276   : > { %vm6917_vm11 = vmmov %vm6914_vm4 }
 0x278   : > { %v1435_v55 = vpop.permute.xlu1 %1434 }
 0x279   : > { %vm1481_vm10 = vcmp.eq.s32.totalorder %v4972_v31, %v1435_v55 }
 0x27a   : > { %vm1509_vm1 = vmor %vm1341_vm9, %vm1481_vm10  ;;  %vm812_vm9 = vcmp.eq.s32.totalorder %v4972_v31, %v6921_v17 }
 0x27b   : > { %v5763_v57 = vsel %vm1509_vm1, 1.0, %v6615_v54  ;;  %vm504_vm10 = vmor %vm336_vm12, %vm476_vm2 }
 0x27c   : > { %6912 = vst [vmem:[#allocation78_spill] sm:$0xff] %v5763_v57  ;;  %v1631_v14 = vsel %vm6913_vm14, %v5763_v57, 0  ;;  %v1438_v12 = vpop.permute.xlu1 %1437  ;;  %3874 = vmatprep.mubr.msk.f32.mxu1 %vm6914_vm4, %v5763_v57  ;;  %vm1316_vm4 = vcmp.eq.s32.totalorder %v4972_v31, %v5159_v0  ;;  %v6943_v57 = vld [vmem:[#allocation30_spill] sm:$0xff] }
 0x27d   : > { %v5769_v49 = vsub.f32 %v1631_v14, %v1631_v14  ;;  %vm1482_vm8 = vcmp.eq.s32.totalorder %v4972_v31, %v1438_v12  ;;  %v6919_v12 = vld [vmem:[#allocation72_spill] sm:$0xff] }
 0x27e   : > { %vm1510_vm0 = vmor %vm1342_vm3, %vm1482_vm8  ;;  %vm644_vm15 = vcmp.eq.s32.totalorder %v4972_v31, %v6919_v12  ;;  %vm335_vm8 = vcmp.eq.s32.totalorder %v4972_v31, %v6922_v24 }
 0x27f   : > { %v5775_v38 = vsel %vm1510_vm0, 1.0, %v6615_v54  ;;  %v6613_v58 = vand.u32 4294901760, %v5769_v49  ;;  %vm672_vm1 = vmor %vm504_vm10, %vm644_vm15  ;;  %vm979_vm10 = vcmp.eq.s32.totalorder %v4972_v31, %v937_v48 }
 0x280   : > { %6915 = vst [vmem:[#allocation5_spill] sm:$0xff] %v5775_v38  ;;  %v1634_v18 = vsel %vm6916_vm6, %v5775_v38, 0  ;;  %3875 = vmatmul.mubr.msk.f32.gmra.mxu1 %vm6917_vm11, %v5775_v38  ;;  %vm840_vm7 = vmor %vm672_vm1, %vm812_vm9  ;;  %vm1484_vm6 = vcmp.eq.s32.totalorder %v4972_v31, %v4981_v30 }
 0x281   : > { %v5784_v5 = vsub.f32 %v1634_v18, %v1634_v18  ;;  %v940_v55 = vpop.permute.xlu1 %939  ;;  %v1912_v14 = vsub.f32 %v5769_v49, %v6613_v58  ;;  %v5796_v18 = vpop.permute.xlu0 %954 }
 0x282   : > { %vm980_vm13 = vcmp.eq.s32.totalorder %v4972_v31, %v940_v55  ;;  %v6923_v55 = vld [vmem:[#allocation48_spill] sm:$0xff] }
 0x283   : > { %v1913_v29 = vand.u32 4294901760, %v1912_v14  ;;  %v6612_v4 = vand.u32 4294901760, %v5784_v5  ;;  %vm1008_vm5 = vmor %vm840_vm7, %vm980_vm13  ;;  %vm475_vm0 = vcmp.eq.s32.totalorder %v4972_v31, %v6923_v55  ;;  %vm6927_vm7 = vcmask 261120  }
 0x284   : > { %vm503_vm9 = vmor %vm335_vm8, %vm475_vm0 }
 0x285   : > { %3824 = vmatprep.mubr.f32.mxu0 %v1913_v29  ;;  %v1922_v21 = vsub.f32 %v5784_v5, %v6612_v4  ;;  %v6924_v29 = vld [vmem:[#allocation69_spill] sm:$0xff]  ;;  %v1105_v14 = vpop.permute.xlu0 %1104  ;;  %vm6929_vm0 = vmmov %vm6927_vm7 }
 0x286   : > { %v1108_v12 = vpop.permute.xlu1 %1107  ;;  %vm643_vm2 = vcmp.eq.s32.totalorder %v4972_v31, %v6924_v29  ;;  %vm1147_vm1 = vcmp.eq.s32.totalorder %v4972_v31, %v1105_v14 }
 0x287   : > { %vm1148_vm14 = vcmp.eq.s32.totalorder %v4972_v31, %v1108_v12  ;;  %v1923_v17 = vand.u32 4294901760, %v1922_v21  ;;  %v6925_v21 = vld [vmem:[#allocation102_spill] sm:$0xff]  ;;  %vm671_vm13 = vmor %vm503_vm9, %vm643_vm2 }
 0x288   : > { %vm1176_vm3 = vmor %vm1008_vm5, %vm1148_vm14  ;;  %vm811_vm12 = vcmp.eq.s32.totalorder %v4972_v31, %v6925_v21 }
 0x289   : > { %vm1344_vm11 = vmor %vm1176_vm3, %vm1316_vm4  ;;  %3825 = vmatmul.mubr.f32.gmra.mxu0 %v1923_v17 }
 0x28a   : > { %vm1512_vm15 = vmor %vm1344_vm11, %vm1484_vm6 }
 0x28b   : > { %v1273_v0 = vpop.permute.xlu1 %1272  ;;  %v5816_v12 = vsel %vm1512_vm15, 1.0, %v6615_v54  ;;  %vm839_vm5 = vmor %vm671_vm13, %vm811_vm12 }
 0x28c   : > { %6926 = vst [vmem:[#allocation86_spill] sm:$0xff] %v5816_v12  ;;  %v1640_v30 = vsel %vm6927_vm7, %v5816_v12, 0  ;;  %vm1315_vm14 = vcmp.eq.s32.totalorder %v4972_v31, %v1273_v0  ;;  %vm1007_vm4 = vmor %vm839_vm5, %vm979_vm10 }
 0x28d   : > { %vm1175_vm3 = vmor %vm1007_vm4, %vm1147_vm1  ;;  %v5823_v24 = vsub.f32 %v1640_v30, %v1640_v30 }
 0x28e   : > { %vm1343_vm6 = vmor %vm1175_vm3, %vm1315_vm14 }
 0x28f   : > { %vm6930_vm2 = vmmov %vm6929_vm0  ;;  %v6621_v29 = vand.u32 4294901760, %v5823_v24 }
 0x290   : > { %v1441_v17 = vpop.permute.xlu1 %1440  ;;  %vm6931_vm15 = vmmov %vm6929_vm0 }
 0x291   : > { %vm1483_vm11 = vcmp.eq.s32.totalorder %v4972_v31, %v1441_v17  ;;  %v1942_v30 = vsub.f32 %v5823_v24, %v6621_v29  ;;  %v6935_v29 = vld [vmem:[#allocation104_spill] sm:$0xff] }
 0x292   : > { %vm1511_vm8 = vmor %vm1343_vm6, %vm1483_vm11  ;;  %vm813_vm13 = vcmp.eq.s32.totalorder %v4972_v31, %v6935_v29  ;;  %v6936_v29 = vmov 0.0  }
 0x293   : > { %v5827_v48 = vsel %vm1511_vm8, 1.0, %v6615_v54  ;;  %v1943_v39 = vand.u32 4294901760, %v1942_v30  ;;  %v6932_v54 = vld [vmem:[#allocation31_spill] sm:$0xff]  ;;  %vm1485_vm8 = vcmp.eq.s32.totalorder %v4972_v31, %v4997_v61 }
 0x294   : > { %6928 = vst [vmem:[#allocation79_spill] sm:$0xff] %v5827_v48  ;;  %v1637_v55 = vsel %vm6929_vm0, %v5827_v48, 0  ;;  %3877 = vmatprep.mubr.msk.f32.mxu1 %vm6930_vm2, %v5827_v48  ;;  %vm337_vm12 = vcmp.eq.s32.totalorder %v4972_v31, %v6932_v54  ;;  %v6938_v30 = vld [vmem:[#allocation51_spill] sm:$0xff] }
 0x295   : > { %v5834_v14 = vsub.f32 %v1637_v55, %v1637_v55  ;;  %v943_v21 = vpop.permute.xlu1 %942  ;;  %3878 = vmatmul.mubr.msk.f32.gmra.mxu1 %vm6931_vm15, %v5816_v12  ;;  %v6933_v55 = vld [vmem:[#allocation50_spill] sm:$0xff]  ;;  %v6934_v12 = vld [vmem:[#allocation71_spill] sm:$0xff]  ;;  %vm478_vm15 = vcmp.eq.s32.totalorder %v4972_v31, %v6938_v30 }
 0x296   : > { %vm477_vm9 = vcmp.eq.s32.totalorder %v4972_v31, %v6933_v55  ;;  %vm645_vm10 = vcmp.eq.s32.totalorder %v4972_v31, %v6934_v12  ;;  %vm981_vm7 = vcmp.eq.s32.totalorder %v4972_v31, %v943_v21 }
 0x297   : > { %v6624_v0 = vand.u32 4294901760, %v5834_v14  ;;  %vm505_vm1 = vmor %vm337_vm12, %vm477_vm9  ;;  %vm6939_vm12 = vcmask 261120  }
 0x298   : > { %vm673_vm5 = vmor %vm505_vm1, %vm645_vm10  ;;  %vm814_vm1 = vcmp.eq.s32.totalorder %v4972_v31, %v6944_v34 }
 0x299   : > { %v946_v17 = vpop.permute.xlu1 %945  ;;  %v1932_v4 = vsub.f32 %v5834_v14, %v6624_v0  ;;  %vm841_vm4 = vmor %vm673_vm5, %vm813_vm13  ;;  %vm338_vm13 = vcmp.eq.s32.totalorder %v4972_v31, %v6943_v57 }
 0x29a   : > { %vm1009_vm3 = vmor %vm841_vm4, %vm981_vm7  ;;  %vm982_vm5 = vcmp.eq.s32.totalorder %v4972_v31, %v946_v17 }
 0x29b   : > { %v1933_v58 = vand.u32 4294901760, %v1932_v4  ;;  %vm6940_vm9 = vmmov %vm6939_vm12 }
 0x29c   : > { %vm506_vm7 = vmor %vm338_vm13, %vm478_vm15 }
 0x29d   : > { %3827 = vmatprep.mubr.f32.mxu0 %v1933_v58 }
 0x29e   : > { %v1111_v48 = vpop.permute.xlu1 %1110  ;;  %3828 = vmatmul.mubr.f32.gmra.mxu0 %v1943_v39 }
 0x29f   : > { %vm1149_vm14 = vcmp.eq.s32.totalorder %v4972_v31, %v1111_v48 }
 0x2a0   : > { %vm1177_vm6 = vmor %vm1009_vm3, %vm1149_vm14 }
 0x2a2   : > { %v3849_v38 = vpop.f32.mrf.mxu1 }
 0x2a3   : > { %v1279_v4 = vpop.permute.xlu1 %1278 }
 0x2a4   : > { %v2096_v54 = vpop.f32.mrf.mxu1  ;;  %vm1317_vm11 = vcmp.eq.s32.totalorder %v4972_v31, %v1279_v4  ;;  %v6941_v4 = vld [vmem:[#allocation74_spill] sm:$0xff] }
 0x2a5   : > { %vm1345_vm0 = vmor %vm1177_vm6, %vm1317_vm11  ;;  %vm646_vm10 = vcmp.eq.s32.totalorder %v4972_v31, %v6941_v4 }
 0x2a6   : > { %vm1513_vm2 = vmor %vm1345_vm0, %vm1485_vm8 }
 0x2a7   : > { %v1282_v12 = vpop.permute.xlu1 %1281  ;;  %v5859_v21 = vsel %vm1513_vm2, 1.0, %v6936_v29  ;;  %vm674_vm14 = vmor %vm506_vm7, %vm646_vm10 }
 0x2a8   : > { %6937 = vst [vmem:[#allocation80_spill] sm:$0xff] %v5859_v21  ;;  %v1643_v55 = vsel %vm6939_vm12, %v5859_v21, 0  ;;  %3880 = vmatprep.mubr.msk.f32.mxu1 %vm6940_vm9, %v5859_v21  ;;  %vm842_vm4 = vmor %vm674_vm14, %vm814_vm1  ;;  %vm1318_vm11 = vcmp.eq.s32.totalorder %v4972_v31, %v1282_v12 }
 0x2a9   : > { %v5871_v0 = vsub.f32 %v1643_v55, %v1643_v55  ;;  %vm1010_vm6 = vmor %vm842_vm4, %vm982_vm5 }
 0x2aa   : > { %v3799_v48 = vpop.f32.mrf.mxu0  ;;  %vm6950_vm12 = vmmov %vm6940_vm9 }
 0x2ab   : > { %v3852_v58 = vpop.f32.mrf.mxu1  ;;  %v5869_v61 = vadd.f32 %v3849_v38, %v3799_v48  ;;  %v6635_v21 = vand.u32 4294901760, %v5871_v0  ;;  %v1114_v48 = vpop.permute.xlu0 %1113 }
 0x2ac   : > { %v1735_v30 = vpop.f32.mrf.mxu0  ;;  %v949_v38 = vpop.permute.xlu1 %948  ;;  %vm1150_vm3 = vcmp.eq.s32.totalorder %v4972_v31, %v1114_v48 }
 0x2ad   : > { %v2108_v39 = vpop.f32.mrf.mxu1  ;;  %6942 = vst [vmem:[#allocation14_spill] sm:$0xff] %v5869_v61  ;;  %v5878_v10 = vadd.f32 %v2096_v54, %v1735_v30  ;;  %v1952_v57 = vsub.f32 %v5871_v0, %v6635_v21  ;;  %vm1178_vm8 = vmor %vm1010_vm6, %vm1150_vm3  ;;  %vm983_vm6 = vcmp.eq.s32.totalorder %v4972_v31, %v949_v38 }
 0x2ae   : > { %vm1346_vm0 = vmor %vm1178_vm8, %vm1318_vm11 }
 0x2af   : > { %6945 = vst [vmem:[#allocation7_spill] sm:$0xff] %v5878_v10  ;;  %v1953_v4 = vand.u32 4294901760, %v1952_v57 }
 0x2b0   : > { %v3855_v37 = vpop.f32.mrf.mxu1 }
 0x2b1   : > { %v1450_v10 = vpop.permute.xlu1 %1449  ;;  %3830 = vmatprep.mubr.f32.mxu0 %v1953_v4 }
 0x2b2   : > { %v3802_v55 = vpop.f32.mrf.mxu0  ;;  %v2120_v17 = vpop.f32.mrf.mxu1  ;;  %vm1486_vm2 = vcmp.eq.s32.totalorder %v4972_v31, %v1450_v10 }
 0x2b3   : > { %v5885_v34 = vadd.f32 %v3852_v58, %v3802_v55  ;;  %vm1514_vm15 = vmor %vm1346_vm0, %vm1486_vm2 }
 0x2b4   : > { %v1755_v54 = vpop.f32.mrf.mxu0  ;;  %v5894_v55 = vsel %vm1514_vm15, 1.0, %v6936_v29 }
 0x2b5   : > { %6946 = vst [vmem:[#allocation82_spill] sm:$0xff] %v5885_v34  ;;  %v5888_v30 = vadd.f32 %v2108_v39, %v1755_v54  ;;  %v3858_v48 = vpop.f32.mrf.mxu1  ;;  %v1646_v39 = vsel %vm6950_vm12, %v5894_v55, 0  ;;  %3881 = vmatmul.mubr.msk.f32.gmra.mxu1 %vm6940_vm9, %v5894_v55 }
 0x2b6   : > { %v3805_v61 = vpop.f32.mrf.mxu0  ;;  %v5902_v54 = vsub.f32 %v1646_v39, %v1646_v39 }
 0x2b7   : > { %6947 = vst [vmem:[#allocation85_spill] sm:$0xff] %v5888_v30  ;;  %v5891_v21 = vadd.f32 %v3855_v37, %v3805_v61  ;;  %v1117_v37 = vpop.permute.xlu1 %1116  ;;  %v2132_v61 = vpop.f32.mrf.mxu1 }
 0x2b8   : > { %v1775_v58 = vpop.f32.mrf.mxu0  ;;  %v6636_v30 = vand.u32 4294901760, %v5902_v54  ;;  %vm1151_vm8 = vcmp.eq.s32.totalorder %v4972_v31, %v1117_v37 }
 0x2b9   : > { %6948 = vst [vmem:[#allocation17_spill] sm:$0xff] %v5891_v21  ;;  %v5896_v12 = vadd.f32 %v2120_v17, %v1775_v58  ;;  %v6953_v17 = vld [vmem:[#allocation33_spill] sm:$0xff]  ;;  %v6954_v58 = vld [vmem:[#allocation52_spill] sm:$0xff] }
 0x2ba   : > { %v3808_v57 = vpop.f32.mrf.mxu0  ;;  %vm339_vm10 = vcmp.eq.s32.totalorder %v4972_v31, %v6953_v17  ;;  %vm479_vm13 = vcmp.eq.s32.totalorder %v4972_v31, %v6954_v58  ;;  %v1962_v39 = vsub.f32 %v5902_v54, %v6636_v30  ;;  %v6958_v17 = vld [vmem:[#allocation106_spill] sm:$0xff]  ;;  %v6967_v30 = vld [vmem:[#allocation35_spill] sm:$0xff] }
 0x2bb   : > { %6949 = vst [vmem:[#allocation36_spill] sm:$0xff] %v5896_v12  ;;  %v5904_v10 = vadd.f32 %v3858_v48, %v3808_v57  ;;  %v1120_v12 = vpop.permute.xlu1 %1119  ;;  %v6955_v48 = vld [vmem:[#allocation53_spill] sm:$0xff]  ;;  %vm507_vm14 = vmor %vm339_vm10, %vm479_vm13  ;;  %vm815_vm4 = vcmp.eq.s32.totalorder %v4972_v31, %v6958_v17 }
 0x2bc   : > { %v1795_v4 = vpop.f32.mrf.mxu0  ;;  %vm480_vm1 = vcmp.eq.s32.totalorder %v4972_v31, %v6955_v48  ;;  %v6956_v57 = vld [vmem:[#allocation73_spill] sm:$0xff]  ;;  %v6959_v48 = vld [vmem:[#allocation76_spill] sm:$0xff] }
 0x2bd   : > { %6951 = vst [vmem:[#allocation37_spill] sm:$0xff] %v5904_v10  ;;  %v5906_v21 = vadd.f32 %v2132_v61, %v1795_v4  ;;  %vm647_vm7 = vcmp.eq.s32.totalorder %v4972_v31, %v6956_v57  ;;  %v1963_v61 = vand.u32 4294901760, %v1962_v39  ;;  %v6957_v4 = vld [vmem:[#allocation32_spill] sm:$0xff]  ;;  %vm648_vm0 = vcmp.eq.s32.totalorder %v4972_v31, %v6959_v48  ;;  %v6960_v39 = vld [vmem:[#allocation103_spill] sm:$0xff]  ;;  %v6973_v10 = vld [vmem:[#allocation105_spill] sm:$0xff] }
 0x2be   : > { %vm340_vm5 = vcmp.eq.s32.totalorder %v4972_v31, %v6957_v4  ;;  %vm675_vm11 = vmor %vm507_vm14, %vm647_vm7  ;;  %vm816_vm15 = vcmp.eq.s32.totalorder %v4972_v31, %v6960_v39  ;;  %vm984_vm7 = vcmp.eq.s32.totalorder %v4972_v31, %v5772_v50 }
 0x2bf   : > { %6952 = vst [vmem:[#allocation16_spill] sm:$0xff] %v5906_v21  ;;  %vm508_vm3 = vmor %vm340_vm5, %vm480_vm1  ;;  %3831 = vmatmul.mubr.f32.gmra.mxu0 %v1963_v61  ;;  %v1288_v58 = vpop.permute.xlu1 %1287  ;;  %vm1319_vm1 = vcmp.eq.s32.totalorder %v4972_v31, %v5187_v35  ;;  %vm1152_vm5 = vcmp.eq.s32.totalorder %v4972_v31, %v1120_v12  ;;  %v6970_v21 = vld [vmem:[#allocation75_spill] sm:$0xff] }
 0x2c0   : > { %vm843_vm2 = vmor %vm675_vm11, %vm815_vm4  ;;  %vm1320_vm11 = vcmp.eq.s32.totalorder %v4972_v31, %v1288_v58 }
 0x2c1   : > { %vm1011_vm12 = vmor %vm843_vm2, %vm983_vm6 }
 0x2c2   : > { %vm1179_vm9 = vmor %vm1011_vm12, %vm1151_vm8  ;;  %vm6962_vm8 = vcmask 261120  }
 0x2c3   : > { %vm676_vm10 = vmor %vm508_vm3, %vm648_vm0 }
 0x2c4   : > { %v3861_v57 = vpop.f32.mrf.mxu1  ;;  %vm844_vm13 = vmor %vm676_vm10, %vm816_vm15  ;;  %v1453_v38 = vpop.permute.xlu1 %1452 }
 0x2c5   : > { %vm1347_vm14 = vmor %vm1179_vm9, %vm1319_vm1  ;;  %vm1487_vm4 = vcmp.eq.s32.totalorder %v4972_v31, %v1453_v38  ;;  %vm341_vm1 = vcmp.eq.s32.totalorder %v4972_v31, %v6967_v30  ;;  %v6972_v30 = vld [vmem:[#allocation77_spill] sm:$0xff] }
 0x2c6   : > { %vm1515_vm2 = vmor %vm1347_vm14, %vm1487_vm4  ;;  %v2144_v61 = vpop.f32.mrf.mxu1  ;;  %vm649_vm14 = vcmp.eq.s32.totalorder %v4972_v31, %v6970_v21 }
 0x2c7   : > { %vm1012_vm6 = vmor %vm844_vm13, %vm984_vm7  ;;  %v5938_v4 = vsel %vm1515_vm2, 1.0, %v6936_v29  ;;  %vm650_vm2 = vcmp.eq.s32.totalorder %v4972_v31, %v6972_v30 }
 0x2c8   : > { %vm1180_vm3 = vmor %vm1012_vm6, %vm1152_vm5  ;;  %v1649_v35 = vsel %vm6962_vm8, %v5938_v4, 0  ;;  %v1456_v50 = vpop.permute.xlu1 %1455 }
 0x2c9   : > { %vm6963_vm0 = vmmov %vm6962_vm8  ;;  %v5946_v58 = vsub.f32 %v1649_v35, %v1649_v35  ;;  %vm1488_vm12 = vcmp.eq.s32.totalorder %v4972_v31, %v1456_v50 }
 0x2ca   : > { %3883 = vmatprep.mubr.msk.f32.mxu1 %vm6963_vm0, %v5938_v4  ;;  %vm1348_vm15 = vmor %vm1180_vm3, %vm1320_vm11  ;;  %vm818_vm3 = vcmp.eq.s32.totalorder %v4972_v31, %v6973_v10 }
 0x2cb   : > { %vm1516_vm9 = vmor %vm1348_vm15, %vm1488_vm12  ;;  %vm985_vm12 = vcmp.eq.s32.totalorder %v4972_v31, %v5796_v18 }
 0x2cc   : > { %v3811_v37 = vpop.f32.mrf.mxu0  ;;  %v5952_v39 = vsel %vm1516_vm9, 1.0, %v6936_v29  ;;  %vm6965_vm10 = vmmov %vm6963_vm0 }
 0x2cd   : > { %v5940_v17 = vadd.f32 %v3861_v57, %v3811_v37  ;;  %v6637_v57 = vand.u32 4294901760, %v5946_v58  ;;  %v1652_v38 = vsel %vm6965_vm10, %v5952_v39, 0  ;;  %vm6966_vm13 = vmmov %vm6963_vm0  ;;  %v958_v35 = vpop.permute.xlu1 %957 }
 0x2ce   : > { %v1815_v12 = vpop.f32.mrf.mxu0  ;;  %3884 = vmatmul.mubr.msk.f32.gmra.mxu1 %vm6966_vm13, %v5952_v39  ;;  %v5959_v37 = vsub.f32 %v1652_v38, %v1652_v38 }
 0x2cf   : > { %6961 = vst [vmem:[#allocation60_spill] sm:$0xff] %v5940_v17  ;;  %v5949_v48 = vadd.f32 %v2144_v61, %v1815_v12  ;;  %v1972_v61 = vsub.f32 %v5946_v58, %v6637_v57  ;;  %v6969_v17 = vld [vmem:[#allocation55_spill] sm:$0xff]  ;;  %v6971_v57 = vld [vmem:[#allocation34_spill] sm:$0xff] }
 0x2d0   : > { %v6638_v12 = vand.u32 4294901760, %v5959_v37  ;;  %vm482_vm5 = vcmp.eq.s32.totalorder %v4972_v31, %v6969_v17  ;;  %vm342_vm4 = vcmp.eq.s32.totalorder %v4972_v31, %v6971_v57  ;;  %v1123_v17 = vpop.permute.xlu0 %1122 }
 0x2d1   : > { %6964 = vst [vmem:[#allocation81_spill] sm:$0xff] %v5949_v48  ;;  %v1973_v50 = vand.u32 4294901760, %v1972_v61  ;;  %v6968_v48 = vld [vmem:[#allocation54_spill] sm:$0xff]  ;;  %vm510_vm6 = vmor %vm342_vm4, %vm482_vm5  ;;  %vm1153_vm10 = vcmp.eq.s32.totalorder %v4972_v31, %v1123_v17 }
 0x2d2   : > { %vm481_vm7 = vcmp.eq.s32.totalorder %v4972_v31, %v6968_v48  ;;  %v1982_v38 = vsub.f32 %v5959_v37, %v6638_v12  ;;  %v1126_v61 = vpop.permute.xlu1 %1125  ;;  %vm678_vm15 = vmor %vm510_vm6, %vm650_vm2 }
 0x2d3   : > { %3833 = vmatprep.mubr.f32.mxu0 %v1973_v50  ;;  %vm509_vm11 = vmor %vm341_vm1, %vm481_vm7  ;;  %v6974_v50 = vld [vmem:[#allocation107_spill] sm:$0xff]  ;;  %vm986_vm1 = vcmp.eq.s32.totalorder %v4972_v31, %v958_v35  ;;  %vm1154_vm5 = vcmp.eq.s32.totalorder %v4972_v31, %v1126_v61 }
 0x2d4   : > { %v1983_v48 = vand.u32 4294901760, %v1982_v38  ;;  %vm677_vm8 = vmor %vm509_vm11, %vm649_vm14  ;;  %vm817_vm0 = vcmp.eq.s32.totalorder %v4972_v31, %v6974_v50  ;;  %v1294_v10 = vpop.permute.xlu0 %1293 }
 0x2d5   : > { %vm846_vm9 = vmor %vm678_vm15, %vm818_vm3  ;;  %vm1322_vm15 = vcmp.eq.s32.totalorder %v4972_v31, %v1294_v10  ;;  %v6980_v10 = vand.u32 4294901760, %v5032_v8 }
 0x2d6   : > { %3834 = vmatmul.mubr.f32.gmra.mxu0 %v1983_v48  ;;  %vm845_vm13 = vmor %vm677_vm8, %vm817_vm0  ;;  %vm6976_vm8 = vcmask 261120  }
 0x2d7   : > { %v1291_v21 = vpop.permute.xlu1 %1290  ;;  %vm1013_vm7 = vmor %vm845_vm13, %vm985_vm12 }
 0x2d8   : > { %vm1181_vm4 = vmor %vm1013_vm7, %vm1153_vm10  ;;  %vm1321_vm14 = vcmp.eq.s32.totalorder %v4972_v31, %v1291_v21 }
 0x2d9   : > { %vm1014_vm11 = vmor %vm846_vm9, %vm986_vm1 }
 0x2da   : > { %vm1182_vm2 = vmor %vm1014_vm11, %vm1154_vm5 }
 0x2db   : > { %vm1349_vm6 = vmor %vm1181_vm4, %vm1321_vm14 }
 0x2dc   : > { %v1459_v57 = vpop.permute.xlu1 %1458  ;;  %vm6977_vm12 = vmmov %vm6976_vm8 }
 0x2dd   : > { %vm1489_vm3 = vcmp.eq.s32.totalorder %v4972_v31, %v1459_v57  ;;  %vm1350_vm9 = vmor %vm1182_vm2, %vm1322_vm15  ;;  %v3864_v17 = vpop.f32.mrf.mxu1 }
 0x2de   : > { %vm1517_vm0 = vmor %vm1349_vm6, %vm1489_vm3 }
 0x2df   : > { %v5993_v18 = vsel %vm1517_vm0, 1.0, %v6936_v29  ;;  %vm6978_vm1 = vmmov %vm6976_vm8  ;;  %v2156_v12 = vpop.f32.mrf.mxu1 }
 0x2e0   : > { %6975 = vst [vmem:[#allocation84_spill] sm:$0xff] %v5993_v18  ;;  %v1655_v35 = vsel %vm6976_vm8, %v5993_v18, 0  ;;  %v1462_v38 = vpop.permute.xlu1 %1461  ;;  %3886 = vmatprep.mubr.msk.f32.mxu1 %vm6977_vm12, %v5993_v18  ;;  %vm6979_vm7 = vmmov %vm6978_vm1  ;;  %v6981_v18 = vand.u32 4294901760, %v5282_v23 }
 0x2e1   : > { %v5999_v61 = vsub.f32 %v1655_v35, %v1655_v35  ;;  %vm1490_vm10 = vcmp.eq.s32.totalorder %v4972_v31, %v1462_v38  ;;  %vm7010_vm5 = vmmov %vm6978_vm1 }
 0x2e2   : > { %vm1518_vm13 = vmor %vm1350_vm9, %vm1490_vm10 }
 0x2e3   : > { %v6003_v30 = vsel %vm1518_vm13, 1.0, %v6936_v29  ;;  %v6641_v48 = vand.u32 4294901760, %v5999_v61  ;;  %vm7011_vm4 = vmmov %vm6978_vm1 }
 0x2e4   : > { %v1658_v50 = vsel %vm6978_vm1, %v6003_v30, 0  ;;  %3887 = vmatmul.mubr.msk.f32.gmra.mxu1 %vm6979_vm7, %v6003_v30  ;;  %vm7012_vm14 = vmmov %vm6978_vm1 }
 0x2e5   : > { %v6010_v21 = vsub.f32 %v1658_v50, %v1658_v50  ;;  %3947 = vmatprep.mubr.f32.mxu1 %v6980_v10  ;;  %v1992_v31 = vsub.f32 %v5999_v61, %v6641_v48  ;;  %v6982_v10 = vand.u32 4294901760, %v5315_v43  ;;  %vm7013_vm11 = vmmov %vm6978_vm1 }
 0x2e6   : > { %v3814_v29 = vpop.f32.mrf.mxu0  ;;  %vm7014_vm2 = vmmov %vm6978_vm1 }
 0x2e7   : > { %v6017_v57 = vadd.f32 %v3864_v17, %v3814_v29  ;;  %v1993_v35 = vand.u32 4294901760, %v1992_v31  ;;  %v2001_v38 = vand.u32 4294901760, %v6010_v21  ;;  %v6983_v31 = vand.u32 4294901760, %v5267_v62  ;;  %vm7015_vm6 = vmmov %vm6978_vm1 }
 0x2e8   : > { %v1835_v34 = vpop.f32.mrf.mxu0  ;;  %3948 = vmatmul.mubr.f32.vlgmr.msra.gmra.mxu1 %v6981_v18  ;;  %v6987_v18 = vld [vmem:[#allocation88_spill] sm:$0xff]  ;;  %v6995_v29 = vand.u32 4294901760, %v5582_v51  ;;  %vm7016_vm3 = vmmov %vm6978_vm1 }
 0x2e9   : > { %v6022_v50 = vadd.f32 %v2156_v12, %v1835_v34  ;;  %3836 = vmatprep.mubr.f32.mxu0 %v1993_v35  ;;  %3950 = vmatprep.mubr.f32.mxu1 %v6982_v10  ;;  %v2002_v48 = vsub.f32 %v6010_v21, %v2001_v38  ;;  %v6984_v34 = vand.u32 4294901760, %v5269_v53  ;;  %v6985_v12 = vand.u32 4294901760, %v5308_v20  ;;  %vm7017_vm15 = vmmov %vm6978_vm1 }
 0x2ea   : > { %4040 = vmatpush3.msra.mxu1 %v4781_v40  ;;  %v6986_v40 = vand.u32 4294901760, %v5328_v11  ;;  %vm7018_vm0 = vmmov %vm6978_vm1 }
 0x2eb   : > { %v2003_v17 = vand.u32 4294901760, %v2002_v48  ;;  %4041 = vmatprep.subr.mxu1 %v6808_v7  ;;  %vm7019_vm8 = vmmov %vm7018_vm0 }
 0x2ec   : > { %3951 = vmatmul.mubr.f32.gmra.mxu1 %v6983_v31  ;;  %v7000_v31 = vand.u32 4294901760, %v5732_v1  ;;  %vm7020_vm12 = vmmov %vm7018_vm0 }
 0x2ed   : > { %3837 = vmatmul.mubr.f32.gmra.mxu0 %v2003_v17  ;;  %3953 = vmatprep.mubr.f32.mxu1 %v6984_v34  ;;  %v6996_v17 = vand.u32 4294901760, %v5600_v42  ;;  %v7004_v34 = vand.u32 4294901760, %v5823_v24  ;;  %vm7021_vm9 = vmmov %vm7018_vm0 }
 0x2ee   : > { %3897 = vmatprep.mubr.f32.mxu0 %v5032_v8  ;;  %4042 = vmatpush3.msra.mxu1 %v6808_v7  ;;  %v6988_v8 = vand.u32 4294901760, %v5361_v36  ;;  %v6990_v7 = vld [vmem:[#allocation89_spill] sm:$0xff]  ;;  %vm7022_vm10 = vmmov %vm7018_vm0 }
 0x2ef   : > { %4043 = vmatprep.subr.mxu1 %v6811_v19  ;;  %vm7023_vm13 = vmmov %vm7018_vm0 }
 0x2f0   : > { %3954 = vmatmul.mubr.f32.gmra.mxu1 %v6985_v12  ;;  %vm7024_vm1 = vmmov %vm7018_vm0 }
 0x2f1   : > { %3898 = vmatmul.mubr.f32.vlgmr.msra.gmra.mxu0 %v5282_v23  ;;  %3956 = vmatprep.mubr.f32.mxu1 %v6986_v40  ;;  %v6989_v23 = vand.u32 4294901760, %v5459_v6  ;;  %vm7025_vm7 = vmmov %vm7018_vm0 }
 0x2f2   : > { %3990 = vmatpush3.msra.mxu0 %v6830_v46  ;;  %3900 = vmatprep.mubr.f32.mxu0 %v5315_v43  ;;  %v6992_v43 = vld [vmem:[#allocation91_spill] sm:$0xff]  ;;  %v6994_v46 = vand.u32 4294901760, %v5532_v9 }
 0x2f3   : > { %3991 = vmatprep.subr.mxu0 %v6987_v18  ;;  %4044 = vmatpush3.msra.mxu1 %v6811_v19  ;;  %v6991_v19 = vand.u32 4294901760, %v5444_v63 }
 0x2f4   : > { %3957 = vmatmul.mubr.f32.gmra.mxu1 %v6988_v8  ;;  %3992 = vmatpush3.msra.mxu0 %v6987_v18  ;;  %v7006_v18 = vand.u32 4294901760, %v5902_v54  ;;  %v7007_v8 = vand.u32 4294901760, %v5946_v58 }
 0x2f5   : > { %3901 = vmatmul.mubr.f32.gmra.mxu0 %v5267_v62  ;;  %3959 = vmatprep.mubr.f32.mxu1 %v6989_v23  ;;  %v6993_v62 = vand.u32 4294901760, %v5510_v52 }
 0x2f6   : > { %3903 = vmatprep.mubr.f32.mxu0 %v5269_v53  ;;  %3993 = vmatprep.subr.mxu0 %v6990_v7  ;;  %v3867_v53 = vpop.f32.mrf.mxu1 }
 0x2f7   : > { %3994 = vmatpush3.msra.mxu0 %v6990_v7  ;;  %4045 = vmatprep.subr.mxu1 %v4829_v33 }
 0x2f8   : > { %3960 = vmatmul.mubr.f32.gmra.mxu1 %v6991_v19  ;;  %3995 = vmatprep.subr.mxu0 %v6992_v43  ;;  %v2168_v35 = vpop.f32.mrf.mxu1 }
 0x2f9   : > { %3904 = vmatmul.mubr.f32.gmra.mxu0 %v5308_v20  ;;  %3962 = vmatprep.mubr.f32.mxu1 %v6993_v62 }
 0x2fa   : > { %3906 = vmatprep.mubr.f32.mxu0 %v5328_v11  ;;  %3996 = vmatpush3.msra.mxu0 %v6992_v43 }
 0x2fb   : > { %4046 = vmatpush3.msra.mxu1 %v4829_v33  ;;  %v6997_v33 = vand.u32 4294901760, %v5661_v45 }
 0x2fc   : > { %3963 = vmatmul.mubr.f32.gmra.mxu1 %v6994_v46 }
 0x2fd   : > { %v3817_v48 = vpop.f32.mrf.mxu0  ;;  %3907 = vmatmul.mubr.f32.gmra.mxu0 %v5361_v36  ;;  %3965 = vmatprep.mubr.f32.mxu1 %v6995_v29  ;;  %v6998_v36 = vand.u32 4294901760, %v5646_v60 }
 0x2fe   : > { %v6071_v20 = vadd.f32 %v3867_v53, %v3817_v48  ;;  %3909 = vmatprep.mubr.f32.mxu0 %v5459_v6  ;;  %v6999_v6 = vand.u32 4294901760, %v5712_v15 }
 0x2ff   : > { %v1855_v11 = vpop.f32.mrf.mxu0 }
 0x300   : > { %v6074_v10 = vadd.f32 %v2168_v35, %v1855_v11  ;;  %3966 = vmatmul.mubr.f32.gmra.mxu1 %v6996_v17 }
 0x301   : > { %3910 = vmatmul.mubr.f32.gmra.mxu0 %v5444_v63  ;;  %3968 = vmatprep.mubr.f32.mxu1 %v6997_v33  ;;  %v7001_v63 = vand.u32 4294901760, %v5769_v49 }
 0x302   : > { %3912 = vmatprep.mubr.f32.mxu0 %v5510_v52  ;;  %v7002_v52 = vand.u32 4294901760, %v5784_v5 }
 0x304   : > { %3969 = vmatmul.mubr.f32.gmra.mxu1 %v6998_v36 }
 0x305   : > { %3913 = vmatmul.mubr.f32.gmra.mxu0 %v5532_v9  ;;  %3971 = vmatprep.mubr.f32.mxu1 %v6999_v6  ;;  %v7003_v9 = vand.u32 4294901760, %v5834_v14 }
 0x306   : > { %3915 = vmatprep.mubr.f32.mxu0 %v5582_v51 }
 0x308   : > { %3972 = vmatmul.mubr.f32.gmra.mxu1 %v7000_v31 }
 0x309   : > { %3916 = vmatmul.mubr.f32.gmra.mxu0 %v5600_v42  ;;  %3974 = vmatprep.mubr.f32.mxu1 %v7001_v63  ;;  %v3870_v51 = vpop.f32.mrf.mxu1  ;;  %v7005_v42 = vand.u32 4294901760, %v5871_v0 }
 0x30a   : > { %3918 = vmatprep.mubr.f32.mxu0 %v5661_v45 }
 0x30c   : > { %3975 = vmatmul.mubr.f32.gmra.mxu1 %v7002_v52 }
 0x30d   : > { %3919 = vmatmul.mubr.f32.gmra.mxu0 %v5646_v60  ;;  %3977 = vmatprep.mubr.f32.mxu1 %v7003_v9  ;;  %v2180_v60 = vpop.f32.mrf.mxu1 }
 0x30e   : > { %3921 = vmatprep.mubr.f32.mxu0 %v5712_v15 }
 0x310   : > { %3978 = vmatmul.mubr.f32.gmra.mxu1 %v7004_v34 }
 0x311   : > { %3922 = vmatmul.mubr.f32.gmra.mxu0 %v5732_v1  ;;  %3980 = vmatprep.mubr.f32.mxu1 %v7005_v42  ;;  %v7008_v1 = vand.u32 4294901760, %v5959_v37 }
 0x312   : > { %v3820_v45 = vpop.f32.mrf.mxu0  ;;  %3924 = vmatprep.mubr.f32.mxu0 %v5769_v49  ;;  %v7009_v49 = vand.u32 4294901760, %v5999_v61 }
 0x313   : > { %v6106_v12 = vadd.f32 %v3870_v51, %v3820_v45 }
 0x314   : > { %v1875_v40 = vpop.f32.mrf.mxu0  ;;  %3981 = vmatmul.mubr.f32.gmra.mxu1 %v7006_v18 }
 0x315   : > { %v6110_v15 = vadd.f32 %v2180_v60, %v1875_v40  ;;  %3925 = vmatmul.mubr.f32.gmra.mxu0 %v5784_v5  ;;  %3983 = vmatprep.mubr.f32.mxu1 %v7007_v8 }
 0x316   : > { %3927 = vmatprep.mubr.f32.mxu0 %v5834_v14 }
 0x318   : > { %3984 = vmatmul.mubr.f32.gmra.mxu1 %v7008_v1 }
 0x319   : > { %3928 = vmatmul.mubr.f32.gmra.mxu0 %v5823_v24  ;;  %3986 = vmatprep.mubr.f32.mxu1 %v7009_v49 }
 0x31a   : > { %3930 = vmatprep.mubr.f32.mxu0 %v5871_v0 }
 0x31c   : > { %3987 = vmatmul.mubr.f32.gmra.mxu1 %v2001_v38 }
 0x31d   : > { %3931 = vmatmul.mubr.f32.gmra.mxu0 %v5902_v54  ;;  %4047 = vmatprep.mubr.msk.f32.mxu1 %vm7010_vm5, %v5018_v44  ;;  %vm7026_vm5 = vmmov %vm7018_vm0 }
 0x31e   : > { %3933 = vmatprep.mubr.f32.mxu0 %v5946_v58  ;;  %v7066_v58 = vld [vmem:[#allocation84_spill] sm:$0xff] }
 0x320   : > { %4048 = vmatmul.mubr.msk.f32.vlgmr.msra.gmra.mxu1 %vm7011_vm4, %v5265_v16  ;;  %vm7027_vm4 = vmmov %vm7018_vm0 }
 0x321   : > { %3934 = vmatmul.mubr.f32.gmra.mxu0 %v5959_v37  ;;  %4050 = vmatprep.mubr.msk.f32.mxu1 %vm7012_vm14, %v5294_v28  ;;  %vm7028_vm14 = vmmov %vm7018_vm0 }
 0x322   : > { %3936 = vmatprep.mubr.f32.mxu0 %v5999_v61 }
 0x324   : > { %4051 = vmatmul.mubr.msk.f32.gmra.mxu1 %vm7013_vm11, %v5221_v56  ;;  %vm7029_vm11 = vmmov %vm7018_vm0 }
 0x325   : > { %3937 = vmatmul.mubr.f32.gmra.mxu0 %v6010_v21  ;;  %4053 = vmatprep.mubr.msk.f32.mxu1 %vm7014_vm2, %v5226_v26  ;;  %vm7030_vm2 = vmmov %vm7018_vm0 }
 0x326   : > { %3997 = vmatprep.mubr.msk.f32.mxu0 %vm7015_vm6, %v5018_v44  ;;  %vm7031_vm6 = vmmov %vm7018_vm0 }
 0x328   : > { %4054 = vmatmul.mubr.msk.f32.gmra.mxu1 %vm7016_vm3, %v5259_v22  ;;  %vm7032_vm3 = vmmov %vm7018_vm0 }
 0x329   : > { %3998 = vmatmul.mubr.msk.f32.vlgmr.msra.gmra.mxu0 %vm7017_vm15, %v5265_v16  ;;  %4056 = vmatprep.mubr.msk.f32.mxu1 %vm7018_vm0, %v5311_v2  ;;  %v3873_v44 = vpop.f32.mrf.mxu1  ;;  %vm7033_vm15 = vmmov %vm7018_vm0 }
 0x32a   : > { %4000 = vmatprep.mubr.msk.f32.mxu0 %vm7019_vm8, %v5294_v28  ;;  %vm7034_vm8 = vmmov %vm7018_vm0 }
 0x32b   : > { %v2192_v28 = vpop.f32.mrf.mxu1 }
 0x32c   : > { %4057 = vmatmul.mubr.msk.f32.gmra.mxu1 %vm7020_vm12, %v5338_v3  ;;  %vm7036_vm12 = vmmov %vm7018_vm0 }
 0x32d   : > { %4001 = vmatmul.mubr.msk.f32.gmra.mxu0 %vm7021_vm9, %v5221_v56  ;;  %4059 = vmatprep.mubr.msk.f32.mxu1 %vm7022_vm10, %v5449_v13  ;;  %vm7037_vm9 = vmmov %vm7018_vm0 }
 0x32e   : > { %4003 = vmatprep.mubr.msk.f32.mxu0 %vm7023_vm13, %v5226_v26  ;;  %vm7039_vm10 = vmmov %vm7018_vm0 }
 0x32f   : > { %vm7040_vm13 = vmmov %vm7018_vm0 }
 0x330   : > { %4060 = vmatmul.mubr.msk.f32.gmra.mxu1 %vm7024_vm1, %v5434_v59  ;;  %vm7042_vm1 = vmmov %vm7018_vm0 }
 0x331   : > { %4004 = vmatmul.mubr.msk.f32.gmra.mxu0 %vm7025_vm7, %v5259_v22  ;;  %4062 = vmatprep.mubr.msk.f32.mxu1 %vm7026_vm5, %v5504_v32  ;;  %v7035_v22 = vld [vmem:[#allocation56_spill] sm:$0xff]  ;;  %vm7043_vm7 = vmmov %vm7018_vm0 }
 0x332   : > { %v3823_v16 = vpop.f32.mrf.mxu0  ;;  %4006 = vmatprep.mubr.msk.f32.mxu0 %vm7027_vm4, %v5311_v2  ;;  %v7038_v2 = vld [vmem:[#allocation6_spill] sm:$0xff]  ;;  %vm7045_vm5 = vmmov %vm7018_vm0 }
 0x333   : > { %v6165_v56 = vadd.f32 %v3873_v44, %v3823_v16  ;;  %vm7046_vm4 = vmmov %vm7018_vm0 }
 0x334   : > { %v1895_v5 = vpop.f32.mrf.mxu0  ;;  %4063 = vmatmul.mubr.msk.f32.gmra.mxu1 %vm7028_vm14, %v5526_v25  ;;  %vm7048_vm14 = vmmov %vm7018_vm0 }
 0x335   : > { %v6169_v26 = vadd.f32 %v2192_v28, %v1895_v5  ;;  %4007 = vmatmul.mubr.msk.f32.gmra.mxu0 %vm7029_vm11, %v5338_v3  ;;  %4065 = vmatprep.mubr.msk.f32.mxu1 %vm7030_vm2, %v5575_v47  ;;  %v7041_v3 = vld [vmem:[#allocation58_spill] sm:$0xff]  ;;  %vm7049_vm11 = vmmov %vm7018_vm0 }
 0x336   : > { %4009 = vmatprep.mubr.msk.f32.mxu0 %vm7031_vm6, %v5449_v13  ;;  %v7047_v13 = vld [vmem:[#allocation5_spill] sm:$0xff]  ;;  %vm7051_vm2 = vmmov %vm7018_vm0 }
 0x337   : > { %vm7052_vm6 = vmmov %vm7018_vm0 }
 0x338   : > { %4066 = vmatmul.mubr.msk.f32.gmra.mxu1 %vm7032_vm3, %v5587_v41  ;;  %vm7054_vm3 = vmmov %vm7018_vm0 }
 0x339   : > { %4010 = vmatmul.mubr.msk.f32.gmra.mxu0 %vm7033_vm15, %v5434_v59  ;;  %4068 = vmatprep.mubr.msk.f32.mxu1 %vm7018_vm0, %v5651_v27  ;;  %v7044_v59 = vld [vmem:[#allocation78_spill] sm:$0xff]  ;;  %vm7055_vm15 = vmmov %vm7018_vm0 }
 0x33a   : > { %4012 = vmatprep.mubr.msk.f32.mxu0 %vm7034_vm8, %v5504_v32  ;;  %v7050_v32 = vld [vmem:[#allocation79_spill] sm:$0xff]  ;;  %vm7058_vm8 = vmmov %vm7018_vm0 }
 0x33c   : > { %4069 = vmatmul.mubr.msk.f32.gmra.mxu1 %vm7036_vm12, %v7035_v22  ;;  %vm7060_vm12 = vmmov %vm7018_vm0 }
 0x33d   : > { %4013 = vmatmul.mubr.msk.f32.gmra.mxu0 %vm7037_vm9, %v5526_v25  ;;  %4071 = vmatprep.mubr.msk.f32.mxu1 %vm7039_vm10, %v7038_v2  ;;  %vm7061_vm9 = vmmov %vm7018_vm0 }
 0x33e   : > { %4015 = vmatprep.mubr.msk.f32.mxu0 %vm7040_vm13, %v5575_v47  ;;  %v7053_v47 = vld [vmem:[#allocation86_spill] sm:$0xff]  ;;  %vm7062_vm10 = vmmov %vm7018_vm0 }
 0x33f   : > { %vm7063_vm13 = vmmov %vm7018_vm0 }
 0x340   : > { %4072 = vmatmul.mubr.msk.f32.gmra.mxu1 %vm7042_vm1, %v7041_v3  ;;  %v3876_v25 = vpop.f32.mrf.mxu1  ;;  %vm7064_vm1 = vmmov %vm7018_vm0 }
 0x341   : > { %4016 = vmatmul.mubr.msk.f32.gmra.mxu0 %vm7043_vm7, %v5587_v41  ;;  %4074 = vmatprep.mubr.msk.f32.mxu1 %vm7045_vm5, %v7044_v59  ;;  %vm7065_vm7 = vmmov %vm7018_vm0 }
 0x342   : > { %4018 = vmatprep.mubr.msk.f32.mxu0 %vm7046_vm4, %v5651_v27  ;;  %v7056_v27 = vld [vmem:[#allocation80_spill] sm:$0xff]  ;;  %v2204_v14 = vpop.f32.mrf.mxu1  ;;  %vm7067_vm5 = vmmov %vm7018_vm0 }
 0x343   : > { %vm7068_vm4 = vmmov %vm7018_vm0 }
 0x344   : > { %4075 = vmatmul.mubr.msk.f32.gmra.mxu1 %vm7048_vm14, %v7047_v13  ;;  %vm7069_vm14 = vmmov %vm7018_vm0 }
 0x345   : > { %4019 = vmatmul.mubr.msk.f32.gmra.mxu0 %vm7049_vm11, %v7035_v22  ;;  %4077 = vmatprep.mubr.msk.f32.mxu1 %vm7051_vm2, %v7050_v32  ;;  %vm7070_vm11 = vmmov %vm7018_vm0 }
 0x346   : > { %4021 = vmatprep.mubr.msk.f32.mxu0 %vm7052_vm6, %v7038_v2  ;;  %vm7071_vm2 = vmmov %vm7018_vm0 }
 0x347   : > { %vm7072_vm6 = vmmov %vm7018_vm0 }
 0x348   : > { %4078 = vmatmul.mubr.msk.f32.gmra.mxu1 %vm7054_vm3, %v7053_v47  ;;  %vm7073_vm3 = vmmov %vm7018_vm0 }
 0x349   : > { %v3826_v41 = vpop.f32.mrf.mxu0  ;;  %4022 = vmatmul.mubr.msk.f32.gmra.mxu0 %vm7055_vm15, %v7041_v3  ;;  %4080 = vmatprep.mubr.msk.f32.mxu1 %vm7018_vm0, %v7056_v27  ;;  %vm7074_vm15 = vmmov %vm7018_vm0 }
 0x34a   : > { %v6215_v24 = vadd.f32 %v3876_v25, %v3826_v41  ;;  %4024 = vmatprep.mubr.msk.f32.mxu0 %vm7058_vm8, %v7044_v59 }
 0x34b   : > { %v1915_v0 = vpop.f32.mrf.mxu0 }
 0x34c   : > { %7057 = vst [vmem:[#allocation57_spill] sm:$0xff] %v6215_v24  ;;  %v6219_v54 = vadd.f32 %v2204_v14, %v1915_v0  ;;  %4081 = vmatmul.mubr.msk.f32.gmra.mxu1 %vm7060_vm12, %v5894_v55 }
 0x34d   : > { %4025 = vmatmul.mubr.msk.f32.gmra.mxu0 %vm7061_vm9, %v7047_v13  ;;  %4083 = vmatprep.mubr.msk.f32.mxu1 %vm7062_vm10, %v5938_v4 }
 0x34e   : > { %7059 = vst [vmem:[#allocation83_spill] sm:$0xff] %v6219_v54  ;;  %4027 = vmatprep.mubr.msk.f32.mxu0 %vm7063_vm13, %v7050_v32  ;;  %v7109_v54 = vld [vmem:[#allocation17_spill] sm:$0xff] }
 0x350   : > { %4084 = vmatmul.mubr.msk.f32.gmra.mxu1 %vm7064_vm1, %v5952_v39 }
 0x351   : > { %4028 = vmatmul.mubr.msk.f32.gmra.mxu0 %vm7065_vm7, %v7053_v47  ;;  %4086 = vmatprep.mubr.msk.f32.mxu1 %vm7067_vm5, %v7066_v58 }
 0x352   : > { %4030 = vmatprep.mubr.msk.f32.mxu0 %vm7068_vm4, %v7056_v27 }
 0x354   : > { %4087 = vmatmul.mubr.msk.f32.gmra.mxu1 %vm7069_vm14, %v6003_v30 }
 0x355   : > { %4031 = vmatmul.mubr.msk.f32.gmra.mxu0 %vm7070_vm11, %v5894_v55  ;;  %v3879_v37 = vpop.f32.mrf.mxu1 }
 0x356   : > { %4033 = vmatprep.mubr.msk.f32.mxu0 %vm7071_vm2, %v5938_v4 }
 0x357   : > { %v2216_v38 = vpop.f32.mrf.mxu1 }
 0x359   : > { %4034 = vmatmul.mubr.msk.f32.gmra.mxu0 %vm7072_vm6, %v5952_v39 }
 0x35a   : > { %4036 = vmatprep.mubr.msk.f32.mxu0 %vm7073_vm3, %v7066_v58 }
 0x35d   : > { %4037 = vmatmul.mubr.msk.f32.gmra.mxu0 %vm7074_vm15, %v6003_v30 }
 0x35e   : > { %v3829_v61 = vpop.f32.mrf.mxu0 }
 0x35f   : > { %v6249_v21 = vadd.f32 %v3879_v37, %v3829_v61 }
 0x360   : > { %v1935_v23 = vpop.f32.mrf.mxu0 }
 0x361   : > { %7075 = vst [vmem:[#allocation39_spill] sm:$0xff] %v6249_v21  ;;  %v6251_v7 = vadd.f32 %v2216_v38, %v1935_v23 }
 0x363   : > { %7076 = vst [vmem:[#allocation62_spill] sm:$0xff] %v6251_v7 }
 0x375   : > { %v3882_v55 = vpop.f32.mrf.mxu1 }
 0x377   : > { %v2228_v39 = vpop.f32.mrf.mxu1 }
 0x37f   : > { %v3832_v4 = vpop.f32.mrf.mxu0 }
 0x380   : > { %v6254_v19 = vadd.f32 %v3882_v55, %v3832_v4 }
 0x381   : > { %v1955_v43 = vpop.f32.mrf.mxu0 }
 0x382   : > { %7077 = vst [vmem:[#allocation18_spill] sm:$0xff] %v6254_v19  ;;  %v6256_v62 = vadd.f32 %v2228_v39, %v1955_v43  ;;  %v7103_v19 = vld [vmem:[#allocation14_spill] sm:$0xff] }
 0x384   : > { %7078 = vst [vmem:[#allocation87_spill] sm:$0xff] %v6256_v62 }
 0x38e   : > { %v3885_v53 = vpop.f32.mrf.mxu1 }
 0x390   : > { %v2240_v30 = vpop.f32.mrf.mxu1 }
 0x396   : > { %v3835_v46 = vpop.f32.mrf.mxu0 }
 0x397   : > { %v6258_v48 = vadd.f32 %v3885_v53, %v3835_v46 }
 0x398   : > { %v1975_v29 = vpop.f32.mrf.mxu0 }
 0x399   : > { %7079 = vst [vmem:[#allocation8_spill] sm:$0xff] %v6258_v48  ;;  %v6260_v35 = vadd.f32 %v2240_v30, %v1975_v29 }
 0x39b   : > { %7080 = vst [vmem:[#allocation19_spill] sm:$0xff] %v6260_v35 }
 0x3a4   : > { %v3888_v11 = vpop.f32.mrf.mxu1 }
 0x3a6   : > { %v2252_v17 = vpop.f32.mrf.mxu1 }
 0x3a8   : > { %v6262_v33 = vpop.f32.mrf.mxu1 }
 0x3aa   : > { %v6264_v36 = vpop.f32.mrf.mxu1 }
 0x3ac   : > { %v6266_v6 = vpop.f32.mrf.mxu1 }
 0x3ad   : > { %v3838_v31 = vpop.f32.mrf.mxu0 }
 0x3ae   : > { %v6268_v63 = vadd.f32 %v3888_v11, %v3838_v31  ;;  %v6270_v52 = vpop.f32.mrf.mxu1 }
 0x3af   : > { %v1995_v9 = vpop.f32.mrf.mxu0 }
 0x3b0   : > { %7081 = vst [vmem:[#allocation38_spill] sm:$0xff] %v6268_v63  ;;  %v6272_v51 = vadd.f32 %v2252_v17, %v1995_v9  ;;  %v6274_v34 = vpop.f32.mrf.mxu1 }
 0x3b1   : > { %v3899_v42 = vpop.f32.mrf.mxu0 }
 0x3b2   : > { %7082 = vst [vmem:[#allocation59_spill] sm:$0xff] %v6272_v51  ;;  %v6276_v45 = vpop.f32.mrf.mxu1 }
 0x3b3   : > { %v2338_v60 = vpop.f32.mrf.mxu0 }
 0x3b4   : > { %v6278_v40 = vpop.f32.mrf.mxu1 }
 0x3b5   : > { %v3902_v18 = vpop.f32.mrf.mxu0 }
 0x3b6   : > { %v6280_v8 = vpop.f32.mrf.mxu1 }
 0x3b7   : > { %v2352_v1 = vpop.f32.mrf.mxu0 }
 0x3b8   : > { %v6282_v49 = vpop.f32.mrf.mxu1 }
 0x3b9   : > { %v3905_v44 = vpop.f32.mrf.mxu0 }
 0x3ba   : > { %v6284_v16 = vpop.f32.mrf.mxu1 }
 0x3bb   : > { %v6286_v28 = vpop.f32.mrf.mxu0 }
 0x3bc   : > { %v6288_v5 = vpop.f32.mrf.mxu1 }
 0x3bd   : > { %v6290_v22 = vpop.f32.mrf.mxu0 }
 0x3be   : > { %v6292_v2 = vpop.f32.mrf.mxu1 }
 0x3bf   : > { %v6294_v3 = vpop.f32.mrf.mxu0 }
 0x3c0   : > { %v6296_v59 = vpop.f32.mrf.mxu1 }
 0x3c1   : > { %v6298_v13 = vpop.f32.mrf.mxu0 }
 0x3c2   : > { %v6300_v32 = vpop.f32.mrf.mxu1 }
 0x3c3   : > { %v6302_v25 = vpop.f32.mrf.mxu0 }
 0x3c4   : > { %v6304_v47 = vpop.f32.mrf.mxu1 }
 0x3c5   : > { %v6306_v41 = vpop.f32.mrf.mxu0 }
 0x3c6   : > { %v6308_v27 = vpop.f32.mrf.mxu1 }
 0x3c7   : > { %v6310_v14 = vpop.f32.mrf.mxu0 }
 0x3c8   : > { %v6312_v0 = vpop.f32.mrf.mxu1 }
 0x3c9   : > { %7083 = vst [vmem:[#allocation92_spill] sm:$0xff] %v6312_v0  ;;  %v6314_v58 = vpop.f32.mrf.mxu0 }
 0x3ca   : > { %v6316_v37 = vpop.f32.mrf.mxu1 }
 0x3cb   : > { %7084 = vst [vmem:[#allocation110_spill] sm:$0xff] %v6316_v37  ;;  %v6318_v61 = vpop.f32.mrf.mxu0  ;;  %v7108_v37 = vld [vmem:[#allocation85_spill] sm:$0xff] }
 0x3cc   : > { %v6320_v38 = vpop.f32.mrf.mxu1 }
 0x3cd   : > { %7085 = vst [vmem:[#allocation9_spill] sm:$0xff] %v6320_v38  ;;  %v6322_v23 = vpop.f32.mrf.mxu0 }
 0x3ce   : > { %v6324_v55 = vpop.f32.mrf.mxu1 }
 0x3cf   : > { %7086 = vst [vmem:[#allocation11_spill] sm:$0xff] %v6324_v55  ;;  %v6326_v4 = vpop.f32.mrf.mxu0  ;;  %v2346_v55 = vadd.f32 %v3899_v42, %v7103_v19 }
 0x3d0   : > { %v6328_v39 = vpop.f32.mrf.mxu1 }
 0x3d1   : > { %7087 = vst [vmem:[#allocation10_spill] sm:$0xff] %v6328_v39  ;;  %v6330_v43 = vpop.f32.mrf.mxu0 }
 0x3d2   : > { %v6332_v53 = vpop.f32.mrf.mxu1 }
 0x3d3   : > { %7088 = vst [vmem:[#allocation21_spill] sm:$0xff] %v6332_v53  ;;  %v6334_v46 = vpop.f32.mrf.mxu0 }
 0x3d4   : > { %v6336_v30 = vpop.f32.mrf.mxu1 }
 0x3d5   : > { %7089 = vst [vmem:[#allocation40_spill] sm:$0xff] %v6336_v30  ;;  %v6338_v29 = vpop.f32.mrf.mxu0 }
 0x3d6   : > { %7090 = vst [vmem:[#allocation41_spill] sm:$0xff] %v6338_v29  ;;  %v6340_v11 = vpop.f32.mrf.mxu1 }
 0x3d7   : > { %7091 = vst [vmem:[#allocation61_spill] sm:$0xff] %v6340_v11  ;;  %v6342_v17 = vpop.f32.mrf.mxu0 }
 0x3d8   : > { %7092 = vst [vmem:[#allocation20_spill] sm:$0xff] %v6342_v17  ;;  %v6344_v31 = vpop.f32.mrf.mxu1 }
 0x3d9   : > { %7093 = vst [vmem:[#allocation94_spill] sm:$0xff] %v6344_v31  ;;  %v6346_v9 = vpop.f32.mrf.mxu0 }
 0x3da   : > { %7094 = vst [vmem:[#allocation64_spill] sm:$0xff] %v6346_v9  ;;  %v6348_v51 = vpop.f32.mrf.mxu1 }
 0x3db   : > { %7095 = vst [vmem:[#allocation90_spill] sm:$0xff] %v6348_v51  ;;  %v6350_v63 = vpop.f32.mrf.mxu0 }
 0x3dc   : > { %7096 = vst [vmem:[#allocation13_spill] sm:$0xff] %v6350_v63  ;;  %v6352_v35 = vpop.f32.mrf.mxu1  ;;  %v7105_v63 = vld [vmem:[#allocation7_spill] sm:$0xff] }
 0x3dd   : > { %7097 = vst [vmem:[#allocation23_spill] sm:$0xff] %v6352_v35  ;;  %v6354_v48 = vpop.f32.mrf.mxu0  ;;  %v2339_v38 = vadd.f32 %v2338_v60, %v7105_v63  ;;  %v2374_v63 = vadd.f32 %v3905_v44, %v7109_v54 }
 0x3de   : > { %7098 = vst [vmem:[#allocation42_spill] sm:$0xff] %v6354_v48  ;;  %v6356_v30 = vpop.f32.mrf.mxu1 }
 0x3df   : > { %7099 = vst [vmem:[#allocation43_spill] sm:$0xff] %v6356_v30  ;;  %v6358_v53 = vpop.f32.mrf.mxu0  ;;  %v7107_v30 = vld [vmem:[#allocation82_spill] sm:$0xff]  ;;  %v2605_v42 = vadd.f32 %v6264_v36, %v2339_v38 }
 0x3e0   : > { %7100 = vst [vmem:[#allocation22_spill] sm:$0xff] %v6358_v53  ;;  %v4049_v11 = vpop.f32.mrf.mxu1  ;;  %v2360_v53 = vadd.f32 %v3902_v18, %v7107_v30  ;;  %v7110_v18 = vld [vmem:[#allocation36_spill] sm:$0xff] }
 0x3e1   : > { %v6360_v62 = vpop.f32.mrf.mxu0  ;;  %v2367_v30 = vadd.f32 %v6286_v28, %v7110_v18 }
 0x3e2   : > { %7101 = vst [vmem:[#allocation66_spill] sm:$0xff] %v6360_v62  ;;  %v3140_v39 = vpop.f32.mrf.mxu1  ;;  %v2613_v62 = vadd.f32 %v6262_v33, %v2346_v55  ;;  %v2629_v29 = vadd.f32 %v6266_v6, %v2360_v53  ;;  %v7112_v55 = vld [vmem:[#allocation16_spill] sm:$0xff] }
 0x3e3   : > { %v6362_v31 = vpop.f32.mrf.mxu0  ;;  %v2637_v53 = vadd.f32 %v6276_v45, %v2367_v30 }
 0x3e4   : > { %7102 = vst [vmem:[#allocation93_spill] sm:$0xff] %v6362_v31  ;;  %v4052_v51 = vpop.f32.mrf.mxu1  ;;  %v2353_v31 = vadd.f32 %v2352_v1, %v7108_v37  ;;  %v2645_v37 = vadd.f32 %v6274_v34, %v2374_v63  ;;  %v7114_v63 = vld [vmem:[#allocation81_spill] sm:$0xff] }
 0x3e5   : > { %v6365_v7 = vpop.f32.mrf.mxu0 }
 0x3e6   : > { %7104 = vst [vmem:[#allocation111_spill] sm:$0xff] %v6365_v7  ;;  %v3152_v35 = vpop.f32.mrf.mxu1  ;;  %v2621_v54 = vadd.f32 %v6270_v52, %v2353_v31 }
 0x3e7   : > { %v6368_v9 = vpop.f32.mrf.mxu0 }
 0x3e8   : > { %7106 = vst [vmem:[#allocation12_spill] sm:$0xff] %v6368_v9  ;;  %v4055_v48 = vpop.f32.mrf.mxu1 }
 0x3e9   : > { %v3999_v21 = vpop.f32.mrf.mxu0 }
 0x3ea   : > { %v2910_v17 = vadd.f32 %v3999_v21, %v2613_v62  ;;  %v3164_v19 = vpop.f32.mrf.mxu1 }
 0x3eb   : > { %v2903_v7 = vpop.f32.mrf.mxu0 }
 0x3ec   : > { %v3147_v60 = vadd.f32 %v4049_v11, %v2910_v17  ;;  %v2904_v0 = vadd.f32 %v2903_v7, %v2605_v42  ;;  %v4058_v9 = vpop.f32.mrf.mxu1  ;;  %v7111_v7 = vld [vmem:[#allocation37_spill] sm:$0xff]  ;;  %v7113_v11 = vld [vmem:[#allocation60_spill] sm:$0xff] }
 0x3ed   : > { %v4002_v24 = vpop.f32.mrf.mxu0  ;;  %v2388_v6 = vadd.f32 %v6290_v22, %v7111_v7 }
 0x3ee   : > { %3307 = vst [vmem:[%s6380_s14 + $0x8] sm:$0xff] %v3147_v60  ;;  %v3141_v21 = vadd.f32 %v3140_v39, %v2904_v0  ;;  %v2922_v62 = vadd.f32 %v4002_v24, %v2629_v29  ;;  %v3176_v33 = vpop.f32.mrf.mxu1  ;;  %v2381_v0 = vadd.f32 %v6294_v3, %v7112_v55 }
 0x3ef   : > { %v2915_v36 = vpop.f32.mrf.mxu0  ;;  %v2661_v31 = vadd.f32 %v6278_v40, %v2388_v6 }
 0x3f0   : > { %3306 = vst [vmem:[%s6380_s14] sm:$0xff] %v3141_v21  ;;  %v3159_v1 = vadd.f32 %v4052_v51, %v2922_v62  ;;  %v2916_v44 = vadd.f32 %v2915_v36, %v2621_v54  ;;  %v4061_v28 = vpop.f32.mrf.mxu1  ;;  %v2402_v51 = vadd.f32 %v6298_v13, %v7113_v11  ;;  %v2653_v18 = vadd.f32 %v6280_v8, %v2381_v0 }
 0x3f1   : > { %v4005_v38 = vpop.f32.mrf.mxu0 }
 0x3f2   : > { %3309 = vst [vmem:[%s6380_s14 + $0x18] sm:$0xff] %v3159_v1  ;;  %v3153_v24 = vadd.f32 %v3152_v35, %v2916_v44  ;;  %v2934_v39 = vadd.f32 %v4005_v38, %v2645_v37  ;;  %v3188_v52 = vpop.f32.mrf.mxu1  ;;  %v2395_v35 = vadd.f32 %v6302_v25, %v7114_v63  ;;  %v2677_v62 = vadd.f32 %v6282_v49, %v2402_v51  ;;  %v7117_v63 = vld [vmem:[#allocation92_spill] sm:$0xff] }
 0x3f3   : > { %v2927_v29 = vpop.f32.mrf.mxu0  ;;  %v2409_v25 = vadd.f32 %v6310_v14, %v6022_v50  ;;  %v2423_v50 = vadd.f32 %v6318_v61, %v6074_v10  ;;  %v2437_v10 = vadd.f32 %v6326_v4, %v6110_v15  ;;  %v2451_v15 = vadd.f32 %v6334_v46, %v6169_v26  ;;  %v7119_v26 = vld [vmem:[#allocation20_spill] sm:$0xff] }
 0x3f4   : > { %3308 = vst [vmem:[%s6380_s14 + $0x10] sm:$0xff] %v3153_v24  ;;  %v3171_v22 = vadd.f32 %v4055_v48, %v2934_v39  ;;  %v2928_v17 = vadd.f32 %v2927_v29, %v2637_v53  ;;  %v4064_v34 = vpop.f32.mrf.mxu1  ;;  %v2416_v48 = vadd.f32 %v6306_v41, %v6017_v57  ;;  %v2669_v7 = vadd.f32 %v6284_v16, %v2395_v35 }
 0x3f5   : > { %v4008_v42 = vpop.f32.mrf.mxu0  ;;  %v2430_v57 = vadd.f32 %v6314_v58, %v6071_v20  ;;  %v2685_v37 = vadd.f32 %v6292_v2, %v2409_v25  ;;  %v2444_v20 = vadd.f32 %v6322_v23, %v6106_v12  ;;  %v2701_v39 = vadd.f32 %v6300_v32, %v2423_v50 }
 0x3f6   : > { %3311 = vst [vmem:[%s6380_s14 + $0x28] sm:$0xff] %v3171_v22  ;;  %v3165_v3 = vadd.f32 %v3164_v19, %v2928_v17  ;;  %v2946_v60 = vadd.f32 %v4008_v42, %v2661_v31  ;;  %v3200_v45 = vpop.f32.mrf.mxu1  ;;  %v2693_v1 = vadd.f32 %v6288_v5, %v2416_v48  ;;  %v2458_v12 = vadd.f32 %v6330_v43, %v6165_v56  ;;  %v7116_v56 = vld [vmem:[#allocation41_spill] sm:$0xff] }
 0x3f7   : > { %v2939_v30 = vpop.f32.mrf.mxu0  ;;  %v2709_v55 = vadd.f32 %v6296_v59, %v2430_v57  ;;  %v2725_v29 = vadd.f32 %v6304_v47, %v2444_v20  ;;  %v2717_v22 = vadd.f32 %v6308_v27, %v2437_v10  ;;  %v7125_v57 = vld [vmem:[#allocation13_spill] sm:$0xff]  ;;  %v7129_v20 = vld [vmem:[#allocation10_spill] sm:$0xff] }
 0x3f8   : > { %3310 = vst [vmem:[%s6380_s14 + $0x20] sm:$0xff] %v3165_v3  ;;  %v3183_v13 = vadd.f32 %v4058_v9, %v2946_v60  ;;  %v2940_v21 = vadd.f32 %v2939_v30, %v2653_v18  ;;  %v4067_v40 = vpop.f32.mrf.mxu1  ;;  %v2741_v35 = vadd.f32 %v7117_v63, %v2458_v12  ;;  %v7118_v60 = vld [vmem:[#allocation83_spill] sm:$0xff]  ;;  %v7120_v30 = vld [vmem:[#allocation110_spill] sm:$0xff]  ;;  %v7133_v12 = vld [vmem:[#allocation8_spill] sm:$0xff] }
 0x3f9   : > { %v4011_v54 = vpop.f32.mrf.mxu0  ;;  %v2465_v46 = vadd.f32 %v7119_v26, %v7118_v60  ;;  %v2733_v48 = vadd.f32 %v7120_v30, %v2451_v15  ;;  %v7139_v63 = vld [vmem:[#allocation38_spill] sm:$0xff]  ;;  %v7142_v30 = vld [vmem:[#allocation59_spill] sm:$0xff] }
 0x3fa   : > { %3313 = vst [vmem:[%s6380_s14 + $0x38] sm:$0xff] %v3183_v13  ;;  %v3177_v19 = vadd.f32 %v3176_v33, %v2940_v21  ;;  %v2958_v36 = vadd.f32 %v4011_v54, %v2677_v62  ;;  %v3212_v8 = vpop.f32.mrf.mxu1  ;;  %v7121_v21 = vld [vmem:[#allocation39_spill] sm:$0xff]  ;;  %v7141_v26 = vld [vmem:[#allocation94_spill] sm:$0xff] }
 0x3fb   : > { %v2951_v6 = vpop.f32.mrf.mxu0 }
 0x3fc   : > { %3312 = vst [vmem:[%s6380_s14 + $0x30] sm:$0xff] %v3177_v19  ;;  %v3195_v41 = vadd.f32 %v4061_v28, %v2958_v36  ;;  %v2952_v9 = vadd.f32 %v2951_v6, %v2669_v7  ;;  %v4070_v49 = vpop.f32.mrf.mxu1  ;;  %v7123_v19 = vld [vmem:[#allocation9_spill] sm:$0xff]  ;;  %v7124_v6 = vld [vmem:[#allocation62_spill] sm:$0xff] }
 0x3fd   : > { %v4014_v44 = vpop.f32.mrf.mxu0 }
 0x3fe   : > { %3315 = vst [vmem:[%s6380_s14 + $0x48] sm:$0xff] %v3195_v41  ;;  %v3189_v14 = vadd.f32 %v3188_v52, %v2952_v9  ;;  %v2970_v33 = vadd.f32 %v4014_v44, %v2693_v1  ;;  %v3224_v16 = vpop.f32.mrf.mxu1  ;;  %v2479_v41 = vadd.f32 %v7125_v57, %v7124_v6  ;;  %v7126_v1 = vld [vmem:[#allocation11_spill] sm:$0xff] }
 0x3ff   : > { %v2963_v38 = vpop.f32.mrf.mxu0  ;;  %v2749_v44 = vadd.f32 %v7126_v1, %v2465_v46 }
 0x400   : > { %3314 = vst [vmem:[%s6380_s14 + $0x40] sm:$0xff] %v3189_v14  ;;  %v3207_v58 = vadd.f32 %v4064_v34, %v2970_v33  ;;  %v2964_v28 = vadd.f32 %v2963_v38, %v2685_v37  ;;  %v4073_v5 = vpop.f32.mrf.mxu1  ;;  %v7115_v34 = vld [vmem:[#allocation57_spill] sm:$0xff]  ;;  %v7127_v14 = vld [vmem:[#allocation18_spill] sm:$0xff] }
 0x401   : > { %v4017_v0 = vpop.f32.mrf.mxu0  ;;  %v2472_v43 = vadd.f32 %v7116_v56, %v7115_v34  ;;  %v7128_v33 = vld [vmem:[#allocation42_spill] sm:$0xff] }
 0x402   : > { %3317 = vst [vmem:[%s6380_s14 + $0x58] sm:$0xff] %v3207_v58  ;;  %v3201_v61 = vadd.f32 %v3200_v45, %v2964_v28  ;;  %v2982_v24 = vadd.f32 %v4017_v0, %v2709_v55  ;;  %v3236_v2 = vpop.f32.mrf.mxu1  ;;  %v7130_v55 = vld [vmem:[#allocation87_spill] sm:$0xff]  ;;  %v7131_v0 = vld [vmem:[#allocation22_spill] sm:$0xff] }
 0x403   : > { %v2975_v52 = vpop.f32.mrf.mxu0  ;;  %v2757_v36 = vadd.f32 %v7123_v19, %v2472_v43  ;;  %v2493_v10 = vadd.f32 %v7131_v0, %v7130_v55  ;;  %v7138_v43 = vld [vmem:[#allocation61_spill] sm:$0xff] }
 0x404   : > { %3316 = vst [vmem:[%s6380_s14 + $0x50] sm:$0xff] %v3201_v61  ;;  %v3219_v23 = vadd.f32 %v4067_v40, %v2982_v24  ;;  %v2976_v53 = vadd.f32 %v2975_v52, %v2701_v39  ;;  %v4076_v59 = vpop.f32.mrf.mxu1  ;;  %v7122_v40 = vld [vmem:[#allocation64_spill] sm:$0xff] }
 0x405   : > { %v4020_v11 = vpop.f32.mrf.mxu0  ;;  %v2486_v62 = vadd.f32 %v7122_v40, %v7121_v21  ;;  %v7144_v40 = vld [vmem:[#allocation90_spill] sm:$0xff] }
 0x406   : > { %3319 = vst [vmem:[%s6380_s14 + $0x68] sm:$0xff] %v3219_v23  ;;  %v3213_v4 = vadd.f32 %v3212_v8, %v2976_v53  ;;  %v2994_v51 = vadd.f32 %v4020_v11, %v2725_v29  ;;  %v3248_v32 = vpop.f32.mrf.mxu1  ;;  %v7134_v23 = vld [vmem:[#allocation66_spill] sm:$0xff]  ;;  %v7135_v11 = vld [vmem:[#allocation40_spill] sm:$0xff] }
 0x407   : > { %v2987_v17 = vpop.f32.mrf.mxu0  ;;  %v2773_v58 = vadd.f32 %v7129_v20, %v2486_v62  ;;  %v2514_v53 = vadd.f32 %v7134_v23, %v7133_v12 }
 0x408   : > { %3318 = vst [vmem:[%s6380_s14 + $0x60] sm:$0xff] %v3213_v4  ;;  %v3231_v31 = vadd.f32 %v4070_v49, %v2994_v51  ;;  %v2988_v42 = vadd.f32 %v2987_v17, %v2717_v22  ;;  %v4079_v47 = vpop.f32.mrf.mxu1  ;;  %v7136_v22 = vld [vmem:[#allocation19_spill] sm:$0xff]  ;;  %v7137_v17 = vld [vmem:[#allocation93_spill] sm:$0xff] }
 0x409   : > { %v4023_v3 = vpop.f32.mrf.mxu0  ;;  %v2507_v34 = vadd.f32 %v7137_v17, %v7136_v22  ;;  %v2805_v46 = vadd.f32 %v7141_v26, %v2514_v53 }
 0x40a   : > { %3321 = vst [vmem:[%s6380_s14 + $0x78] sm:$0xff] %v3231_v31  ;;  %v3225_v45 = vadd.f32 %v3224_v16, %v2988_v42  ;;  %v3006_v18 = vadd.f32 %v4023_v3, %v2741_v35  ;;  %v3260_v27 = vpop.f32.mrf.mxu1  ;;  %v2500_v16 = vadd.f32 %v7128_v33, %v7127_v14  ;;  %v2781_v31 = vadd.f32 %v7138_v43, %v2493_v10  ;;  %v7140_v35 = vld [vmem:[#allocation111_spill] sm:$0xff] }
 0x40b   : > { %v2999_v13 = vpop.f32.mrf.mxu0  ;;  %v2528_v3 = vadd.f32 %v7140_v35, %v7139_v63  ;;  %v2797_v62 = vadd.f32 %v7144_v40, %v2507_v34 }
 0x40c   : > { %3320 = vst [vmem:[%s6380_s14 + $0x70] sm:$0xff] %v3225_v45  ;;  %v3243_v54 = vadd.f32 %v4073_v5, %v3006_v18  ;;  %v3000_v25 = vadd.f32 %v2999_v13, %v2733_v48  ;;  %v4082_v8 = vpop.f32.mrf.mxu1  ;;  %v2789_v15 = vadd.f32 %v7135_v11, %v2500_v16  ;;  %v7143_v48 = vld [vmem:[#allocation12_spill] sm:$0xff] }
 0x40d   : > { %v4026_v7 = vpop.f32.mrf.mxu0  ;;  %v2521_v13 = vadd.f32 %v7143_v48, %v7142_v30 }
 0x40e   : > { %3323 = vst [vmem:[%s6380_s14 + $0x88] sm:$0xff] %v3243_v54  ;;  %v3237_v9 = vadd.f32 %v3236_v2, %v3000_v25  ;;  %v3018_v49 = vadd.f32 %v4026_v7, %v2757_v36  ;;  %v3272_v28 = vpop.f32.mrf.mxu1  ;;  %v7132_v2 = vld [vmem:[#allocation21_spill] sm:$0xff]  ;;  %v7145_v36 = vld [vmem:[#allocation23_spill] sm:$0xff] }
 0x40f   : > { %v3011_v50 = vpop.f32.mrf.mxu0  ;;  %v2765_v39 = vadd.f32 %v7132_v2, %v2479_v41 }
 0x410   : > { %3322 = vst [vmem:[%s6380_s14 + $0x80] sm:$0xff] %v3237_v9  ;;  %v3255_v37 = vadd.f32 %v4076_v59, %v3018_v49  ;;  %v3012_v38 = vadd.f32 %v3011_v50, %v2749_v44  ;;  %v4085_v4 = vpop.f32.mrf.mxu1  ;;  %v7146_v9 = vld [vmem:[#allocation43_spill] sm:$0xff] }
 0x411   : > { %v4029_v5 = vpop.f32.mrf.mxu0  ;;  %v2813_v49 = vadd.f32 %v7146_v9, %v2521_v13 }
 0x412   : > { %3325 = vst [vmem:[%s6380_s14 + $0x98] sm:$0xff] %v3255_v37  ;;  %v3249_v61 = vadd.f32 %v3248_v32, %v3012_v38  ;;  %v3030_v24 = vadd.f32 %v4029_v5, %v2773_v58  ;;  %v3284_v45 = vpop.f32.mrf.mxu1 }
 0x413   : > { %v3023_v52 = vpop.f32.mrf.mxu0 }
 0x414   : > { %3324 = vst [vmem:[%s6380_s14 + $0x90] sm:$0xff] %v3249_v61  ;;  %v3267_v59 = vadd.f32 %v4079_v47, %v3030_v24  ;;  %v3024_v29 = vadd.f32 %v3023_v52, %v2765_v39  ;;  %v4088_v7 = vpop.f32.mrf.mxu1 }
 0x415   : > { %v4032_v51 = vpop.f32.mrf.mxu0 }
 0x416   : > { %3327 = vst [vmem:[%s6380_s14 + $0xa8] sm:$0xff] %v3267_v59  ;;  %v3261_v32 = vadd.f32 %v3260_v27, %v3024_v29  ;;  %v3042_v56 = vadd.f32 %v4032_v51, %v2789_v15  ;;  %v3296_v14 = vpop.f32.mrf.mxu1 }
 0x417   : > { %v3035_v42 = vpop.f32.mrf.mxu0 }
 0x418   : > { %3326 = vst [vmem:[%s6380_s14 + $0xa0] sm:$0xff] %v3261_v32  ;;  %v3279_v47 = vadd.f32 %v4082_v8, %v3042_v56  ;;  %v3036_v60 = vadd.f32 %v3035_v42, %v2781_v31  ;;  %v2821_v8 = vadd.f32 %v7145_v36, %v2528_v3 }
 0x419   : > { %v4035_v18 = vpop.f32.mrf.mxu0 }
 0x41a   : > { %3329 = vst [vmem:[%s6380_s14 + $0xb8] sm:$0xff] %v3279_v47  ;;  %v3273_v27 = vadd.f32 %v3272_v28, %v3036_v60  ;;  %v3054_v21 = vadd.f32 %v4035_v18, %v2805_v46 }
 0x41b   : > { %v3047_v54 = vpop.f32.mrf.mxu0 }
 0x41c   : > { %3328 = vst [vmem:[%s6380_s14 + $0xb0] sm:$0xff] %v3273_v27  ;;  %v3291_v25 = vadd.f32 %v4085_v4, %v3054_v21  ;;  %v3048_v19 = vadd.f32 %v3047_v54, %v2797_v62 }
 0x41d   : > { %v4038_v6 = vpop.f32.mrf.mxu0 }
 0x41e   : > { %3331 = vst [vmem:[%s6380_s14 + $0xc8] sm:$0xff] %v3291_v25  ;;  %v3285_v57 = vadd.f32 %v3284_v45, %v3048_v19  ;;  %v3066_v41 = vadd.f32 %v4038_v6, %v2821_v8 }
 0x41f   : > { %v3059_v1 = vpop.f32.mrf.mxu0 }
 0x420   : > { %3330 = vst [vmem:[%s6380_s14 + $0xc0] sm:$0xff] %v3285_v57  ;;  %v3303_v44 = vadd.f32 %v4088_v7, %v3066_v41  ;;  %v3060_v50 = vadd.f32 %v3059_v1, %v2813_v49  ;;  %3341 = sbr.rel (!%p4350_p5) target bundleno = 1088 (0x440), region = 32 }
 0x422   : > { %3333 = vst [vmem:[%s6380_s14 + $0xd8] sm:$0xff] %v3303_v44  ;;  %v3297_v33 = vadd.f32 %v3296_v14, %v3060_v50 }
 0x424   : > { %3332 = vst [vmem:[%s6380_s14 + $0xd0] sm:$0xff] %v3297_v33 }
 0x425   : > { %s7152_s17 = smov (!%p3344_p11, %s3343_s17), 28 }
 0x426   : > { %s6486_s22 = sshll.u32 %s7152_s17, 7 }
 0x427   : > { %s3348_s23 = ssub.s32 3584, %s6486_s22 }
 0x428   : > { %3349 = vsyncadd %s6481_s16, %s3348_s23  ;;  %p3534_p12 = scmp.ne.s32.totalorder %s6486_s22, 0  ;;  %s3540_s24 = smul.u32 3584, %s4333_s13 }
 0x429   : > { %s3354_s25 = sshll.u32 %s6380_s14, 4  ;;  %s4294_s28 = smov [#allocation2]   ;;  %s6498_s25 = int_to_ptr.vmem [resolvable:$true] %s3354_s25 }
 0x42a   : > { %s6496_s27 = scalar_lea.hbm %s6543_s2, %s3540_s24  ;;  %s4223_s21 = scalar_lea.vmem %s6498_s25, %s6486_s22 }
 0x42b   : > { %p4224_p13 = scmp.ne.s32.totalorder %s6498_s25, %s4223_s21  ;;  %s4227_s29 = sshll.u32 %s4294_s28, 4  ;;  %s4228_s29 = int_to_ptr.vmem [resolvable:$false] %s4227_s29 }
 0x42c   : > { %s4229_s13 = scalar_lea.vmem %s4228_s29, 7168  ;;  %p4230_p2 = scmp.lt.s32.totalorder %s6498_s25, %s4228_s29 }
 0x42d   : > { %p4225_p0 = pnand %p4224_p13, %p3534_p12  ;;  %p4231_p3 = scmp.lt.s32.totalorder %s4229_s13, %s4223_s21 }
 0x42f   : > { %p4226_p1 = pneg %p4225_p0  ;;  %p4232_p4 = por %p4231_p3, %p4230_p2 }
 0x431   : > { %p4233_p5 = pnand %p4232_p4, %p4226_p1 }
 0x433   : > { %4236 = shalt.err (!%p4233_p5)
}
 0x434   : > { %s4237_s30 = scalar_lea.hbm %s6496_s27, %s6486_s22  ;;  %s4241_s5 = scalar_lea.hbm %s6543_s2, 6272 }
 0x435   : > { %p4238_p7 = scmp.ne.s32.totalorder %s6496_s27, %s4237_s30  ;;  %p4242_p10 = scmp.lt.s32.totalorder %s6496_s27, %s6543_s2 }
 0x436   : > { %p4243_p11 = scmp.lt.s32.totalorder %s4241_s5, %s4237_s30 }
 0x437   : > { %p4239_p8 = pnand %p4238_p7, %p3534_p12 }
 0x438   : > { %p4244_p13 = por %p4243_p11, %p4242_p10 }
 0x439   : > { %p4240_p9 = pneg %p4239_p8 }
 0x43b   : > { %p4245_p0 = pnand %p4244_p13, %p4240_p9 }
 0x43d   : > { %4248 = shalt.err (!%p4245_p0)
}
 0x43e   : > { %s4295_s8 = smov 128   ;;  %s4296_s14 = smov 8  }
 0x43f   : > { %3360 = dma.vmem_to_hbm [thread:$0]  (%p3534_p12), %s6498_s25, %s6486_s22, %s6496_s27, %s6481_s16, %s4295_s8, %s4295_s8, %s4296_s14  }
 0x440 PF: > { %p4108_p1 = scmp.ge.s32.totalorder %s4283_s12, 2  ;;  %s3369_s17 = sand.u32 1, %s4271_s9  }
 0x441   : > { %s3370_s23 = scalar_lea.sflag [#allocation3], %s3369_s17 }
 0x442   : > { %p4105_p2 = pnand %p4108_p1, %p4354_p6 }
 0x444   : > { %p4106_p3 = pneg %p4105_p2 }
 0x446   : > { %4266 = dma.done.wait (%p4106_p3), %s3370_s23, 3584  }
 0x447   : > { %4268 = vsyncadd (%p4106_p3), %s3370_s23, 4294963712  ;;  %p12_p4 = scmp.ge.s32.totalorder %s4337_s15, 4   ;;  %s7147_s9 = smov %s4275_s10 }
 0x448   : > { %s7148_s10 = smov %s4279_s11  ;;  %s7149_s11 = smov %s4348_s18 }
 0x449   : > { %s7150_s12 = smov %s4337_s15  ;;  %14 = sbr.rel (!%p12_p4) target bundleno = 3 (0x3), region = 63 }
 0x44e   :  { %3375 = vsyncpa [#allocation3], 1 }
 0x44f   :  { %3377 = vsyncpa [#allocation3 + $0x1], 1 }

</bundles_post_ra>
